<compile_context>
chip_gen: v7x
topology: tpu7x:2x2x1
jax: 0.10.0
libtpu: 0.0.40
codegen_flags: <defaults>
</compile_context>

<pallas_src>
import functools

import jax
import jax.numpy as jnp
from jax.experimental import pallas as pl
from jax.experimental.pallas import tpu as pltpu


# ----------------------------- Pallas kernel ------------------------------ #
def _pointnetfeat_kernel(x_ref, w1_ref, b1_ref, w2_ref, b2_ref, w3_ref, b3_ref,
                         out_ref, *, n_valid):
    """Grid = (batch_block [parallel], point_tile [arbitrary / reduction]).

    x_ref   : (TB, TN, 4)    bf16 point tile
    w1_ref  : (4, 64)    bf16    b1_ref : (1, 64)    f32
    w2_ref  : (64, 128)  bf16    b2_ref : (1, 128)   f32
    w3_ref  : (128, 1024) bf16   b3_ref : (1, 1024)  f32
    out_ref : (TB, 1024) f32     running max over point tiles (resident)
    """
    n = pl.program_id(1)                      # point-tile (reduction) axis
    TB, TN, CIN = x_ref.shape

    # Collapse batch tile so each layer is one large 2-D MXU matmul.
    x = x_ref[...].reshape(TB * TN, CIN)                             # (M, 4)

    # conv1 + bn1 + relu  (4 -> 64), bf16 on the MXU, f32 accumulate.
    h = jnp.dot(x, w1_ref[...], preferred_element_type=jnp.float32) + b1_ref[...]
    h = jnp.maximum(h, 0.0)

    # conv2 + bn2 + relu  (64 -> 128)
    h = jnp.dot(h.astype(jnp.bfloat16), w2_ref[...],
                preferred_element_type=jnp.float32) + b2_ref[...]
    h = jnp.maximum(h, 0.0)

    # conv3 + bn3  (128 -> 1024)
    h = jnp.dot(h.astype(jnp.bfloat16), w3_ref[...],
                preferred_element_type=jnp.float32) + b3_ref[...]
    h = h.reshape(TB, TN, 1024)

    # Mask rows of the (possibly ragged) last tile to -inf so padded / OOB
    # points never win the max.  Static condition: only emitted when needed.
    if n_valid % TN != 0:
        row = jax.lax.broadcasted_iota(jnp.int32, (1, TN, 1), 1)
        valid = (n * TN + row) < n_valid
        h = jnp.where(valid, h, -jnp.inf)

    tile_max = jnp.max(h, axis=1)                                    # (TB, 1024)

    @pl.when(n == 0)
    def _():
        out_ref[...] = tile_max

    @pl.when(n > 0)
    def _():
        out_ref[...] = jnp.maximum(out_ref[...], tile_max)


# ------------------------------ JAX wrapper -------------------------------- #
def _round_up(v, m):
    return (v + m - 1) // m * m


def _fold_bn(w, b, gamma, beta, mean, var, eps=1e-5):
    """Fold eval-mode BatchNorm1d into a kernel-size-1 Conv1d.

    w: (Cin, Cout), b: (Cout,).  Returns (w_eff, b_eff (1, Cout))."""
    scale = gamma / jnp.sqrt(var + eps)                              # (Cout,)
    w_eff = w * scale[None, :]
    b_eff = (b - mean) * scale + beta
    return w_eff, b_eff.reshape(1, -1)


# f32 intermediate footprint per point (64 + 128 + 1024 channels) + slack.
_BYTES_PER_POINT = (64 + 128 + 1024) * 4 + 256
_INTERMEDIATE_BUDGET = 16 * 1024 * 1024      # keeps v7x (64 MiB VMEM/TC) safe


def _pick_tiles(B, N, tile_n):
    """Pick (batch_tile, point_tile) obeying layout + VMEM constraints."""
    tn = max(8, _round_up(min(tile_n, _round_up(N, 8)), 8))
    max_tb = max(1, _INTERMEDIATE_BUDGET // (tn * _BYTES_PER_POINT))
    if B <= max_tb:
        return B, tn
    # Prefer a batch tile that divides B and keeps the (TB, 1024) output block
    # layout-legal (sublane multiple of 8, or the full batch dim).
    for tb in range(min(max_tb, B), 0, -1):
        if B % tb == 0 and tb % 8 == 0:
            return tb, tn
    # Fallback: keep the whole batch resident and shrink the point tile.
    tn = max(8, (_INTERMEDIATE_BUDGET // (B * _BYTES_PER_POINT)) // 8 * 8)
    return B, tn


@functools.partial(jax.jit, static_argnames=("tile_n",))
def pointnetfeat_forward(x_bcn, params, tile_n=1024):
    """x_bcn: (B, 4, N) float32 (PyTorch NCW layout).  Returns (B, 1024) f32."""
    B, C_in, N = x_bcn.shape
    assert C_in == 4

    # NCW -> (B, N, C): channels on lanes, points on sublanes; bf16 for MXU.
    x = jnp.transpose(x_bcn, (0, 2, 1)).astype(jnp.bfloat16)         # (B, N, 4)

    # TODO(synk): training-mode BatchNorm (batch statistics) not implemented;
    # eval-mode BN is folded into the per-point linear layers here.
    w1, b1 = _fold_bn(params["w1"], params["b1"], *params["bn1"])
    w2, b2 = _fold_bn(params["w2"], params["b2"], *params["bn2"])
    w3, b3 = _fold_bn(params["w3"], params["b3"], *params["bn3"])
    w1 = w1.astype(jnp.bfloat16)
    w2 = w2.astype(jnp.bfloat16)
    w3 = w3.astype(jnp.bfloat16)

    tb, tn = _pick_tiles(B, N, tile_n)
    grid = (pl.cdiv(B, tb), pl.cdiv(N, tn))
    full = lambda bb, n: (0, 0)

    kernel = functools.partial(_pointnetfeat_kernel, n_valid=N)

    out = pl.pallas_call(
        kernel,
        out_shape=jax.ShapeDtypeStruct((B, 1024), jnp.float32),
        grid_spec=pltpu.PrefetchScalarGridSpec(
            num_scalar_prefetch=0,
            grid=grid,
            in_specs=[
                pl.BlockSpec((tb, tn, 4), lambda bb, n: (bb, n, 0)),     # x
                pl.BlockSpec((4, 64), full),     pl.BlockSpec((1, 64), full),
                pl.BlockSpec((64, 128), full),   pl.BlockSpec((1, 128), full),
                pl.BlockSpec((128, 1024), full), pl.BlockSpec((1, 1024), full),
            ],
            out_specs=pl.BlockSpec((tb, 1024), lambda bb, n: (bb, 0)),
        ),
        compiler_params=pltpu.CompilerParams(
            # Batch blocks are independent (megacore-shardable on v7x); the
            # point-tile axis is the running-max reduction and stays last.
            dimension_semantics=("parallel", "arbitrary"),
            # 40 MiB stays well under v7x's 64 MiB/TC with headroom for the
            # double-buffered x tile, weights, and Mosaic internal scratch.
            vmem_limit_bytes=40 * 1024 * 1024,
        ),
    )(x, w1, b1, w2, b2, w3, b3)
    return out


# -------------------------- deterministic params --------------------------- #
def make_params(key):
    ks = jax.random.split(key, 12)

    def lin(k, cin, cout):
        return jax.random.normal(k, (cin, cout), jnp.float32) * 0.05

    def bn(kg, kb, c):
        gamma = 1.0 + 0.1 * jax.random.normal(kg, (c,), jnp.float32)
        beta = 0.1 * jax.random.normal(kb, (c,), jnp.float32)
        mean = jnp.zeros((c,), jnp.float32)
        var = jnp.ones((c,), jnp.float32)
        return (gamma, beta, mean, var)

    return {
        "w1": lin(ks[0], 4, 64),     "b1": 0.01 * jax.random.normal(ks[1], (64,)),
        "w2": lin(ks[2], 64, 128),   "b2": 0.01 * jax.random.normal(ks[3], (128,)),
        "w3": lin(ks[4], 128, 1024), "b3": 0.01 * jax.random.normal(ks[5], (1024,)),
        "bn1": bn(ks[6], ks[7], 64),
        "bn2": bn(ks[8], ks[9], 128),
        "bn3": bn(ks[10], ks[11], 1024),
    }


def reference_forward(x_bcn, params):
    """Pure-JAX f32 reference for correctness check."""
    x = jnp.transpose(x_bcn, (0, 2, 1))
    w1, b1 = _fold_bn(params["w1"], params["b1"], *params["bn1"])
    w2, b2 = _fold_bn(params["w2"], params["b2"], *params["bn2"])
    w3, b3 = _fold_bn(params["w3"], params["b3"], *params["bn3"])
    h = jnp.maximum(jnp.einsum("bnc,ck->bnk", x, w1) + b1[0], 0.0)
    h = jnp.maximum(jnp.einsum("bnc,ck->bnk", h, w2) + b2[0], 0.0)
    h = jnp.einsum("bnc,ck->bnk", h, w3) + b3[0]
    return jnp.max(h, axis=1)


if __name__ == "__main__":
    key = jax.random.PRNGKey(0)
    k_x, k_p = jax.random.split(key)

    # Small shapes for the example; N deliberately not a tile multiple so the
    # in-kernel ragged-tile masking and the multi-tile running max are both
    # exercised.  Real workloads should use the default tile_n=1024.
    B, C_in, N = 2, 4, 500
    x = jax.random.normal(k_x, (B, C_in, N), jnp.float32)   # PyTorch NCW input
    params = make_params(k_p)

    out = pointnetfeat_forward(x, params, tile_n=256)
    out = jax.block_until_ready(out)

    ref = reference_forward(x, params)
    assert out.shape == (B, 1024)
    assert bool(jnp.all(jnp.isfinite(out))), "non-finite output"
    assert jnp.allclose(out, ref, rtol=2e-2, atol=2e-2), "mismatch vs reference"

    print("KERNEL_OK")
</pallas_src>

<mosaic_0001>
module attributes {stable_mosaic.version = 11 : i64} {
  func.func @_pointnetfeat_kernel(%arg0: i32, %arg1: i32, %arg2: memref<2x256x4xbf16, #tpu.memory_space<vmem>>, %arg3: memref<4x64xbf16, #tpu.memory_space<vmem>>, %arg4: memref<1x64xf32, #tpu.memory_space<vmem>>, %arg5: memref<64x128xbf16, #tpu.memory_space<vmem>>, %arg6: memref<1x128xf32, #tpu.memory_space<vmem>>, %arg7: memref<128x1024xbf16, #tpu.memory_space<vmem>>, %arg8: memref<1x1024xf32, #tpu.memory_space<vmem>>, %arg9: memref<2x1024xf32, #tpu.memory_space<vmem>>) attributes {dimension_semantics = [#tpu.dimension_semantics<parallel>, #tpu.dimension_semantics<arbitrary>], iteration_bounds = array<i64: 1, 2>, scalar_prefetch = 0 : i64, scratch_operands = 0 : i64, tpu.core_type = #tpu.core_type<tc>, window_params = [{transform_indices = @transform_0, window_bounds = array<i64: 2, 256, 4>}, {pipeline_mode = #tpu.pipeline_mode<synchronous>, transform_indices = @transform_1, window_bounds = array<i64: 4, 64>}, {pipeline_mode = #tpu.pipeline_mode<synchronous>, transform_indices = @transform_2, window_bounds = array<i64: 1, 64>}, {pipeline_mode = #tpu.pipeline_mode<synchronous>, transform_indices = @transform_3, window_bounds = array<i64: 64, 128>}, {pipeline_mode = #tpu.pipeline_mode<synchronous>, transform_indices = @transform_4, window_bounds = array<i64: 1, 128>}, {pipeline_mode = #tpu.pipeline_mode<synchronous>, transform_indices = @transform_5, window_bounds = array<i64: 128, 1024>}, {pipeline_mode = #tpu.pipeline_mode<synchronous>, transform_indices = @transform_6, window_bounds = array<i64: 1, 1024>}, {transform_indices = @transform_7, window_bounds = array<i64: 2, 1024>}]} {
    %c0 = arith.constant 0 : index
    %c0_0 = arith.constant 0 : index
    %c0_1 = arith.constant 0 : index
    %0 = vector.load %arg2[%c0, %c0_0, %c0_1] : memref<2x256x4xbf16, #tpu.memory_space<vmem>>, vector<2x256x4xbf16>
    %1 = vector.shape_cast %0 : vector<2x256x4xbf16> to vector<512x4xbf16>
    %c0_2 = arith.constant 0 : index
    %c0_3 = arith.constant 0 : index
    %2 = vector.load %arg3[%c0_2, %c0_3] : memref<4x64xbf16, #tpu.memory_space<vmem>>, vector<4x64xbf16>
    %cst = arith.constant dense<0.000000e+00> : vector<512x64xf32>
    %3 = tpu.matmul %1, %2, %cst {dimension_numbers = #tpu.dot_dimension_numbers<[1], [0], [0], [1], [0, 0, 1, 1], [], []>} : vector<512x4xbf16>, vector<4x64xbf16>, vector<512x64xf32> -> vector<512x64xf32>
    %c0_4 = arith.constant 0 : index
    %c0_5 = arith.constant 0 : index
    %4 = vector.load %arg4[%c0_4, %c0_5] : memref<1x64xf32, #tpu.memory_space<vmem>>, vector<1x64xf32>
    %5 = vector.broadcast %4 : vector<1x64xf32> to vector<512x64xf32>
    %6 = arith.addf %3, %5 : vector<512x64xf32>
    %cst_6 = arith.constant 0.000000e+00 : f32
    %7 = vector.broadcast %cst_6 : f32 to vector<512x64xf32>
    %8 = arith.maximumf %6, %7 : vector<512x64xf32>
    %9 = arith.truncf %8 : vector<512x64xf32> to vector<512x64xbf16>
    %c0_7 = arith.constant 0 : index
    %c0_8 = arith.constant 0 : index
    %10 = vector.load %arg5[%c0_7, %c0_8] : memref<64x128xbf16, #tpu.memory_space<vmem>>, vector<64x128xbf16>
    %cst_9 = arith.constant dense<0.000000e+00> : vector<512x128xf32>
    %11 = tpu.matmul %9, %10, %cst_9 {dimension_numbers = #tpu.dot_dimension_numbers<[1], [0], [0], [1], [0, 0, 1, 1], [], []>} : vector<512x64xbf16>, vector<64x128xbf16>, vector<512x128xf32> -> vector<512x128xf32>
    %c0_10 = arith.constant 0 : index
    %c0_11 = arith.constant 0 : index
    %12 = vector.load %arg6[%c0_10, %c0_11] : memref<1x128xf32, #tpu.memory_space<vmem>>, vector<1x128xf32>
    %13 = vector.broadcast %12 : vector<1x128xf32> to vector<512x128xf32>
    %14 = arith.addf %11, %13 : vector<512x128xf32>
    %cst_12 = arith.constant 0.000000e+00 : f32
    %15 = vector.broadcast %cst_12 : f32 to vector<512x128xf32>
    %16 = arith.maximumf %14, %15 : vector<512x128xf32>
    %17 = arith.truncf %16 : vector<512x128xf32> to vector<512x128xbf16>
    %c0_13 = arith.constant 0 : index
    %c0_14 = arith.constant 0 : index
    %18 = vector.load %arg7[%c0_13, %c0_14] : memref<128x1024xbf16, #tpu.memory_space<vmem>>, vector<128x1024xbf16>
    %cst_15 = arith.constant dense<0.000000e+00> : vector<512x1024xf32>
    %19 = tpu.matmul %17, %18, %cst_15 {dimension_numbers = #tpu.dot_dimension_numbers<[1], [0], [0], [1], [0, 0, 1, 1], [], []>} : vector<512x128xbf16>, vector<128x1024xbf16>, vector<512x1024xf32> -> vector<512x1024xf32>
    %c0_16 = arith.constant 0 : index
    %c0_17 = arith.constant 0 : index
    %20 = vector.load %arg8[%c0_16, %c0_17] : memref<1x1024xf32, #tpu.memory_space<vmem>>, vector<1x1024xf32>
    %21 = vector.broadcast %20 : vector<1x1024xf32> to vector<512x1024xf32>
    %22 = arith.addf %19, %21 : vector<512x1024xf32>
    %23 = vector.shape_cast %22 : vector<512x1024xf32> to vector<2x256x1024xf32>
    %24 = tpu.iota {dimensions = array<i32: 1>} : vector<1x256x1xi32>
    %c256_i32 = arith.constant 256 : i32
    %25 = arith.muli %arg1, %c256_i32 : i32
    %26 = vector.broadcast %25 : i32 to vector<1x256x1xi32>
    %27 = arith.addi %26, %24 : vector<1x256x1xi32>
    %c500_i32 = arith.constant 500 : i32
    %28 = vector.broadcast %c500_i32 : i32 to vector<1x256x1xi32>
    %29 = arith.cmpi slt, %27, %28 : vector<1x256x1xi32>
    %cst_18 = arith.constant 0xFF800000 : f32
    %30 = vector.shape_cast %29 : vector<1x256x1xi1> to vector<1x256x1xi1>
    %31 = vector.broadcast %30 : vector<1x256x1xi1> to vector<2x256x1024xi1>
    %32 = vector.broadcast %cst_18 : f32 to vector<2x256x1024xf32>
    %33 = arith.select %31, %23, %32 : vector<2x256x1024xi1>, vector<2x256x1024xf32>
    %cst_19 = arith.constant dense<0xFF800000> : vector<2x1024xf32>
    %34 = vector.multi_reduction <maximumf>, %33, %cst_19 [1] : vector<2x256x1024xf32> to vector<2x1024xf32>
    %c0_i32 = arith.constant 0 : i32
    %35 = arith.cmpi eq, %arg1, %c0_i32 : i32
    %36 = arith.extui %35 : i1 to i32
    %c0_i32_20 = arith.constant 0 : i32
    %37 = arith.cmpi ne, %36, %c0_i32_20 : i32
    scf.if %37 {
      %c0_23 = arith.constant 0 : index
      %c0_24 = arith.constant 0 : index
      %41 = vector.load %arg9[%c0_23, %c0_24] : memref<2x1024xf32, #tpu.memory_space<vmem>>, vector<2x1024xf32>
      tpu.vector_store %arg9[%c0_23, %c0_24], %34 {strides = array<i32>} : memref<2x1024xf32, #tpu.memory_space<vmem>>, vector<2x1024xf32>,
    } else {
    }
    %c0_i32_21 = arith.constant 0 : i32
    %38 = arith.cmpi sgt, %arg1, %c0_i32_21 : i32
    %39 = arith.extui %38 : i1 to i32
    %c0_i32_22 = arith.constant 0 : i32
    %40 = arith.cmpi ne, %39, %c0_i32_22 : i32
    scf.if %40 {
      %c0_23 = arith.constant 0 : index
      %c0_24 = arith.constant 0 : index
      %41 = vector.load %arg9[%c0_23, %c0_24] : memref<2x1024xf32, #tpu.memory_space<vmem>>, vector<2x1024xf32>
      %42 = arith.maximumf %41, %34 : vector<2x1024xf32>
      %c0_25 = arith.constant 0 : index
      %c0_26 = arith.constant 0 : index
      %43 = vector.load %arg9[%c0_25, %c0_26] : memref<2x1024xf32, #tpu.memory_space<vmem>>, vector<2x1024xf32>
      tpu.vector_store %arg9[%c0_25, %c0_26], %42 {strides = array<i32>} : memref<2x1024xf32, #tpu.memory_space<vmem>>, vector<2x1024xf32>,
    } else {
    }
    return
  }
  func.func @transform_0(%arg0: i32, %arg1: i32) -> (i32, i32, i32) {
    %c0_i32 = arith.constant 0 : i32
    %c0_i32_0 = arith.constant 0 : i32
    return %arg0, %arg1, %c0_i32 : i32, i32, i32
  }
  func.func @transform_1(%arg0: i32, %arg1: i32) -> (i32, i32) {
    %c0_i32 = arith.constant 0 : i32
    %c0_i32_0 = arith.constant 0 : i32
    %c0_i32_1 = arith.constant 0 : i32
    return %c0_i32, %c0_i32_0 : i32, i32
  }
  func.func @transform_2(%arg0: i32, %arg1: i32) -> (i32, i32) {
    %c0_i32 = arith.constant 0 : i32
    %c0_i32_0 = arith.constant 0 : i32
    %c0_i32_1 = arith.constant 0 : i32
    return %c0_i32, %c0_i32_0 : i32, i32
  }
  func.func @transform_3(%arg0: i32, %arg1: i32) -> (i32, i32) {
    %c0_i32 = arith.constant 0 : i32
    %c0_i32_0 = arith.constant 0 : i32
    %c0_i32_1 = arith.constant 0 : i32
    return %c0_i32, %c0_i32_0 : i32, i32
  }
  func.func @transform_4(%arg0: i32, %arg1: i32) -> (i32, i32) {
    %c0_i32 = arith.constant 0 : i32
    %c0_i32_0 = arith.constant 0 : i32
    %c0_i32_1 = arith.constant 0 : i32
    return %c0_i32, %c0_i32_0 : i32, i32
  }
  func.func @transform_5(%arg0: i32, %arg1: i32) -> (i32, i32) {
    %c0_i32 = arith.constant 0 : i32
    %c0_i32_0 = arith.constant 0 : i32
    %c0_i32_1 = arith.constant 0 : i32
    return %c0_i32, %c0_i32_0 : i32, i32
  }
  func.func @transform_6(%arg0: i32, %arg1: i32) -> (i32, i32) {
    %c0_i32 = arith.constant 0 : i32
    %c0_i32_0 = arith.constant 0 : i32
    %c0_i32_1 = arith.constant 0 : i32
    return %c0_i32, %c0_i32_0 : i32, i32
  }
  func.func @transform_7(%arg0: i32, %arg1: i32) -> (i32, i32) {
    %c0_i32 = arith.constant 0 : i32
    %c0_i32_0 = arith.constant 0 : i32
    return %arg0, %c0_i32 : i32, i32
  }
}

</mosaic_0001>

<bundles_post_ra>
// kernel: pointnetfeat_forward.1
= control target key start
LH: loop header
LB: loop body
LE: loop exit
PB: predicated region body
PF: predicated region fallthrough
CT: control target
= control target key end

     0   :  { %12 = vsyncpa [#allocation4], 0  ;;  %s6132_s24 = smov 0   ;;  %s6134_s25 = smov 0   ;;  %s9006_s0 = inlined_call_operand.vmem [shape: bf16[2,500,4], index: 0, kind: input, shape index: {}]   ;;  %s9007_s1 = inlined_call_operand.vmem [shape: bf16[4,64], index: 1, kind: input, shape index: {}]   ;;  %s9008_s2 = inlined_call_operand.vmem [shape: f32[1,64], index: 2, kind: input, shape index: {}]   ;;  %s9009_s3 = inlined_call_operand.vmem [shape: bf16[64,128], index: 3, kind: input, shape index: {}]   ;;  %s9010_s4 = inlined_call_operand.vmem [shape: f32[1,128], index: 4, kind: input, shape index: {}]   ;;  %s9011_s5 = inlined_call_operand.vmem [shape: bf16[128,1024], index: 5, kind: input, shape index: {}]   ;;  %s9012_s6 = inlined_call_operand.vmem [shape: f32[1,1024], index: 6, kind: input, shape index: {}]   ;;  %s9013_s7 = inlined_call_operand.hbm [shape: f32[2,1024], index: 7, kind: output, shape index: {}]  }
   0x1   :  { %s6136_s26 = smov 0   ;;  %s6138_s27 = smov 0  }
   0x2   :  { %s6140_s28 = smov 0  }
   0x3 LB: > { %s5399_s29 = sadd.s32 4294967295, %s6054_s28   ;;  %s27_s30 = sadd.s32 1, %s6050_s27  ;;  %s6054_s28 = sphi %s6140_s28, %s18_s28   ;;  %s6050_s27 = sphi %s6138_s27, %s9403_s27   ;;  %s6046_s26 = sphi %s6136_s26, %s9402_s26   ;;  %s6042_s25 = sphi %s6134_s25, %s9401_s25   ;;  %s6038_s24 = sphi %s6132_s24, %s9400_s24  }
   0x4   : > { %p28_p0 = scmp.ge.s32.totalorder %s27_s30, 2  ;;  %p46_p1 = scmp.ne.s32.totalorder %s6042_s25, %s6038_s24 }
   0x5   : > { %p47_p2 = scmp.eq.s32.totalorder %s6054_s28, 0  ;;  %s39_s9 = sadd.s32 1, %s6042_s25 }
   0x6   : > { %s9405_s30 = smov (%p28_p0, %s27_s30), 0  ;;  %p5401_p5 = scmp.ge.s32.totalorder %s6054_s28, 2 }
   0x7   : > { %p48_p3 = por %p47_p2, %p46_p1  ;;  %s35_s8 = ssub.s32 %s6050_s27, %s9405_s30 }
   0x8   : > { %p37_p4 = scmp.eq.s32.totalorder %s35_s8, 0  ;;  %242 = sbr.rel (%p5401_p5) target bundleno = 113 (0x71), region = 40 }
   0xa   : > { %s6168_s10 = scalar_select %p37_p4, %s6042_s25, %s39_s9  }
   0xf   : > { %245 = sbr.rel (!%p48_p3) target bundleno = 113 (0x71), region = 44  ;;  %s247_s11 = sand.u32 (%p48_p3), 1, %s6042_s25  }
  0x10   : > { %s5403_s12 = sshll.u32 (%p48_p3), %s6050_s27, 5  ;;  %s5402_s13 = sshll.u32 (%p48_p3), %s247_s11, 8 }
  0x11   : > { %s252_s14 = ssub.s32 (%p48_p3), 63, %s5403_s12  ;;  %s5592_s15 = sshll.u32 (%p48_p3), %s6050_s27, 7 }
  0x12   : > { %p253_p6 = scmp.lt.s32.totalorder (%p48_p3), %s252_s14, 32  ;;  %s6179_s18 = scalar_lea.vmem (%p48_p3), %s9006_s0, %s5592_s15  }
  0x13   : > { %s6182_s20 = scalar_lea.vmem (%p48_p3), [#allocation2], %s5402_s13  }
  0x16   : > { %s9407_s14 = smov (!%p253_p6, %s252_s14), 32 }
  0x17   : > { %s5404_s19 = sshll.u32 %s9407_s14, 7 }
  0x18   : > { %p5407_p7 = scmp.eq.s32.totalorder %s5404_s19, 0 }
  0x19   : > { %s6185_s21 = sshrl.u32 (!%p5407_p7), %s9407_s14, 5 }
  0x1a   : > { %263 = sbr.rel (%p5407_p7) target bundleno = 113 (0x71), region = 48  ;;  %p5408_p8 = scmp.le.s32.totalorder (!%p5407_p7), %s6185_s21, 0 }
  0x21   : > { %5350 = sbr.rel (%p5408_p8) target bundleno = 92 (0x5c), region = 159  ;;  %s9089_s22 = smov (!%p5408_p8), %s6182_s20 }
  0x22   : > { %s9090_s23 = smov (!%p5408_p8), %s6179_s18  ;;  %s6194_s8 = smov (!%p5408_p8), 0  }
  0x23   : > { %s6196_s9 = smov (!%p5408_p8), 0  }
  0x28 LB: >> { %v279_v0 = vld [vmem:[%s6062_s23] sm:$0xf]  ;;  %v281_v1 = vld [vmem:[%s6062_s23 + $0x4] sm:$0xf]  ;;  %v283_v2 = vld [vmem:[%s6062_s23 + $0x8] sm:$0xf]  ;;  %s6070_s9 = sphi %s6196_s9, %s273_s9   ;;  %s6066_s8 = sphi %s6194_s8, %s9091_s8   ;;  %s6062_s23 = sphi %s9090_s23, %s412_s23   ;;  %s6058_s22 = sphi %s9089_s22, %s413_s22  }
  0x29   : >> { %280 = vst [vmem:[%s6058_s22] sm:$0xf] %v279_v0  ;;  %282 = vst [vmem:[%s6058_s22 + $0x4] sm:$0xf] %v281_v1  ;;  %v285_v3 = vld [vmem:[%s6062_s23 + $0xc] sm:$0xf]  ;;  %s407_s11 = sadd.s32 1, %s6066_s8 }
  0x2a   : >> { %284 = vst [vmem:[%s6058_s22 + $0x8] sm:$0xf] %v283_v2  ;;  %v287_v4 = vld [vmem:[%s6062_s23 + $0x10] sm:$0xf]  ;;  %v289_v5 = vld [vmem:[%s6062_s23 + $0x14] sm:$0xf]  ;;  %p408_p9 = scmp.ge.s32.totalorder %s407_s11, %s6185_s21 }
  0x2b   : >> { %286 = vst [vmem:[%s6058_s22 + $0xc] sm:$0xf] %v285_v3  ;;  %288 = vst [vmem:[%s6058_s22 + $0x10] sm:$0xf] %v287_v4  ;;  %v291_v6 = vld [vmem:[%s6062_s23 + $0x18] sm:$0xf] }
  0x2c   : >> { %290 = vst [vmem:[%s6058_s22 + $0x14] sm:$0xf] %v289_v5  ;;  %v293_v7 = vld [vmem:[%s6062_s23 + $0x1c] sm:$0xf]  ;;  %v295_v8 = vld [vmem:[%s6062_s23 + $0x20] sm:$0xf] }
  0x2d   : >> { %292 = vst [vmem:[%s6058_s22 + $0x18] sm:$0xf] %v291_v6  ;;  %294 = vst [vmem:[%s6058_s22 + $0x1c] sm:$0xf] %v293_v7  ;;  %v297_v9 = vld [vmem:[%s6062_s23 + $0x24] sm:$0xf] }
  0x2e   : >> { %296 = vst [vmem:[%s6058_s22 + $0x20] sm:$0xf] %v295_v8  ;;  %v299_v10 = vld [vmem:[%s6062_s23 + $0x28] sm:$0xf]  ;;  %v301_v11 = vld [vmem:[%s6062_s23 + $0x2c] sm:$0xf] }
  0x2f   : >> { %298 = vst [vmem:[%s6058_s22 + $0x24] sm:$0xf] %v297_v9  ;;  %300 = vst [vmem:[%s6058_s22 + $0x28] sm:$0xf] %v299_v10  ;;  %v303_v12 = vld [vmem:[%s6062_s23 + $0x30] sm:$0xf] }
  0x30   : >> { %302 = vst [vmem:[%s6058_s22 + $0x2c] sm:$0xf] %v301_v11  ;;  %v305_v13 = vld [vmem:[%s6062_s23 + $0x34] sm:$0xf]  ;;  %v307_v14 = vld [vmem:[%s6062_s23 + $0x38] sm:$0xf] }
  0x31   : >> { %304 = vst [vmem:[%s6058_s22 + $0x30] sm:$0xf] %v303_v12  ;;  %306 = vst [vmem:[%s6058_s22 + $0x34] sm:$0xf] %v305_v13  ;;  %v309_v15 = vld [vmem:[%s6062_s23 + $0x3c] sm:$0xf] }
  0x32   : >> { %308 = vst [vmem:[%s6058_s22 + $0x38] sm:$0xf] %v307_v14  ;;  %v311_v16 = vld [vmem:[%s6062_s23 + $0x40] sm:$0xf]  ;;  %v313_v17 = vld [vmem:[%s6062_s23 + $0x44] sm:$0xf] }
  0x33   : >> { %310 = vst [vmem:[%s6058_s22 + $0x3c] sm:$0xf] %v309_v15  ;;  %312 = vst [vmem:[%s6058_s22 + $0x40] sm:$0xf] %v311_v16  ;;  %v315_v18 = vld [vmem:[%s6062_s23 + $0x48] sm:$0xf] }
  0x34   : >> { %314 = vst [vmem:[%s6058_s22 + $0x44] sm:$0xf] %v313_v17  ;;  %v317_v19 = vld [vmem:[%s6062_s23 + $0x4c] sm:$0xf]  ;;  %v319_v20 = vld [vmem:[%s6062_s23 + $0x50] sm:$0xf] }
  0x35   : >> { %316 = vst [vmem:[%s6058_s22 + $0x48] sm:$0xf] %v315_v18  ;;  %318 = vst [vmem:[%s6058_s22 + $0x4c] sm:$0xf] %v317_v19  ;;  %v321_v21 = vld [vmem:[%s6062_s23 + $0x54] sm:$0xf] }
  0x36   : >> { %320 = vst [vmem:[%s6058_s22 + $0x50] sm:$0xf] %v319_v20  ;;  %v323_v22 = vld [vmem:[%s6062_s23 + $0x58] sm:$0xf]  ;;  %v325_v23 = vld [vmem:[%s6062_s23 + $0x5c] sm:$0xf] }
  0x37   : >> { %322 = vst [vmem:[%s6058_s22 + $0x54] sm:$0xf] %v321_v21  ;;  %324 = vst [vmem:[%s6058_s22 + $0x58] sm:$0xf] %v323_v22  ;;  %v327_v24 = vld [vmem:[%s6062_s23 + $0x60] sm:$0xf] }
  0x38   : >> { %326 = vst [vmem:[%s6058_s22 + $0x5c] sm:$0xf] %v325_v23  ;;  %v329_v25 = vld [vmem:[%s6062_s23 + $0x64] sm:$0xf]  ;;  %v331_v26 = vld [vmem:[%s6062_s23 + $0x68] sm:$0xf] }
  0x39   : >> { %328 = vst [vmem:[%s6058_s22 + $0x60] sm:$0xf] %v327_v24  ;;  %330 = vst [vmem:[%s6058_s22 + $0x64] sm:$0xf] %v329_v25  ;;  %v333_v27 = vld [vmem:[%s6062_s23 + $0x6c] sm:$0xf] }
  0x3a   : >> { %332 = vst [vmem:[%s6058_s22 + $0x68] sm:$0xf] %v331_v26  ;;  %v335_v28 = vld [vmem:[%s6062_s23 + $0x70] sm:$0xf]  ;;  %v337_v29 = vld [vmem:[%s6062_s23 + $0x74] sm:$0xf] }
  0x3b   : >> { %334 = vst [vmem:[%s6058_s22 + $0x6c] sm:$0xf] %v333_v27  ;;  %336 = vst [vmem:[%s6058_s22 + $0x70] sm:$0xf] %v335_v28  ;;  %v339_v30 = vld [vmem:[%s6062_s23 + $0x78] sm:$0xf] }
  0x3c   : >> { %338 = vst [vmem:[%s6058_s22 + $0x74] sm:$0xf] %v337_v29  ;;  %v341_v31 = vld [vmem:[%s6062_s23 + $0x7c] sm:$0xf]  ;;  %340 = vst [vmem:[%s6058_s22 + $0x78] sm:$0xf] %v339_v30 }
  0x3d   : >> { %v343_v32 = vld [vmem:[%s6062_s23 + $0xfc] sm:$0xf]  ;;  %342 = vst [vmem:[%s6058_s22 + $0x7c] sm:$0xf] %v341_v31  ;;  %v345_v33 = vld [vmem:[%s6062_s23 + $0x100] sm:$0xf] }
  0x3e   : >> { %344 = vst [vmem:[%s6058_s22 + $0x80] sm:$0xf] %v343_v32  ;;  %v347_v34 = vld [vmem:[%s6062_s23 + $0x104] sm:$0xf]  ;;  %v349_v35 = vld [vmem:[%s6062_s23 + $0x108] sm:$0xf] }
  0x3f   : >> { %346 = vst [vmem:[%s6058_s22 + $0x84] sm:$0xf] %v345_v33  ;;  %348 = vst [vmem:[%s6058_s22 + $0x88] sm:$0xf] %v347_v34  ;;  %v351_v36 = vld [vmem:[%s6062_s23 + $0x10c] sm:$0xf] }
  0x40   : >> { %350 = vst [vmem:[%s6058_s22 + $0x8c] sm:$0xf] %v349_v35  ;;  %v353_v37 = vld [vmem:[%s6062_s23 + $0x110] sm:$0xf]  ;;  %v355_v38 = vld [vmem:[%s6062_s23 + $0x114] sm:$0xf] }
  0x41   : >> { %352 = vst [vmem:[%s6058_s22 + $0x90] sm:$0xf] %v351_v36  ;;  %354 = vst [vmem:[%s6058_s22 + $0x94] sm:$0xf] %v353_v37  ;;  %v357_v39 = vld [vmem:[%s6062_s23 + $0x118] sm:$0xf] }
  0x42   : >> { %356 = vst [vmem:[%s6058_s22 + $0x98] sm:$0xf] %v355_v38  ;;  %v359_v40 = vld [vmem:[%s6062_s23 + $0x11c] sm:$0xf]  ;;  %v361_v41 = vld [vmem:[%s6062_s23 + $0x120] sm:$0xf] }
  0x43   : >> { %358 = vst [vmem:[%s6058_s22 + $0x9c] sm:$0xf] %v357_v39  ;;  %360 = vst [vmem:[%s6058_s22 + $0xa0] sm:$0xf] %v359_v40  ;;  %v363_v42 = vld [vmem:[%s6062_s23 + $0x124] sm:$0xf] }
  0x44   : >> { %362 = vst [vmem:[%s6058_s22 + $0xa4] sm:$0xf] %v361_v41  ;;  %v365_v43 = vld [vmem:[%s6062_s23 + $0x128] sm:$0xf]  ;;  %v367_v44 = vld [vmem:[%s6062_s23 + $0x12c] sm:$0xf] }
  0x45   : >> { %364 = vst [vmem:[%s6058_s22 + $0xa8] sm:$0xf] %v363_v42  ;;  %366 = vst [vmem:[%s6058_s22 + $0xac] sm:$0xf] %v365_v43  ;;  %v369_v45 = vld [vmem:[%s6062_s23 + $0x130] sm:$0xf] }
  0x46   : >> { %368 = vst [vmem:[%s6058_s22 + $0xb0] sm:$0xf] %v367_v44  ;;  %v371_v46 = vld [vmem:[%s6062_s23 + $0x134] sm:$0xf]  ;;  %v373_v47 = vld [vmem:[%s6062_s23 + $0x138] sm:$0xf] }
  0x47   : >> { %370 = vst [vmem:[%s6058_s22 + $0xb4] sm:$0xf] %v369_v45  ;;  %372 = vst [vmem:[%s6058_s22 + $0xb8] sm:$0xf] %v371_v46  ;;  %v375_v48 = vld [vmem:[%s6062_s23 + $0x13c] sm:$0xf] }
  0x48   : >> { %374 = vst [vmem:[%s6058_s22 + $0xbc] sm:$0xf] %v373_v47  ;;  %v377_v49 = vld [vmem:[%s6062_s23 + $0x140] sm:$0xf]  ;;  %v379_v50 = vld [vmem:[%s6062_s23 + $0x144] sm:$0xf] }
  0x49   : >> { %376 = vst [vmem:[%s6058_s22 + $0xc0] sm:$0xf] %v375_v48  ;;  %378 = vst [vmem:[%s6058_s22 + $0xc4] sm:$0xf] %v377_v49  ;;  %v381_v51 = vld [vmem:[%s6062_s23 + $0x148] sm:$0xf] }
  0x4a   : >> { %380 = vst [vmem:[%s6058_s22 + $0xc8] sm:$0xf] %v379_v50  ;;  %v383_v52 = vld [vmem:[%s6062_s23 + $0x14c] sm:$0xf]  ;;  %v385_v53 = vld [vmem:[%s6062_s23 + $0x150] sm:$0xf] }
  0x4b   : >> { %382 = vst [vmem:[%s6058_s22 + $0xcc] sm:$0xf] %v381_v51  ;;  %384 = vst [vmem:[%s6058_s22 + $0xd0] sm:$0xf] %v383_v52  ;;  %v387_v54 = vld [vmem:[%s6062_s23 + $0x154] sm:$0xf] }
  0x4c   : >> { %386 = vst [vmem:[%s6058_s22 + $0xd4] sm:$0xf] %v385_v53  ;;  %v389_v55 = vld [vmem:[%s6062_s23 + $0x158] sm:$0xf]  ;;  %v391_v56 = vld [vmem:[%s6062_s23 + $0x15c] sm:$0xf] }
  0x4d   : >> { %388 = vst [vmem:[%s6058_s22 + $0xd8] sm:$0xf] %v387_v54  ;;  %390 = vst [vmem:[%s6058_s22 + $0xdc] sm:$0xf] %v389_v55  ;;  %v393_v57 = vld [vmem:[%s6062_s23 + $0x160] sm:$0xf] }
  0x4e   : >> { %392 = vst [vmem:[%s6058_s22 + $0xe0] sm:$0xf] %v391_v56  ;;  %v395_v58 = vld [vmem:[%s6062_s23 + $0x164] sm:$0xf]  ;;  %v397_v59 = vld [vmem:[%s6062_s23 + $0x168] sm:$0xf] }
  0x4f   : >> { %394 = vst [vmem:[%s6058_s22 + $0xe4] sm:$0xf] %v393_v57  ;;  %396 = vst [vmem:[%s6058_s22 + $0xe8] sm:$0xf] %v395_v58  ;;  %v399_v60 = vld [vmem:[%s6062_s23 + $0x16c] sm:$0xf] }
  0x50   : >> { %398 = vst [vmem:[%s6058_s22 + $0xec] sm:$0xf] %v397_v59  ;;  %v401_v61 = vld [vmem:[%s6062_s23 + $0x170] sm:$0xf]  ;;  %v403_v62 = vld [vmem:[%s6062_s23 + $0x174] sm:$0xf] }
  0x51   : >> { %400 = vst [vmem:[%s6058_s22 + $0xf0] sm:$0xf] %v399_v60  ;;  %402 = vst [vmem:[%s6058_s22 + $0xf4] sm:$0xf] %v401_v61  ;;  %v405_v63 = vld [vmem:[%s6062_s23 + $0x178] sm:$0xf] }
  0x52   : >> { %404 = vst [vmem:[%s6058_s22 + $0xf8] sm:$0xf] %v403_v62  ;;  %406 = vst [vmem:[%s6058_s22 + $0xfc] sm:$0xf] %v405_v63  ;;  %s9409_s11 = smov (%p408_p9, %s407_s11), 0  ;;  %s273_s9 = sadd.s32 1, %s6070_s9  }
  0x53   : >> { %s5409_s12 = sshll.u32 %s9409_s11, 7  ;;  %p272_p10 = scmp.ge.s32.totalorder %s273_s9, %s6185_s21 }
  0x54   : >> { %s412_s23 = scalar_lea.vmem %s6179_s18, %s5409_s12   ;;  %s413_s22 = scalar_lea.vmem %s6182_s20, %s5409_s12 [#allocation2]  }
  0x55   : >> { %s9091_s8 = smov %s9409_s11  ;;  %275 = sbr.rel (!%p272_p10) target bundleno = 40 (0x28), region = 165 }
  0x5c PF: > { %s6353_s13 = sand.u32 31, %s9407_s14   ;;  %s5593_s15 = sshll.u32 %s6185_s21, 7 }
  0x5d   : > { %s6357_s16 = scalar_lea.vmem %s6179_s18, %s5593_s15   ;;  %s420_s17 = scalar_lea.vmem %s6182_s20, %s5593_s15 [#allocation2]  }
  0x5e   : > { %p5414_p11 = scmp.le.s32.totalorder %s6353_s13, 0 }
  0x5f   : > { %s6072_s19 = smov (!%p5414_p11), %s420_s17   ;;  %s6076_s11 = smov (!%p5414_p11), %s6357_s16  }
  0x60   : > { %5364 = sbr.rel (%p5414_p11) target bundleno = 113 (0x71), region = 170  ;;  %s6080_s12 = smov (!%p5414_p11), 0  }
  0x61   : > { %s6084_s9 = smov (!%p5414_p11), 0  }
  0x67 LB: >> { %v430_v0 = vld [vmem:[%s6078_s11] sm:$0xf]  ;;  %v432_v1 = vld [vmem:[%s6078_s11 + $0xfc] sm:$0xf]  ;;  %s434_s14 = sadd.s32 1, %s6082_s12  ;;  %s424_s9 = sadd.s32 1, %s6086_s9   ;;  %s6086_s9 = sphi %s6084_s9, %s424_s9   ;;  %s6082_s12 = sphi %s6080_s12, %s6081_s12   ;;  %s6078_s11 = sphi %s6076_s11, %s439_s11   ;;  %s6074_s19 = sphi %s6072_s19, %s440_s19  }
  0x68   : >> { %431 = vst [vmem:[%s6074_s19] sm:$0xf] %v430_v0  ;;  %433 = vst [vmem:[%s6074_s19 + $0x80] sm:$0xf] %v432_v1  ;;  %p435_p12 = scmp.ge.s32.totalorder %s434_s14, %s6353_s13  ;;  %p423_p13 = scmp.ge.s32.totalorder %s424_s9, %s6353_s13 }
  0x6a   : >> { %s9411_s14 = smov (%p435_p12, %s434_s14), 0  ;;  %426 = sbr.rel (!%p423_p13) target bundleno = 103 (0x67), region = 176 }
  0x6b   : >> { %s5415_s18 = sshll.u32 %s9411_s14, 2  ;;  %s6081_s12 = smov %s9411_s14  }
  0x6c   : >> { %s439_s11 = scalar_lea.vmem %s6357_s16, %s5415_s18   ;;  %s440_s19 = scalar_lea.vmem %s420_s17, %s5415_s18 [#allocation2]  }
  0x71 PF: > { %p5417_p0 = scmp.ge.s32.totalorder %s6054_s28, 1  ;;  %p658_p1 = scmp.lt.s32.totalorder %s6054_s28, 3 }
  0x73   : > { %p659_p2 = pnand %p5417_p0, %p658_p1 }
  0x75   : > { %662 = sbr.rel (%p659_p2) target bundleno = 1371 (0x55b), region = 106 }
  0x7c   : > { %v762_v2 = vld [vmem:[%s9007_s1] sm:$0x3]  ;;  %vm1027_vm0 = vcmask 1041408   ;;  %s665_s22 = sand.u32 1, %s6038_s24   ;;  %vm930_vm1 = vcmask 31744   ;;  %v5950_v5 = vld [vmem:[%s9009_s3 + $0x8] sm:$0xff]  }
  0x7d   : > { %v5949_v3 = vld [vmem:[%s9009_s3] sm:$0xff]   ;;  %5802 = vmatprep.subr.msk.bf16.mxu0 %vm1027_vm0, %v762_v2  ;;  %v1029_v4 = vsel %vm1027_vm0, %v762_v2, 0  ;;  %s5418_s13 = sshll.u32 %s665_s22, 8  ;;  %v5951_v30 = vld [vmem:[%s9009_s3 + $0x10] sm:$0xff]   ;;  %v5952_v32 = vld [vmem:[%s9009_s3 + $0x18] sm:$0xff]   ;;  %vm1455_vm2 = vcmask 523264  }
  0x7e   : > { %5665 = vmatpush3.bf16.msra.mxu0 %v1029_v4  ;;  %5730 = vmatprep.subr.bf16.mxu1 %v5949_v3  ;;  %s6377_s17 = scalar_lea.vmem [#allocation2], %s5418_s13  ;;  %v1937_v40 = vld [vmem:[%s9011_s5] sm:$0xff]  ;;  %v6458_v42 = vld [vmem:[%s9011_s5 + $0x8] sm:$0xff]  ;;  %s5585_s21 = sshll.u32 %s6046_s26, 8 }
  0x7f   : > { %v5917_v6 = vld [vmem:[%s6377_s17] sm:$0xff]   ;;  %5731 = vmatpush3.bf16.msra.mxu1 %v5949_v3  ;;  %v5918_v7 = vld [vmem:[%s6377_s17 + $0x8] sm:$0xff]   ;;  %v5919_v8 = vld [vmem:[%s6377_s17 + $0x10] sm:$0xff]   ;;  %p5586_p3 = scmp.ne.s32.totalorder %s6046_s26, 0 }
  0x80   : > { %5732 = vmatprep.subr.bf16.mxu1 %v5950_v5  ;;  %5666 = vmatprep.mubr.msk.bf16.mxu0 %vm930_vm1, %v5917_v6  ;;  %v5920_v9 = vld [vmem:[%s6377_s17 + $0x18] sm:$0xff]   ;;  %v5921_v10 = vld [vmem:[%s6377_s17 + $0x20] sm:$0xff]   ;;  %v5922_v11 = vld [vmem:[%s6377_s17 + $0x28] sm:$0xff]  }
  0x81   : > { %5667 = vmatmul.mubr.msk.bf16.vlgmr.msra.gmra.mrb[0].mxu0 %vm930_vm1, %v5918_v7  ;;  %v5923_v12 = vld [vmem:[%s6377_s17 + $0x30] sm:$0xff]   ;;  %v5924_v13 = vld [vmem:[%s6377_s17 + $0x38] sm:$0xff]   ;;  %v5925_v14 = vld [vmem:[%s6377_s17 + $0x40] sm:$0xff]  }
  0x82   : > { %5670 = vmatprep.mubr.msk.bf16.mxu0 %vm930_vm1, %v5919_v8  ;;  %v5926_v15 = vld [vmem:[%s6377_s17 + $0x48] sm:$0xff]   ;;  %v5927_v16 = vld [vmem:[%s6377_s17 + $0x50] sm:$0xff]   ;;  %v5928_v17 = vld [vmem:[%s6377_s17 + $0x58] sm:$0xff]  }
  0x83   : > { %5733 = vmatpush3.bf16.msra.mxu1 %v5950_v5  ;;  %v5929_v18 = vld [vmem:[%s6377_s17 + $0x60] sm:$0xff]   ;;  %v5930_v19 = vld [vmem:[%s6377_s17 + $0x68] sm:$0xff]   ;;  %v5931_v20 = vld [vmem:[%s6377_s17 + $0x70] sm:$0xff]  }
  0x84   : > { %v5932_v21 = vld [vmem:[%s6377_s17 + $0x78] sm:$0xff]   ;;  %v5933_v22 = vld [vmem:[%s6377_s17 + $0x80] sm:$0xff]   ;;  %v5934_v23 = vld [vmem:[%s6377_s17 + $0x88] sm:$0xff]   ;;  %5734 = vmatprep.subr.bf16.mxu1 %v5951_v30 }
  0x85   : > { %v5935_v24 = vld [vmem:[%s6377_s17 + $0x90] sm:$0xff]   ;;  %v5936_v25 = vld [vmem:[%s6377_s17 + $0x98] sm:$0xff]   ;;  %v5937_v26 = vld [vmem:[%s6377_s17 + $0xa0] sm:$0xff]  }
  0x86   : > { %v5938_v27 = vld [vmem:[%s6377_s17 + $0xa8] sm:$0xff]   ;;  %v5939_v28 = vld [vmem:[%s6377_s17 + $0xb0] sm:$0xff]   ;;  %v5940_v29 = vld [vmem:[%s6377_s17 + $0xb8] sm:$0xff]  }
  0x87   : > { %v5941_v31 = vld [vmem:[%s6377_s17 + $0xc0] sm:$0xff]   ;;  %5735 = vmatpush3.bf16.msra.mxu1 %v5951_v30  ;;  %v5942_v33 = vld [vmem:[%s6377_s17 + $0xc8] sm:$0xff]   ;;  %v5943_v34 = vld [vmem:[%s6377_s17 + $0xd0] sm:$0xff]  }
  0x88   : > { %5736 = vmatprep.subr.bf16.mxu1 %v5952_v32  ;;  %v5944_v35 = vld [vmem:[%s6377_s17 + $0xd8] sm:$0xff]   ;;  %v5945_v36 = vld [vmem:[%s6377_s17 + $0xe0] sm:$0xff]   ;;  %v5946_v37 = vld [vmem:[%s6377_s17 + $0xe8] sm:$0xff]  }
  0x89   : > { %5671 = vmatmul.mubr.msk.bf16.gmra.mrb[4].mxu0 %vm930_vm1, %v5920_v9  ;;  %v5947_v38 = vld [vmem:[%s6377_s17 + $0xf0] sm:$0xff]   ;;  %v5948_v39 = vld [vmem:[%s6377_s17 + $0xf8] sm:$0xff]   ;;  %v1941_v41 = vld [vmem:[%s9011_s5 + $0x20] sm:$0xff] }
  0x8a   : > { %5674 = vmatprep.mubr.msk.bf16.mxu0 %vm930_vm1, %v5921_v10  ;;  %v5521_v43 = vcombine.low %v1937_v40, %v1941_v41  ;;  %v5522_v44 = vcombine.high %v1937_v40, %v1941_v41  ;;  %v6463_v45 = vld [vmem:[%s9011_s5 + $0x28] sm:$0xff]  ;;  %v1945_v48 = vld [vmem:[%s9011_s5 + $0x40] sm:$0xff] }
  0x8b   : > { %5737 = vmatpush3.bf16.msra.mxu1 %v5952_v32  ;;  %v5523_v46 = vcombine.low %v6458_v42, %v6463_v45  ;;  %v5524_v47 = vcombine.high %v6458_v42, %v6463_v45  ;;  %v1949_v49 = vld [vmem:[%s9011_s5 + $0x60] sm:$0xff] }
  0x8c   : > { %2363 = vmatprep.subr.bf16.mxu0 %v5522_v44  ;;  %v5529_v50 = vcombine.low %v1945_v48, %v1949_v49  ;;  %v5530_v51 = vcombine.high %v1945_v48, %v1949_v49  ;;  %v1953_v52 = vld [vmem:[%s9011_s5 + $0x80] sm:$0xff]  ;;  %v1962_v49 = vld [vmem:[%s9011_s5 + $0xc8] sm:$0xff] }
  0x8d   : > { %2716 = vmatprep.subr.bf16.mxu1 %v5524_v47  ;;  %2364 = vmatpush1.bf16.msra.mxu0 %v5521_v43  ;;  %v1957_v53 = vld [vmem:[%s9011_s5 + $0xa0] sm:$0xff] }
  0x8e   : > { %2365 = vmatprep.subr.bf16.mxu0 %v5530_v51  ;;  %v5537_v54 = vcombine.low %v1953_v52, %v1957_v53  ;;  %v5538_v55 = vcombine.high %v1953_v52, %v1957_v53  ;;  %v1961_v56 = vld [vmem:[%s9011_s5 + $0xc0] sm:$0xff] }
  0x8f   : > { %v1965_v57 = vld [vmem:[%s9011_s5 + $0xe0] sm:$0xff] }
  0x90   : > { %v5545_v58 = vcombine.low %v1961_v56, %v1965_v57  ;;  %v5546_v59 = vcombine.high %v1961_v56, %v1965_v57  ;;  %v1969_v60 = vld [vmem:[%s9011_s5 + $0x100] sm:$0xff]  ;;  %v1970_v57 = vld [vmem:[%s9011_s5 + $0x108] sm:$0xff] }
  0x91   : > { %5675 = vmatmul.mubr.msk.bf16.gmra.mrb[8].mxu0 %vm930_vm1, %v5922_v11  ;;  %v1973_v61 = vld [vmem:[%s9011_s5 + $0x120] sm:$0xff] }
  0x92   : > { %5678 = vmatprep.mubr.msk.bf16.mxu0 %vm930_vm1, %v5923_v12  ;;  %2366 = vmatpush1.bf16.msra.mxu0 %v5529_v50  ;;  %v5553_v62 = vcombine.low %v1969_v60, %v1973_v61  ;;  %v5554_v63 = vcombine.high %v1969_v60, %v1973_v61  ;;  %v1977_v0 = vld [vmem:[%s9011_s5 + $0x140] sm:$0xff]  ;;  %v1966_v50 = vld [vmem:[%s9011_s5 + $0xe8] sm:$0xff] }
  0x93   : > { %2367 = vmatprep.subr.bf16.mxu0 %v5538_v55  ;;  %v1981_v1 = vld [vmem:[%s9011_s5 + $0x160] sm:$0xff] }
  0x94   : > { %v5561_v2 = vcombine.low %v1977_v0, %v1981_v1  ;;  %v5562_v3 = vcombine.high %v1977_v0, %v1981_v1  ;;  %v1985_v4 = vld [vmem:[%s9011_s5 + $0x180] sm:$0xff]  ;;  %v5547_v0 = vcombine.low %v1962_v49, %v1966_v50 }
  0x95   : > { %v1989_v5 = vld [vmem:[%s9011_s5 + $0x1a0] sm:$0xff] }
  0x96   : > { %2368 = vmatpush1.bf16.msra.mxu0 %v5537_v54  ;;  %v5569_v6 = vcombine.low %v1985_v4, %v1989_v5  ;;  %v5570_v7 = vcombine.high %v1985_v4, %v1989_v5  ;;  %v6508_v8 = vld [vmem:[%s9008_s2] ss:$0 sm:$0xff]  ;;  %v1978_v4 = vld [vmem:[%s9011_s5 + $0x148] sm:$0xff] }
  0x97   : > { %2369 = vmatprep.subr.bf16.mxu0 %v5546_v59  ;;  %v1993_v10 = vld [vmem:[%s9011_s5 + $0x1c0] sm:$0xff]  ;;  %v1982_v5 = vld [vmem:[%s9011_s5 + $0x168] sm:$0xff] }
  0x98   : > { %v1997_v11 = vld [vmem:[%s9011_s5 + $0x1e0] sm:$0xff] }
  0x99   : > { %5679 = vmatmul.mubr.msk.bf16.gmra.mrb[12].mxu0 %vm930_vm1, %v5924_v13 }
  0x9a   : > { %5682 = vmatprep.mubr.msk.bf16.mxu0 %vm930_vm1, %v5925_v14  ;;  %2370 = vmatpush1.bf16.msra.mxu0 %v5545_v58  ;;  %v5577_v14 = vcombine.low %v1993_v10, %v1997_v11  ;;  %v1974_v58 = vld [vmem:[%s9011_s5 + $0x128] sm:$0xff] }
  0x9b   : > { %2371 = vmatprep.subr.bf16.mxu0 %v5554_v63 }
  0x9e   : > { %2372 = vmatpush1.bf16.msra.mxu0 %v5553_v62 }
  0x9f   : > { %2373 = vmatprep.subr.bf16.mxu0 %v5562_v3 }
  0xa1   : > { %5683 = vmatmul.mubr.msk.bf16.gmra.mrb[16].mxu0 %vm930_vm1, %v5926_v15  ;;  %v5578_v15 = vcombine.high %v1993_v10, %v1997_v11  ;;  %v5555_v10 = vcombine.low %v1970_v57, %v1974_v58 }
  0xa2   : > { %5686 = vmatprep.mubr.msk.bf16.mxu0 %vm930_vm1, %v5927_v16  ;;  %2374 = vmatpush1.bf16.msra.mxu0 %v5561_v2  ;;  %v5556_v2 = vcombine.high %v1970_v57, %v1974_v58 }
  0xa3   : > { %2375 = vmatprep.subr.bf16.mxu0 %v5570_v7 }
  0xa6   : > { %2376 = vmatpush1.bf16.msra.mxu0 %v5569_v6 }
  0xa7   : > { %2377 = vmatprep.subr.bf16.mxu0 %v5578_v15 }
  0xa9   : > { %5687 = vmatmul.mubr.msk.bf16.gmra.mrb[20].mxu0 %vm930_vm1, %v5928_v17 }
  0xaa   : > { %5690 = vmatprep.mubr.msk.bf16.mxu0 %vm930_vm1, %v5929_v18  ;;  %2378 = vmatpush1.bf16.msra.mxu0 %v5577_v14 }
  0xb1   : > { %5691 = vmatmul.mubr.msk.bf16.gmra.mrb[24].mxu0 %vm930_vm1, %v5930_v19 }
  0xb2   : > { %5694 = vmatprep.mubr.msk.bf16.mxu0 %vm930_vm1, %v5931_v20 }
  0xb9   : > { %5695 = vmatmul.mubr.msk.bf16.gmra.mrb[28].mxu0 %vm930_vm1, %v5932_v21 }
  0xba   : > { %5698 = vmatprep.mubr.msk.bf16.mxu0 %vm930_vm1, %v5933_v22 }
  0xc1   : > { %5699 = vmatmul.mubr.msk.bf16.gmra.mrb[32].mxu0 %vm930_vm1, %v5934_v23 }
  0xc2   : > { %5702 = vmatprep.mubr.msk.bf16.mxu0 %vm930_vm1, %v5935_v24 }
  0xc9   : > { %5703 = vmatmul.mubr.msk.bf16.gmra.mrb[36].mxu0 %vm930_vm1, %v5936_v25  ;;  %v1946_v25 = vld [vmem:[%s9011_s5 + $0x48] sm:$0xff] }
  0xca   : > { %5706 = vmatprep.mubr.msk.bf16.mxu0 %vm930_vm1, %v5937_v26  ;;  %v1950_v26 = vld [vmem:[%s9011_s5 + $0x68] sm:$0xff] }
  0xcb   : > { %v5532_v32 = vcombine.high %v1946_v25, %v1950_v26  ;;  %v5531_v43 = vcombine.low %v1946_v25, %v1950_v26 }
  0xd1   : > { %5707 = vmatmul.mubr.msk.bf16.gmra.mrb[40].mxu0 %vm930_vm1, %v5938_v27 }
  0xd2   : > { %5710 = vmatprep.mubr.msk.bf16.mxu0 %vm930_vm1, %v5939_v28 }
  0xd9   : > { %5711 = vmatmul.mubr.msk.bf16.gmra.mrb[44].mxu0 %vm930_vm1, %v5940_v29 }
  0xda   : > { %5714 = vmatprep.mubr.msk.bf16.mxu0 %vm930_vm1, %v5941_v31 }
  0xe1   : > { %5715 = vmatmul.mubr.msk.bf16.gmra.mrb[48].mxu0 %vm930_vm1, %v5942_v33 }
  0xe2   : > { %5718 = vmatprep.mubr.msk.bf16.mxu0 %vm930_vm1, %v5943_v34 }
  0xe9   : > { %5719 = vmatmul.mubr.msk.bf16.gmra.mrb[52].mxu0 %vm930_vm1, %v5944_v35  ;;  %v1954_v35 = vld [vmem:[%s9011_s5 + $0x88] sm:$0xff] }
  0xea   : > { %5722 = vmatprep.mubr.msk.bf16.mxu0 %vm930_vm1, %v5945_v36  ;;  %v1958_v36 = vld [vmem:[%s9011_s5 + $0xa8] sm:$0xff] }
  0xeb   : > { %v5540_v47 = vcombine.high %v1954_v35, %v1958_v36  ;;  %v5539_v54 = vcombine.low %v1954_v35, %v1958_v36 }
  0xf1   : > { %5723 = vmatmul.mubr.msk.bf16.gmra.mrb[56].mxu0 %vm930_vm1, %v5946_v37 }
  0xf2   : > { %5726 = vmatprep.mubr.msk.bf16.mxu0 %vm930_vm1, %v5947_v38 }
  0xf9   : > { %5727 = vmatmul.mubr.msk.bf16.gmra.mrb[60].mxu0 %vm930_vm1, %v5948_v39 }
 0x154   : > { %v5668_v9 = vpop.f32.mrb[0].mxu0 }
 0x155   : > { %v1074_v12 = vadd.f32 %v5668_v9, %v6508_v8  ;;  %v1065_v13 = vpop.f32.mrb[1].mxu0 }
 0x156   : > { %v1066_v16 = vadd.f32 %v6508_v8, %v1065_v13  ;;  %v5669_v17 = vpop.f32.mrb[2].mxu0  ;;  %v5564_v13 = vcombine.high %v1978_v4, %v1982_v5 }
 0x157   : > { %v1077_v18 = vadd.f32 %v5669_v17, %v6508_v8  ;;  %v1068_v19 = vpop.f32.mrb[3].mxu0  ;;  %v1322_v21 = vmax.f32 %v1074_v12, 0.0  ;;  %v1990_v17 = vld [vmem:[%s9011_s5 + $0x1a8] sm:$0xff] }
 0x158   : > { %v1069_v20 = vadd.f32 %v6508_v8, %v1068_v19  ;;  %v1320_v23 = vmax.f32 %v1066_v16, 0.0  ;;  %v1986_v16 = vld [vmem:[%s9011_s5 + $0x188] sm:$0xff] }
 0x159   : > { %v1323_v22 = vmax.f32 %v1077_v18, 0.0  ;;  %v5572_v25 = vcombine.high %v1986_v16, %v1990_v17 }
 0x15a   : > { %v1321_v24 = vmax.f32 %v1069_v20, 0.0 }
 0x15b   : > { %v1385_v27 = vpack.c.bf16 %v1323_v22, %v1322_v21 }
 0x15c   : > { %v5672_v28 = vpop.f32.mrb[4].mxu0  ;;  %v1384_v29 = vpack.c.bf16 %v1321_v24, %v1320_v23  ;;  %v5563_v23 = vcombine.low %v1978_v4, %v1982_v5 }
 0x15d   : > { %v1090_v30 = vadd.f32 %v5672_v28, %v6508_v8  ;;  %v1081_v31 = vpop.f32.mrb[5].mxu0  ;;  %v1998_v28 = vld [vmem:[%s9011_s5 + $0x1e8] sm:$0xff] }
 0x15e   : > { %v1082_v33 = vadd.f32 %v6508_v8, %v1081_v31  ;;  %5738 = vmatprep.mubr.msk.bf16.mxu1 %vm1455_vm2, %v1384_v29  ;;  %v5673_v34 = vpop.f32.mrb[6].mxu0 }
 0x15f   : > { %v1326_v37 = vmax.f32 %v1090_v30, 0.0  ;;  %v1093_v38 = vadd.f32 %v5673_v34, %v6508_v8  ;;  %5739 = vmatmul.mubr.msk.bf16.vlgmr.msra.gmra.mrb[0].mxu1 %vm1455_vm2, %v1385_v27  ;;  %v1084_v39 = vpop.f32.mrb[7].mxu0  ;;  %v1994_v27 = vld [vmem:[%s9011_s5 + $0x1c8] sm:$0xff] }
 0x160   : > { %v1324_v40 = vmax.f32 %v1082_v33, 0.0  ;;  %v1085_v41 = vadd.f32 %v6508_v8, %v1084_v39  ;;  %2717 = vmatpush1.bf16.msra.mxu1 %v5523_v46  ;;  %v5548_v46 = vcombine.high %v1962_v49, %v1966_v50  ;;  %v5580_v35 = vcombine.high %v1994_v27, %v1998_v28 }
 0x161   : > { %v1327_v44 = vmax.f32 %v1093_v38, 0.0  ;;  %2718 = vmatprep.subr.bf16.mxu1 %v5532_v32  ;;  %v5571_v32 = vcombine.low %v1986_v16, %v1990_v17 }
 0x162   : > { %v1325_v48 = vmax.f32 %v1085_v41, 0.0 }
 0x163   : > { %v1387_v51 = vpack.c.bf16 %v1327_v44, %v1326_v37  ;;  %v5579_v44 = vcombine.low %v1994_v27, %v1998_v28 }
 0x164   : > { %v1386_v52 = vpack.c.bf16 %v1325_v48, %v1324_v40  ;;  %v5676_v53 = vpop.f32.mrb[8].mxu0  ;;  %2719 = vmatpush1.bf16.msra.mxu1 %v5531_v43 }
 0x165   : > { %v1106_v42 = vadd.f32 %v5676_v53, %v6508_v8  ;;  %v1097_v45 = vpop.f32.mrb[9].mxu0  ;;  %2720 = vmatprep.subr.bf16.mxu1 %v5540_v47 }
 0x166   : > { %5742 = vmatprep.mubr.msk.bf16.mxu1 %vm1455_vm2, %v1386_v52  ;;  %v1098_v55 = vadd.f32 %v6508_v8, %v1097_v45  ;;  %v5677_v56 = vpop.f32.mrb[10].mxu0 }
 0x167   : > { %5743 = vmatmul.mubr.msk.bf16.gmra.mrb[4].mxu1 %vm1455_vm2, %v1387_v51  ;;  %v1330_v59 = vmax.f32 %v1106_v42, 0.0  ;;  %v1109_v60 = vadd.f32 %v5677_v56, %v6508_v8  ;;  %v1100_v61 = vpop.f32.mrb[11].mxu0 }
 0x168   : > { %v1328_v62 = vmax.f32 %v1098_v55, 0.0  ;;  %v1101_v63 = vadd.f32 %v6508_v8, %v1100_v61  ;;  %2721 = vmatpush1.bf16.msra.mxu1 %v5539_v54 }
 0x169   : > { %v1331_v1 = vmax.f32 %v1109_v60, 0.0  ;;  %2722 = vmatprep.subr.bf16.mxu1 %v5548_v46 }
 0x16a   : > { %v1329_v3 = vmax.f32 %v1101_v63, 0.0 }
 0x16b   : > { %v1389_v6 = vpack.c.bf16 %v1331_v1, %v1330_v59 }
 0x16c   : > { %v1388_v7 = vpack.c.bf16 %v1329_v3, %v1328_v62  ;;  %v5680_v9 = vpop.f32.mrb[12].mxu0  ;;  %2723 = vmatpush1.bf16.msra.mxu1 %v5547_v0 }
 0x16d   : > { %v1122_v11 = vadd.f32 %v5680_v9, %v6508_v8  ;;  %v1113_v12 = vpop.f32.mrb[13].mxu0  ;;  %2724 = vmatprep.subr.bf16.mxu1 %v5556_v2 }
 0x16e   : > { %5746 = vmatprep.mubr.msk.bf16.mxu1 %vm1455_vm2, %v1388_v7  ;;  %v1114_v14 = vadd.f32 %v6508_v8, %v1113_v12  ;;  %v5681_v15 = vpop.f32.mrb[14].mxu0 }
 0x16f   : > { %5747 = vmatmul.mubr.msk.bf16.gmra.mrb[8].mxu1 %vm1455_vm2, %v1389_v6  ;;  %v1334_v18 = vmax.f32 %v1122_v11, 0.0  ;;  %v1125_v19 = vadd.f32 %v5681_v15, %v6508_v8  ;;  %v1116_v20 = vpop.f32.mrb[15].mxu0 }
 0x170   : > { %v1332_v21 = vmax.f32 %v1114_v14, 0.0  ;;  %v1117_v22 = vadd.f32 %v6508_v8, %v1116_v20  ;;  %2725 = vmatpush1.bf16.msra.mxu1 %v5555_v10 }
 0x171   : > { %v1335_v24 = vmax.f32 %v1125_v19, 0.0  ;;  %2726 = vmatprep.subr.bf16.mxu1 %v5564_v13 }
 0x172   : > { %v1333_v26 = vmax.f32 %v1117_v22, 0.0 }
 0x173   : > { %v1391_v29 = vpack.c.bf16 %v1335_v24, %v1334_v18 }
 0x174   : > { %v1390_v30 = vpack.c.bf16 %v1333_v26, %v1332_v21  ;;  %v5684_v31 = vpop.f32.mrb[16].mxu0  ;;  %2727 = vmatpush1.bf16.msra.mxu1 %v5563_v23 }
 0x175   : > { %v1138_v33 = vadd.f32 %v5684_v31, %v6508_v8  ;;  %v1129_v34 = vpop.f32.mrb[17].mxu0  ;;  %2728 = vmatprep.subr.bf16.mxu1 %v5572_v25 }
 0x176   : > { %5750 = vmatprep.mubr.msk.bf16.mxu1 %vm1455_vm2, %v1390_v30  ;;  %v1130_v36 = vadd.f32 %v6508_v8, %v1129_v34  ;;  %v5685_v37 = vpop.f32.mrb[18].mxu0 }
 0x177   : > { %5751 = vmatmul.mubr.msk.bf16.gmra.mrb[12].mxu1 %vm1455_vm2, %v1391_v29  ;;  %v1338_v38 = vmax.f32 %v1138_v33, 0.0  ;;  %v1141_v39 = vadd.f32 %v5685_v37, %v6508_v8  ;;  %v1132_v40 = vpop.f32.mrb[19].mxu0 }
 0x178   : > { %v1336_v41 = vmax.f32 %v1130_v36, 0.0  ;;  %v1133_v43 = vadd.f32 %v6508_v8, %v1132_v40  ;;  %2729 = vmatpush1.bf16.msra.mxu1 %v5571_v32 }
 0x179   : > { %v1339_v47 = vmax.f32 %v1141_v39, 0.0  ;;  %2730 = vmatprep.subr.bf16.mxu1 %v5580_v35 }
 0x17a   : > { %v1337_v48 = vmax.f32 %v1133_v43, 0.0 }
 0x17b   : > { %v1393_v49 = vpack.c.bf16 %v1339_v47, %v1338_v38 }
 0x17c   : > { %v1392_v50 = vpack.c.bf16 %v1337_v48, %v1336_v41  ;;  %v5688_v51 = vpop.f32.mrb[20].mxu0  ;;  %2731 = vmatpush1.bf16.msra.mxu1 %v5579_v44 }
 0x17d   : > { %v1154_v52 = vadd.f32 %v5688_v51, %v6508_v8  ;;  %v1145_v53 = vpop.f32.mrb[21].mxu0 }
 0x17e   : > { %5754 = vmatprep.mubr.msk.bf16.mxu1 %vm1455_vm2, %v1392_v50  ;;  %v1146_v54 = vadd.f32 %v6508_v8, %v1145_v53  ;;  %v5689_v42 = vpop.f32.mrb[22].mxu0 }
 0x17f   : > { %5755 = vmatmul.mubr.msk.bf16.gmra.mrb[16].mxu1 %vm1455_vm2, %v1393_v49  ;;  %v1342_v45 = vmax.f32 %v1154_v52, 0.0  ;;  %v1157_v46 = vadd.f32 %v5689_v42, %v6508_v8  ;;  %v1148_v55 = vpop.f32.mrb[23].mxu0 }
 0x180   : > { %v1340_v56 = vmax.f32 %v1146_v54, 0.0  ;;  %v1149_v57 = vadd.f32 %v6508_v8, %v1148_v55 }
 0x181   : > { %v1343_v58 = vmax.f32 %v1157_v46, 0.0 }
 0x182   : > { %v1341_v59 = vmax.f32 %v1149_v57, 0.0 }
 0x183   : > { %v1395_v60 = vpack.c.bf16 %v1343_v58, %v1342_v45 }
 0x184   : > { %v1394_v61 = vpack.c.bf16 %v1341_v59, %v1340_v56  ;;  %v5692_v62 = vpop.f32.mrb[24].mxu0 }
 0x185   : > { %v1170_v63 = vadd.f32 %v5692_v62, %v6508_v8  ;;  %v1161_v0 = vpop.f32.mrb[25].mxu0 }
 0x186   : > { %5758 = vmatprep.mubr.msk.bf16.mxu1 %vm1455_vm2, %v1394_v61  ;;  %v1162_v1 = vadd.f32 %v6508_v8, %v1161_v0  ;;  %v5693_v2 = vpop.f32.mrb[26].mxu0 }
 0x187   : > { %5759 = vmatmul.mubr.msk.bf16.gmra.mrb[20].mxu1 %vm1455_vm2, %v1395_v60  ;;  %v1346_v3 = vmax.f32 %v1170_v63, 0.0  ;;  %v1173_v4 = vadd.f32 %v5693_v2, %v6508_v8  ;;  %v1164_v5 = vpop.f32.mrb[27].mxu0 }
 0x188   : > { %v1344_v6 = vmax.f32 %v1162_v1, 0.0  ;;  %v1165_v7 = vadd.f32 %v6508_v8, %v1164_v5 }
 0x189   : > { %v1347_v9 = vmax.f32 %v1173_v4, 0.0 }
 0x18a   : > { %v1345_v10 = vmax.f32 %v1165_v7, 0.0 }
 0x18b   : > { %v1397_v11 = vpack.c.bf16 %v1347_v9, %v1346_v3 }
 0x18c   : > { %v1396_v12 = vpack.c.bf16 %v1345_v10, %v1344_v6  ;;  %v5696_v13 = vpop.f32.mrb[28].mxu0 }
 0x18d   : > { %v1186_v14 = vadd.f32 %v5696_v13, %v6508_v8  ;;  %v1177_v15 = vpop.f32.mrb[29].mxu0 }
 0x18e   : > { %5762 = vmatprep.mubr.msk.bf16.mxu1 %vm1455_vm2, %v1396_v12  ;;  %v1178_v16 = vadd.f32 %v6508_v8, %v1177_v15  ;;  %v5697_v17 = vpop.f32.mrb[30].mxu0 }
 0x18f   : > { %5763 = vmatmul.mubr.msk.bf16.gmra.mrb[24].mxu1 %vm1455_vm2, %v1397_v11  ;;  %v1350_v18 = vmax.f32 %v1186_v14, 0.0  ;;  %v1189_v19 = vadd.f32 %v5697_v17, %v6508_v8  ;;  %v1180_v20 = vpop.f32.mrb[31].mxu0 }
 0x190   : > { %v1348_v21 = vmax.f32 %v1178_v16, 0.0  ;;  %v1181_v22 = vadd.f32 %v6508_v8, %v1180_v20 }
 0x191   : > { %v1351_v23 = vmax.f32 %v1189_v19, 0.0 }
 0x192   : > { %v1349_v24 = vmax.f32 %v1181_v22, 0.0 }
 0x193   : > { %v1399_v25 = vpack.c.bf16 %v1351_v23, %v1350_v18 }
 0x194   : > { %v1398_v26 = vpack.c.bf16 %v1349_v24, %v1348_v21  ;;  %v5700_v27 = vpop.f32.mrb[32].mxu0 }
 0x195   : > { %v1202_v28 = vadd.f32 %v5700_v27, %v6508_v8  ;;  %v1193_v29 = vpop.f32.mrb[33].mxu0 }
 0x196   : > { %5766 = vmatprep.mubr.msk.bf16.mxu1 %vm1455_vm2, %v1398_v26  ;;  %v1194_v30 = vadd.f32 %v6508_v8, %v1193_v29  ;;  %v5701_v31 = vpop.f32.mrb[34].mxu0 }
 0x197   : > { %5767 = vmatmul.mubr.msk.bf16.gmra.mrb[28].mxu1 %vm1455_vm2, %v1399_v25  ;;  %v1354_v32 = vmax.f32 %v1202_v28, 0.0  ;;  %v1205_v33 = vadd.f32 %v5701_v31, %v6508_v8  ;;  %v1196_v34 = vpop.f32.mrb[35].mxu0 }
 0x198   : > { %v1352_v35 = vmax.f32 %v1194_v30, 0.0  ;;  %v1197_v36 = vadd.f32 %v6508_v8, %v1196_v34 }
 0x199   : > { %v1355_v37 = vmax.f32 %v1205_v33, 0.0  ;;  %v9014_v33 = vmov 0  }
 0x19a   : > { %v1353_v38 = vmax.f32 %v1197_v36, 0.0  ;;  %2395 = vmatprep.mubr.bf16.mxu0 %v9014_v33 }
 0x19b   : > { %v1401_v39 = vpack.c.bf16 %v1355_v37, %v1354_v32 }
 0x19c   : > { %v1400_v40 = vpack.c.bf16 %v1353_v38, %v1352_v35  ;;  %v5704_v41 = vpop.f32.mrb[36].mxu0  ;;  %v6642_v38 = vld [vmem:[%s9011_s5 + $0x10] sm:$0xff] }
 0x19d   : > { %v1218_v43 = vadd.f32 %v5704_v41, %v6508_v8  ;;  %v1209_v44 = vpop.f32.mrb[37].mxu0 }
 0x19e   : > { %5770 = vmatprep.mubr.msk.bf16.mxu1 %vm1455_vm2, %v1400_v40  ;;  %v1210_v47 = vadd.f32 %v6508_v8, %v1209_v44  ;;  %v5705_v48 = vpop.f32.mrb[38].mxu0  ;;  %v6652_v40 = vld [vmem:[%s9011_s5 + $0x18] sm:$0xff] }
 0x19f   : > { %5771 = vmatmul.mubr.msk.bf16.gmra.mrb[32].mxu1 %vm1455_vm2, %v1401_v39  ;;  %v1358_v49 = vmax.f32 %v1218_v43, 0.0  ;;  %v1221_v50 = vadd.f32 %v5705_v48, %v6508_v8  ;;  %v1212_v51 = vpop.f32.mrb[39].mxu0  ;;  %v6647_v39 = vld [vmem:[%s9011_s5 + $0x30] sm:$0xff]  ;;  %v6663_v48 = vld [vmem:[%s9011_s5 + $0x38] sm:$0xff] }
 0x1a0   : > { %v1356_v52 = vmax.f32 %v1210_v47, 0.0  ;;  %v1213_v53 = vadd.f32 %v6508_v8, %v1212_v51  ;;  %v5525_v44 = vcombine.low %v6642_v38, %v6647_v39  ;;  %v5526_v47 = vcombine.high %v6642_v38, %v6647_v39  ;;  %v1963_v39 = vld [vmem:[%s9011_s5 + $0xd0] sm:$0xff] }
 0x1a1   : > { %v1359_v54 = vmax.f32 %v1221_v50, 0.0 }
 0x1a2   : > { %v1357_v42 = vmax.f32 %v1213_v53, 0.0  ;;  %v5528_v53 = vcombine.high %v6652_v40, %v6663_v48  ;;  %3069 = vmatprep.subr.bf16.mxu0 %v5526_v47 }
 0x1a3   : > { %v1403_v45 = vpack.c.bf16 %v1359_v54, %v1358_v49 }
 0x1a4   : > { %v1402_v46 = vpack.c.bf16 %v1357_v42, %v1356_v52  ;;  %v5708_v55 = vpop.f32.mrb[40].mxu0  ;;  %v5527_v52 = vcombine.low %v6652_v40, %v6663_v48  ;;  %3422 = vmatprep.subr.bf16.mxu1 %v5528_v53  ;;  %v1964_v48 = vld [vmem:[%s9011_s5 + $0xd8] sm:$0xff] }
 0x1a5   : > { %v1234_v56 = vadd.f32 %v5708_v55, %v6508_v8  ;;  %v1225_v57 = vpop.f32.mrb[41].mxu0 }
 0x1a6   : > { %5774 = vmatprep.mubr.msk.bf16.mxu1 %vm1455_vm2, %v1402_v46  ;;  %v1226_v58 = vadd.f32 %v6508_v8, %v1225_v57  ;;  %v5709_v59 = vpop.f32.mrb[42].mxu0 }
 0x1a7   : > { %5775 = vmatmul.mubr.msk.bf16.gmra.mrb[36].mxu1 %vm1455_vm2, %v1403_v45  ;;  %v1362_v60 = vmax.f32 %v1234_v56, 0.0  ;;  %v1237_v61 = vadd.f32 %v5709_v59, %v6508_v8  ;;  %v1228_v62 = vpop.f32.mrb[43].mxu0 }
 0x1a8   : > { %v1360_v63 = vmax.f32 %v1226_v58, 0.0  ;;  %v1229_v0 = vadd.f32 %v6508_v8, %v1228_v62 }
 0x1a9   : > { %v1363_v1 = vmax.f32 %v1237_v61, 0.0 }
 0x1aa   : > { %v1361_v2 = vmax.f32 %v1229_v0, 0.0 }
 0x1ab   : > { %v1405_v3 = vpack.c.bf16 %v1363_v1, %v1362_v60 }
 0x1ac   : > { %v1404_v4 = vpack.c.bf16 %v1361_v2, %v1360_v63  ;;  %v5712_v5 = vpop.f32.mrb[44].mxu0 }
 0x1ad   : > { %v1250_v6 = vadd.f32 %v5712_v5, %v6508_v8  ;;  %v1241_v7 = vpop.f32.mrb[45].mxu0 }
 0x1ae   : > { %5778 = vmatprep.mubr.msk.bf16.mxu1 %vm1455_vm2, %v1404_v4  ;;  %v1242_v9 = vadd.f32 %v6508_v8, %v1241_v7  ;;  %v5713_v10 = vpop.f32.mrb[46].mxu0 }
 0x1af   : > { %5779 = vmatmul.mubr.msk.bf16.gmra.mrb[40].mxu1 %vm1455_vm2, %v1405_v3  ;;  %v1366_v11 = vmax.f32 %v1250_v6, 0.0  ;;  %v1253_v12 = vadd.f32 %v5713_v10, %v6508_v8  ;;  %v1244_v13 = vpop.f32.mrb[47].mxu0 }
 0x1b0   : > { %v1364_v14 = vmax.f32 %v1242_v9, 0.0  ;;  %v1245_v15 = vadd.f32 %v6508_v8, %v1244_v13 }
 0x1b1   : > { %v1367_v16 = vmax.f32 %v1253_v12, 0.0 }
 0x1b2   : > { %v1365_v17 = vmax.f32 %v1245_v15, 0.0 }
 0x1b3   : > { %v1407_v18 = vpack.c.bf16 %v1367_v16, %v1366_v11 }
 0x1b4   : > { %v1406_v19 = vpack.c.bf16 %v1365_v17, %v1364_v14  ;;  %v5716_v20 = vpop.f32.mrb[48].mxu0 }
 0x1b5   : > { %v1266_v21 = vadd.f32 %v5716_v20, %v6508_v8  ;;  %v1257_v22 = vpop.f32.mrb[49].mxu0 }
 0x1b6   : > { %5782 = vmatprep.mubr.msk.bf16.mxu1 %vm1455_vm2, %v1406_v19  ;;  %v1258_v23 = vadd.f32 %v6508_v8, %v1257_v22  ;;  %v5717_v24 = vpop.f32.mrb[50].mxu0  ;;  %v6690_v22 = vld [vmem:[%s9010_s4] ss:$0 sm:$0xff] }
 0x1b7   : > { %5783 = vmatmul.mubr.msk.bf16.gmra.mrb[44].mxu1 %vm1455_vm2, %v1407_v18  ;;  %v1370_v25 = vmax.f32 %v1266_v21, 0.0  ;;  %v1269_v26 = vadd.f32 %v5717_v24, %v6508_v8  ;;  %v1260_v27 = vpop.f32.mrb[51].mxu0 }
 0x1b8   : > { %v1368_v28 = vmax.f32 %v1258_v23, 0.0  ;;  %v1261_v29 = vadd.f32 %v6508_v8, %v1260_v27 }
 0x1b9   : > { %v1371_v30 = vmax.f32 %v1269_v26, 0.0 }
 0x1ba   : > { %v1369_v31 = vmax.f32 %v1261_v29, 0.0 }
 0x1bb   : > { %v1409_v32 = vpack.c.bf16 %v1371_v30, %v1370_v25 }
 0x1bc   : > { %v1408_v34 = vpack.c.bf16 %v1369_v31, %v1368_v28  ;;  %v5720_v35 = vpop.f32.mrb[52].mxu0 }
 0x1bd   : > { %v1282_v36 = vadd.f32 %v5720_v35, %v6508_v8  ;;  %v1273_v37 = vpop.f32.mrb[53].mxu0 }
 0x1be   : > { %v1274_v41 = vadd.f32 %v6508_v8, %v1273_v37  ;;  %v5721_v43 = vpop.f32.mrb[54].mxu0  ;;  %5786 = vmatprep.mubr.msk.bf16.mxu1 %vm1455_vm2, %v1408_v34  ;;  %v1948_v37 = vld [vmem:[%s9011_s5 + $0x58] sm:$0xff] }
 0x1bf   : > { %v1374_v49 = vmax.f32 %v1282_v36, 0.0  ;;  %v1285_v50 = vadd.f32 %v5721_v43, %v6508_v8  ;;  %v1276_v51 = vpop.f32.mrb[55].mxu0  ;;  %5787 = vmatmul.mubr.msk.bf16.gmra.mrb[48].mxu1 %vm1455_vm2, %v1409_v32  ;;  %v1947_v32 = vld [vmem:[%s9011_s5 + $0x50] sm:$0xff] }
 0x1c0   : > { %v1372_v54 = vmax.f32 %v1274_v41, 0.0  ;;  %v1277_v42 = vadd.f32 %v6508_v8, %v1276_v51  ;;  %v1951_v36 = vld [vmem:[%s9011_s5 + $0x70] sm:$0xff]  ;;  %v1952_v41 = vld [vmem:[%s9011_s5 + $0x78] sm:$0xff] }
 0x1c1   : > { %v1375_v45 = vmax.f32 %v1285_v50, 0.0  ;;  %v1955_v50 = vld [vmem:[%s9011_s5 + $0x90] sm:$0xff] }
 0x1c2   : > { %v1373_v46 = vmax.f32 %v1277_v42, 0.0  ;;  %v5536_v42 = vcombine.high %v1948_v37, %v1952_v41 }
 0x1c3   : > { %v1411_v55 = vpack.c.bf16 %v1375_v45, %v1374_v49  ;;  %v1959_v45 = vld [vmem:[%s9011_s5 + $0xb0] sm:$0xff] }
 0x1c4   : > { %v1410_v56 = vpack.c.bf16 %v1373_v46, %v1372_v54  ;;  %v5724_v57 = vpop.f32.mrb[56].mxu0  ;;  %v5534_v54 = vcombine.high %v1947_v32, %v1951_v36  ;;  %v1956_v46 = vld [vmem:[%s9011_s5 + $0x98] sm:$0xff] }
 0x1c5   : > { %v1298_v58 = vadd.f32 %v5724_v57, %v6508_v8  ;;  %v1289_v59 = vpop.f32.mrb[57].mxu0 }
 0x1c6   : > { %v1290_v60 = vadd.f32 %v6508_v8, %v1289_v59  ;;  %v5725_v61 = vpop.f32.mrb[58].mxu0  ;;  %5790 = vmatprep.mubr.msk.bf16.mxu1 %vm1455_vm2, %v1410_v56 }
 0x1c7   : > { %v1378_v62 = vmax.f32 %v1298_v58, 0.0  ;;  %v1301_v63 = vadd.f32 %v5725_v61, %v6508_v8  ;;  %v1292_v0 = vpop.f32.mrb[59].mxu0  ;;  %5791 = vmatmul.mubr.msk.bf16.gmra.mrb[52].mxu1 %vm1455_vm2, %v1411_v55  ;;  %v1960_v55 = vld [vmem:[%s9011_s5 + $0xb8] sm:$0xff]  ;;  %v5533_v61 = vcombine.low %v1947_v32, %v1951_v36 }
 0x1c8   : > { %v1376_v1 = vmax.f32 %v1290_v60, 0.0  ;;  %v1293_v2 = vadd.f32 %v6508_v8, %v1292_v0 }
 0x1c9   : > { %v1379_v3 = vmax.f32 %v1301_v63, 0.0 }
 0x1ca   : > { %v1377_v4 = vmax.f32 %v1293_v2, 0.0  ;;  %v5544_v2 = vcombine.high %v1956_v46, %v1960_v55 }
 0x1cb   : > { %v1413_v5 = vpack.c.bf16 %v1379_v3, %v1378_v62  ;;  %v5535_v62 = vcombine.low %v1948_v37, %v1952_v41 }
 0x1cc   : > { %v1412_v6 = vpack.c.bf16 %v1377_v4, %v1376_v1  ;;  %v5728_v7 = vpop.f32.mrb[60].mxu0  ;;  %v5542_v1 = vcombine.high %v1955_v50, %v1959_v45 }
 0x1cd   : > { %v1314_v9 = vadd.f32 %v5728_v7, %v6508_v8  ;;  %v1305_v10 = vpop.f32.mrb[61].mxu0  ;;  %v5543_v7 = vcombine.low %v1956_v46, %v1960_v55 }
 0x1ce   : > { %v1306_v11 = vadd.f32 %v6508_v8, %v1305_v10  ;;  %v5729_v12 = vpop.f32.mrb[62].mxu0  ;;  %5794 = vmatprep.mubr.msk.bf16.mxu1 %vm1455_vm2, %v1412_v6  ;;  %v5541_v6 = vcombine.low %v1955_v50, %v1959_v45 }
 0x1cf   : > { %v1382_v13 = vmax.f32 %v1314_v9, 0.0  ;;  %v1317_v14 = vadd.f32 %v5729_v12, %v6508_v8  ;;  %v1308_v15 = vpop.f32.mrb[63].mxu0  ;;  %5795 = vmatmul.mubr.msk.bf16.gmra.mrb[56].mxu1 %vm1455_vm2, %v1413_v5 }
 0x1d0   : > { %v1380_v16 = vmax.f32 %v1306_v11, 0.0  ;;  %v1309_v17 = vadd.f32 %v6508_v8, %v1308_v15 }
 0x1d1   : > { %v1383_v18 = vmax.f32 %v1317_v14, 0.0 }
 0x1d2   : > { %v1381_v19 = vmax.f32 %v1309_v17, 0.0  ;;  %v1972_v17 = vld [vmem:[%s9011_s5 + $0x118] sm:$0xff] }
 0x1d3   : > { %v1415_v20 = vpack.c.bf16 %v1383_v18, %v1382_v13  ;;  %v1971_v13 = vld [vmem:[%s9011_s5 + $0x110] sm:$0xff]  ;;  %v1976_v18 = vld [vmem:[%s9011_s5 + $0x138] sm:$0xff] }
 0x1d4   : > { %v1414_v21 = vpack.c.bf16 %v1381_v19, %v1380_v16  ;;  %v1975_v16 = vld [vmem:[%s9011_s5 + $0x130] sm:$0xff] }
 0x1d6   : > { %5798 = vmatprep.mubr.msk.bf16.mxu1 %vm1455_vm2, %v1414_v21 }
 0x1d7   : > { %5799 = vmatmul.mubr.msk.bf16.gmra.mrb[60].mxu1 %vm1455_vm2, %v1415_v20 }
 0x1d8   : > { %2748 = vmatprep.mubr.bf16.mxu1 %v9014_v33 }
 0x232   : > { %v5740_v23 = vpop.f32.mrb[0].mxu1 }
 0x233   : > { %v1595_v24 = vadd.f32 %v5740_v23, %v6690_v22  ;;  %v1586_v25 = vpop.f32.mrb[1].mxu1 }
 0x234   : > { %v1587_v8 = vadd.f32 %v6690_v22, %v1586_v25  ;;  %v5741_v26 = vpop.f32.mrb[2].mxu1 }
 0x235   : > { %v1598_v27 = vadd.f32 %v5741_v26, %v6690_v22  ;;  %v1589_v28 = vpop.f32.mrb[3].mxu1  ;;  %v1843_v30 = vmax.f32 %v1595_v24, 0.0 }
 0x236   : > { %v1590_v29 = vadd.f32 %v6690_v22, %v1589_v28  ;;  %v1841_v34 = vmax.f32 %v1587_v8, 0.0  ;;  %v5560_v28 = vcombine.high %v1972_v17, %v1976_v18 }
 0x237   : > { %v1844_v31 = vmax.f32 %v1598_v27, 0.0  ;;  %v5558_v27 = vcombine.high %v1971_v13, %v1975_v16 }
 0x238   : > { %v1842_v35 = vmax.f32 %v1590_v29, 0.0 }
 0x239   : > { %v6708_v43 = vpack.c.bf16 %v1844_v31, %v1843_v30 }
 0x23a   : > { %v6710_v47 = vpack.c.bf16 %v1842_v35, %v1841_v34  ;;  %v5744_v49 = vpop.f32.mrb[4].mxu1  ;;  %v5557_v34 = vcombine.low %v1971_v13, %v1975_v16  ;;  %v5559_v35 = vcombine.low %v1972_v17, %v1976_v18 }
 0x23b   : > { %v1611_v51 = vadd.f32 %v5744_v49, %v6690_v22  ;;  %v1602_v53 = vpop.f32.mrb[5].mxu1 }
 0x23c   : > { %v1603_v56 = vadd.f32 %v6690_v22, %v1602_v53  ;;  %2396 = vmatmul.mubr.bf16.vlgmr.msra.gmra.mrb[64].mxu0 %v6710_v47  ;;  %2749 = vmatmul.mubr.bf16.vlgmr.msra.gmra.mrb[64].mxu1 %v6710_v47  ;;  %v5745_v57 = vpop.f32.mrb[6].mxu1 }
 0x23d   : > { %v1847_v58 = vmax.f32 %v1611_v51, 0.0  ;;  %3070 = vmatpush1.bf16.msra.mxu0 %v5525_v44  ;;  %3423 = vmatpush1.bf16.msra.mxu1 %v5527_v52  ;;  %v1614_v59 = vadd.f32 %v5745_v57, %v6690_v22  ;;  %v1605_v60 = vpop.f32.mrb[7].mxu1  ;;  %v1967_v44 = vld [vmem:[%s9011_s5 + $0xf0] sm:$0xff]  ;;  %v1968_v52 = vld [vmem:[%s9011_s5 + $0xf8] sm:$0xff] }
 0x23e   : > { %v1845_v63 = vmax.f32 %v1603_v56, 0.0  ;;  %v1606_v0 = vadd.f32 %v6690_v22, %v1605_v60  ;;  %2405 = vmatprep.mubr.bf16.mxu0 %v9014_v33  ;;  %2758 = vmatprep.mubr.bf16.mxu1 %v9014_v33  ;;  %v5550_v11 = vcombine.high %v1963_v39, %v1967_v44  ;;  %v5552_v12 = vcombine.high %v1964_v48, %v1968_v52 }
 0x23f   : > { %v1848_v38 = vmax.f32 %v1614_v59, 0.0  ;;  %3071 = vmatprep.subr.bf16.mxu0 %v5534_v54  ;;  %3424 = vmatprep.subr.bf16.mxu1 %v5536_v42  ;;  %v5549_v25 = vcombine.low %v1963_v39, %v1967_v44  ;;  %v5551_v8 = vcombine.low %v1964_v48, %v1968_v52  ;;  %v1984_v52 = vld [vmem:[%s9011_s5 + $0x178] sm:$0xff] }
 0x240   : > { %v1846_v40 = vmax.f32 %v1606_v0, 0.0 }
 0x241   : > { %v6750_v3 = vpack.c.bf16 %v1848_v38, %v1847_v58  ;;  %3072 = vmatpush1.bf16.msra.mxu0 %v5533_v61  ;;  %3425 = vmatpush1.bf16.msra.mxu1 %v5535_v62  ;;  %v1980_v38 = vld [vmem:[%s9011_s5 + $0x158] sm:$0xff] }
 0x242   : > { %v6752_v4 = vpack.c.bf16 %v1846_v40, %v1845_v63  ;;  %v5748_v5 = vpop.f32.mrb[8].mxu1  ;;  %3073 = vmatprep.subr.bf16.mxu0 %v5542_v1  ;;  %3426 = vmatprep.subr.bf16.mxu1 %v5544_v2  ;;  %v1979_v1 = vld [vmem:[%s9011_s5 + $0x150] sm:$0xff] }
 0x243   : > { %v1627_v9 = vadd.f32 %v5748_v5, %v6690_v22  ;;  %v1618_v10 = vpop.f32.mrb[9].mxu1  ;;  %v1983_v2 = vld [vmem:[%s9011_s5 + $0x170] sm:$0xff] }
 0x244   : > { %2406 = vmatmul.mubr.bf16.gmra.mrb[68].mxu0 %v6708_v43  ;;  %2759 = vmatmul.mubr.bf16.gmra.mrb[68].mxu1 %v6708_v43  ;;  %v1619_v14 = vadd.f32 %v6690_v22, %v1618_v10  ;;  %v5749_v15 = vpop.f32.mrb[10].mxu1  ;;  %v5565_v44 = vcombine.low %v1979_v1, %v1983_v2  ;;  %v5566_v48 = vcombine.high %v1979_v1, %v1983_v2 }
 0x245   : > { %v1851_v19 = vmax.f32 %v1627_v9, 0.0  ;;  %2415 = vmatprep.mubr.bf16.mxu0 %v9014_v33  ;;  %2768 = vmatprep.mubr.bf16.mxu1 %v9014_v33  ;;  %v1630_v20 = vadd.f32 %v5749_v15, %v6690_v22  ;;  %v1621_v21 = vpop.f32.mrb[11].mxu1 }
 0x246   : > { %v1849_v23 = vmax.f32 %v1619_v14, 0.0  ;;  %v1622_v24 = vadd.f32 %v6690_v22, %v1621_v21  ;;  %3074 = vmatpush1.bf16.msra.mxu0 %v5541_v6  ;;  %3427 = vmatpush1.bf16.msra.mxu1 %v5543_v7  ;;  %v5567_v6 = vcombine.low %v1980_v38, %v1984_v52  ;;  %v5568_v7 = vcombine.high %v1980_v38, %v1984_v52 }
 0x247   : > { %v1852_v26 = vmax.f32 %v1630_v20, 0.0  ;;  %3075 = vmatprep.subr.bf16.mxu0 %v5550_v11  ;;  %3428 = vmatprep.subr.bf16.mxu1 %v5552_v12 }
 0x248   : > { %v1850_v29 = vmax.f32 %v1622_v24, 0.0 }
 0x249   : > { %v6774_v30 = vpack.c.bf16 %v1852_v26, %v1851_v19 }
 0x24a   : > { %v6776_v31 = vpack.c.bf16 %v1850_v29, %v1849_v23  ;;  %v5752_v32 = vpop.f32.mrb[12].mxu1  ;;  %3076 = vmatpush1.bf16.msra.mxu0 %v5549_v25  ;;  %3429 = vmatpush1.bf16.msra.mxu1 %v5551_v8 }
 0x24b   : > { %v1643_v36 = vadd.f32 %v5752_v32, %v6690_v22  ;;  %v1634_v37 = vpop.f32.mrb[13].mxu1  ;;  %3077 = vmatprep.subr.bf16.mxu0 %v5558_v27  ;;  %3430 = vmatprep.subr.bf16.mxu1 %v5560_v28 }
 0x24c   : > { %2416 = vmatmul.mubr.bf16.gmra.mrb[72].mxu0 %v6752_v4  ;;  %2769 = vmatmul.mubr.bf16.gmra.mrb[72].mxu1 %v6752_v4  ;;  %v1635_v41 = vadd.f32 %v6690_v22, %v1634_v37  ;;  %v5753_v49 = vpop.f32.mrb[14].mxu1 }
 0x24d   : > { %2425 = vmatprep.mubr.bf16.mxu0 %v9014_v33  ;;  %2778 = vmatprep.mubr.bf16.mxu1 %v9014_v33  ;;  %v1855_v50 = vmax.f32 %v1643_v36, 0.0  ;;  %v1646_v51 = vadd.f32 %v5753_v49, %v6690_v22  ;;  %v1637_v53 = vpop.f32.mrb[15].mxu1 }
 0x24e   : > { %v1853_v54 = vmax.f32 %v1635_v41, 0.0  ;;  %v1638_v42 = vadd.f32 %v6690_v22, %v1637_v53  ;;  %3078 = vmatpush1.bf16.msra.mxu0 %v5557_v34  ;;  %3431 = vmatpush1.bf16.msra.mxu1 %v5559_v35 }
 0x24f   : > { %v1856_v45 = vmax.f32 %v1646_v51, 0.0  ;;  %3079 = vmatprep.subr.bf16.mxu0 %v5566_v48  ;;  %3432 = vmatprep.subr.bf16.mxu1 %v5568_v7  ;;  %v1987_v7 = vld [vmem:[%s9011_s5 + $0x190] sm:$0xff] }
 0x250   : > { %v1854_v46 = vmax.f32 %v1638_v42, 0.0 }
 0x251   : > { %v6786_v55 = vpack.c.bf16 %v1856_v45, %v1855_v50 }
 0x252   : > { %v6788_v56 = vpack.c.bf16 %v1854_v46, %v1853_v54  ;;  %v5756_v57 = vpop.f32.mrb[16].mxu1  ;;  %3080 = vmatpush1.bf16.msra.mxu0 %v5565_v44  ;;  %3433 = vmatpush1.bf16.msra.mxu1 %v5567_v6 }
 0x253   : > { %v1659_v58 = vadd.f32 %v5756_v57, %v6690_v22  ;;  %v1650_v59 = vpop.f32.mrb[17].mxu1 }
 0x254   : > { %2426 = vmatmul.mubr.bf16.gmra.mrb[76].mxu0 %v6750_v3  ;;  %2779 = vmatmul.mubr.bf16.gmra.mrb[76].mxu1 %v6750_v3  ;;  %v1651_v60 = vadd.f32 %v6690_v22, %v1650_v59  ;;  %v5757_v61 = vpop.f32.mrb[18].mxu1 }
 0x255   : > { %2435 = vmatprep.mubr.bf16.mxu0 %v9014_v33  ;;  %2788 = vmatprep.mubr.bf16.mxu1 %v9014_v33  ;;  %v1859_v62 = vmax.f32 %v1659_v58, 0.0  ;;  %v1662_v63 = vadd.f32 %v5757_v61, %v6690_v22  ;;  %v1653_v0 = vpop.f32.mrb[19].mxu1 }
 0x256   : > { %v1857_v39 = vmax.f32 %v1651_v60, 0.0  ;;  %v1654_v40 = vadd.f32 %v6690_v22, %v1653_v0 }
 0x257   : > { %v1860_v5 = vmax.f32 %v1662_v63, 0.0 }
 0x258   : > { %v1858_v9 = vmax.f32 %v1654_v40, 0.0 }
 0x259   : > { %v6810_v10 = vpack.c.bf16 %v1860_v5, %v1859_v62 }
 0x25a   : > { %v6812_v11 = vpack.c.bf16 %v1858_v9, %v1857_v39  ;;  %v5760_v12 = vpop.f32.mrb[20].mxu1  ;;  %v1991_v9 = vld [vmem:[%s9011_s5 + $0x1b0] sm:$0xff] }
 0x25b   : > { %v1675_v13 = vadd.f32 %v5760_v12, %v6690_v22  ;;  %v1666_v14 = vpop.f32.mrb[21].mxu1  ;;  %v1988_v12 = vld [vmem:[%s9011_s5 + $0x198] sm:$0xff] }
 0x25c   : > { %2436 = vmatmul.mubr.bf16.gmra.mrb[80].mxu0 %v6776_v31  ;;  %2789 = vmatmul.mubr.bf16.gmra.mrb[80].mxu1 %v6776_v31  ;;  %v1667_v15 = vadd.f32 %v6690_v22, %v1666_v14  ;;  %v5761_v16 = vpop.f32.mrb[22].mxu1 }
 0x25d   : > { %2445 = vmatprep.mubr.bf16.mxu0 %v9014_v33  ;;  %2798 = vmatprep.mubr.bf16.mxu1 %v9014_v33  ;;  %v1863_v17 = vmax.f32 %v1675_v13, 0.0  ;;  %v1678_v18 = vadd.f32 %v5761_v16, %v6690_v22  ;;  %v1669_v19 = vpop.f32.mrb[23].mxu1  ;;  %v5574_v16 = vcombine.high %v1987_v7, %v1991_v9 }
 0x25e   : > { %v1861_v20 = vmax.f32 %v1667_v15, 0.0  ;;  %v1670_v21 = vadd.f32 %v6690_v22, %v1669_v19  ;;  %v5573_v15 = vcombine.low %v1987_v7, %v1991_v9 }
 0x25f   : > { %v1864_v23 = vmax.f32 %v1678_v18, 0.0  ;;  %3081 = vmatprep.subr.bf16.mxu0 %v5574_v16 }
 0x260   : > { %v1862_v24 = vmax.f32 %v1670_v21, 0.0  ;;  %3082 = vmatpush1.bf16.msra.mxu0 %v5573_v15 }
 0x261   : > { %v6822_v25 = vpack.c.bf16 %v1864_v23, %v1863_v17  ;;  %v1992_v17 = vld [vmem:[%s9011_s5 + $0x1b8] sm:$0xff] }
 0x262   : > { %v6824_v8 = vpack.c.bf16 %v1862_v24, %v1861_v20  ;;  %v5764_v26 = vpop.f32.mrb[24].mxu1  ;;  %v5575_v19 = vcombine.low %v1988_v12, %v1992_v17  ;;  %v5576_v20 = vcombine.high %v1988_v12, %v1992_v17 }
 0x263   : > { %v1691_v27 = vadd.f32 %v5764_v26, %v6690_v22  ;;  %v1682_v28 = vpop.f32.mrb[25].mxu1 }
 0x264   : > { %2446 = vmatmul.mubr.bf16.gmra.mrb[84].mxu0 %v6774_v30  ;;  %2799 = vmatmul.mubr.bf16.gmra.mrb[84].mxu1 %v6774_v30  ;;  %v1683_v29 = vadd.f32 %v6690_v22, %v1682_v28  ;;  %v5765_v32 = vpop.f32.mrb[26].mxu1 }
 0x265   : > { %2455 = vmatprep.mubr.bf16.mxu0 %v9014_v33  ;;  %2808 = vmatprep.mubr.bf16.mxu1 %v9014_v33  ;;  %v1867_v34 = vmax.f32 %v1691_v27, 0.0  ;;  %v1694_v35 = vadd.f32 %v5765_v32, %v6690_v22  ;;  %v1685_v36 = vpop.f32.mrb[27].mxu1 }
 0x266   : > { %v1865_v37 = vmax.f32 %v1683_v29, 0.0  ;;  %v1686_v41 = vadd.f32 %v6690_v22, %v1685_v36  ;;  %3434 = vmatprep.subr.bf16.mxu1 %v5576_v20 }
 0x267   : > { %v1868_v49 = vmax.f32 %v1694_v35, 0.0  ;;  %3435 = vmatpush1.bf16.msra.mxu1 %v5575_v19 }
 0x268   : > { %v1866_v50 = vmax.f32 %v1686_v41, 0.0 }
 0x269   : > { %v6834_v51 = vpack.c.bf16 %v1868_v49, %v1867_v34 }
 0x26a   : > { %v6836_v53 = vpack.c.bf16 %v1866_v50, %v1865_v37  ;;  %v5768_v54 = vpop.f32.mrb[28].mxu1 }
 0x26b   : > { %v1707_v42 = vadd.f32 %v5768_v54, %v6690_v22  ;;  %v1698_v45 = vpop.f32.mrb[29].mxu1 }
 0x26c   : > { %2456 = vmatmul.mubr.bf16.gmra.mrb[88].mxu0 %v6788_v56  ;;  %2809 = vmatmul.mubr.bf16.gmra.mrb[88].mxu1 %v6788_v56  ;;  %v1699_v46 = vadd.f32 %v6690_v22, %v1698_v45  ;;  %v5769_v57 = vpop.f32.mrb[30].mxu1 }
 0x26d   : > { %2465 = vmatprep.mubr.bf16.mxu0 %v9014_v33  ;;  %2818 = vmatprep.mubr.bf16.mxu1 %v9014_v33  ;;  %v1871_v58 = vmax.f32 %v1707_v42, 0.0  ;;  %v1710_v59 = vadd.f32 %v5769_v57, %v6690_v22  ;;  %v1701_v60 = vpop.f32.mrb[31].mxu1 }
 0x26e   : > { %v1869_v61 = vmax.f32 %v1699_v46, 0.0  ;;  %v1702_v62 = vadd.f32 %v6690_v22, %v1701_v60 }
 0x26f   : > { %v1872_v63 = vmax.f32 %v1710_v59, 0.0 }
 0x270   : > { %v1870_v0 = vmax.f32 %v1702_v62, 0.0 }
 0x271   : > { %v6846_v1 = vpack.c.bf16 %v1872_v63, %v1871_v58 }
 0x272   : > { %v6848_v2 = vpack.c.bf16 %v1870_v0, %v1869_v61  ;;  %v5772_v38 = vpop.f32.mrb[32].mxu1 }
 0x273   : > { %v1723_v39 = vadd.f32 %v5772_v38, %v6690_v22  ;;  %v1714_v40 = vpop.f32.mrb[33].mxu1 }
 0x274   : > { %2466 = vmatmul.mubr.bf16.gmra.mrb[92].mxu0 %v6786_v55  ;;  %2819 = vmatmul.mubr.bf16.gmra.mrb[92].mxu1 %v6786_v55  ;;  %v1715_v44 = vadd.f32 %v6690_v22, %v1714_v40  ;;  %v5773_v48 = vpop.f32.mrb[34].mxu1 }
 0x275   : > { %2475 = vmatprep.mubr.bf16.mxu0 %v9014_v33  ;;  %2828 = vmatprep.mubr.bf16.mxu1 %v9014_v33  ;;  %v1875_v52 = vmax.f32 %v1723_v39, 0.0  ;;  %v1726_v5 = vadd.f32 %v5773_v48, %v6690_v22  ;;  %v1717_v6 = vpop.f32.mrb[35].mxu1 }
 0x276   : > { %v1873_v13 = vmax.f32 %v1715_v44, 0.0  ;;  %v1718_v14 = vadd.f32 %v6690_v22, %v1717_v6 }
 0x277   : > { %v1876_v18 = vmax.f32 %v1726_v5, 0.0 }
 0x278   : > { %v1874_v21 = vmax.f32 %v1718_v14, 0.0 }
 0x279   : > { %v6870_v23 = vpack.c.bf16 %v1876_v18, %v1875_v52 }
 0x27a   : > { %v6872_v24 = vpack.c.bf16 %v1874_v21, %v1873_v13  ;;  %v5776_v26 = vpop.f32.mrb[36].mxu1 }
 0x27b   : > { %9092 = vst [vmem:[#allocation6_spill] sm:$0xff] %v6870_v23  ;;  %v1739_v27 = vadd.f32 %v5776_v26, %v6690_v22  ;;  %v1730_v28 = vpop.f32.mrb[37].mxu1 }
 0x27c   : > { %2476 = vmatmul.mubr.bf16.gmra.mrb[96].mxu0 %v6812_v11  ;;  %2829 = vmatmul.mubr.bf16.gmra.mrb[96].mxu1 %v6812_v11  ;;  %v1731_v29 = vadd.f32 %v6690_v22, %v1730_v28  ;;  %v5777_v32 = vpop.f32.mrb[38].mxu1 }
 0x27d   : > { %2485 = vmatprep.mubr.bf16.mxu0 %v9014_v33  ;;  %2838 = vmatprep.mubr.bf16.mxu1 %v9014_v33  ;;  %v1879_v34 = vmax.f32 %v1739_v27, 0.0  ;;  %v1742_v35 = vadd.f32 %v5777_v32, %v6690_v22  ;;  %v1733_v36 = vpop.f32.mrb[39].mxu1 }
 0x27e   : > { %v1877_v37 = vmax.f32 %v1731_v29, 0.0  ;;  %v1734_v41 = vadd.f32 %v6690_v22, %v1733_v36 }
 0x27f   : > { %v1880_v49 = vmax.f32 %v1742_v35, 0.0 }
 0x280   : > { %v1878_v50 = vmax.f32 %v1734_v41, 0.0 }
 0x281   : > { %v6882_v54 = vpack.c.bf16 %v1880_v49, %v1879_v34 }
 0x282   : > { %v6884_v42 = vpack.c.bf16 %v1878_v50, %v1877_v37  ;;  %v5780_v45 = vpop.f32.mrb[40].mxu1 }
 0x283   : > { %9093 = vst [vmem:[#allocation7_spill] sm:$0xff] %v6882_v54  ;;  %v1755_v46 = vadd.f32 %v5780_v45, %v6690_v22  ;;  %v1746_v57 = vpop.f32.mrb[41].mxu1 }
 0x284   : > { %9094 = vst [vmem:[#allocation8_spill] sm:$0xff] %v6884_v42  ;;  %2486 = vmatmul.mubr.bf16.gmra.mrb[100].mxu0 %v6810_v10  ;;  %2839 = vmatmul.mubr.bf16.gmra.mrb[100].mxu1 %v6810_v10  ;;  %v1747_v58 = vadd.f32 %v6690_v22, %v1746_v57  ;;  %v5781_v59 = vpop.f32.mrb[42].mxu1 }
 0x285   : > { %2495 = vmatprep.mubr.bf16.mxu0 %v9014_v33  ;;  %2848 = vmatprep.mubr.bf16.mxu1 %v9014_v33  ;;  %v1883_v60 = vmax.f32 %v1755_v46, 0.0  ;;  %v1758_v61 = vadd.f32 %v5781_v59, %v6690_v22  ;;  %v1749_v62 = vpop.f32.mrb[43].mxu1 }
 0x286   : > { %v1881_v63 = vmax.f32 %v1747_v58, 0.0  ;;  %v1750_v0 = vadd.f32 %v6690_v22, %v1749_v62 }
 0x287   : > { %v1884_v38 = vmax.f32 %v1758_v61, 0.0 }
 0x288   : > { %v1882_v39 = vmax.f32 %v1750_v0, 0.0 }
 0x289   : > { %v6894_v40 = vpack.c.bf16 %v1884_v38, %v1883_v60 }
 0x28a   : > { %v6896_v44 = vpack.c.bf16 %v1882_v39, %v1881_v63  ;;  %v5784_v48 = vpop.f32.mrb[44].mxu1 }
 0x28b   : > { %9095 = vst [vmem:[#allocation9_spill] sm:$0xff] %v6894_v40  ;;  %v1771_v52 = vadd.f32 %v5784_v48, %v6690_v22  ;;  %v1762_v5 = vpop.f32.mrb[45].mxu1  ;;  %v1995_v48 = vld [vmem:[%s9011_s5 + $0x1d0] sm:$0xff] }
 0x28c   : > { %9096 = vst [vmem:[#allocation10_spill] sm:$0xff] %v6896_v44  ;;  %2496 = vmatmul.mubr.bf16.gmra.mrb[104].mxu0 %v6824_v8  ;;  %2849 = vmatmul.mubr.bf16.gmra.mrb[104].mxu1 %v6824_v8  ;;  %v1763_v6 = vadd.f32 %v6690_v22, %v1762_v5  ;;  %v5785_v7 = vpop.f32.mrb[46].mxu1  ;;  %v1996_v5 = vld [vmem:[%s9011_s5 + $0x1d8] sm:$0xff] }
 0x28d   : > { %2505 = vmatprep.mubr.bf16.mxu0 %v9014_v33  ;;  %2858 = vmatprep.mubr.bf16.mxu1 %v9014_v33  ;;  %v1887_v9 = vmax.f32 %v1771_v52, 0.0  ;;  %v1774_v12 = vadd.f32 %v5785_v7, %v6690_v22  ;;  %v1765_v13 = vpop.f32.mrb[47].mxu1  ;;  %v1999_v52 = vld [vmem:[%s9011_s5 + $0x1f0] sm:$0xff] }
 0x28e   : > { %v1885_v14 = vmax.f32 %v1763_v6, 0.0  ;;  %v1766_v15 = vadd.f32 %v6690_v22, %v1765_v13  ;;  %v5582_v7 = vcombine.high %v1995_v48, %v1999_v52 }
 0x28f   : > { %v1888_v16 = vmax.f32 %v1774_v12, 0.0 }
 0x290   : > { %v1886_v17 = vmax.f32 %v1766_v15, 0.0  ;;  %3083 = vmatprep.subr.bf16.mxu0 %v5582_v7 }
 0x291   : > { %v6906_v18 = vpack.c.bf16 %v1888_v16, %v1887_v9  ;;  %v2000_v9 = vld [vmem:[%s9011_s5 + $0x1f8] sm:$0xff] }
 0x292   : > { %v6908_v19 = vpack.c.bf16 %v1886_v17, %v1885_v14  ;;  %v5788_v20 = vpop.f32.mrb[48].mxu1  ;;  %v5581_v14 = vcombine.low %v1995_v48, %v1999_v52  ;;  %v5584_v15 = vcombine.high %v1996_v5, %v2000_v9 }
 0x293   : > { %9097 = vst [vmem:[#allocation11_spill] sm:$0xff] %v6906_v18  ;;  %v1787_v21 = vadd.f32 %v5788_v20, %v6690_v22  ;;  %v1778_v26 = vpop.f32.mrb[49].mxu1  ;;  %v5583_v20 = vcombine.low %v1996_v5, %v2000_v9  ;;  %v2001_v9 = vld [vmem:[%s9012_s6] sm:$0xff] }
 0x294   : > { %9098 = vst [vmem:[#allocation12_spill] sm:$0xff] %v6908_v19  ;;  %2506 = vmatmul.mubr.bf16.gmra.mrb[108].mxu0 %v6822_v25  ;;  %2859 = vmatmul.mubr.bf16.gmra.mrb[108].mxu1 %v6822_v25  ;;  %v1779_v27 = vadd.f32 %v6690_v22, %v1778_v26  ;;  %v5789_v28 = vpop.f32.mrb[50].mxu1 }
 0x295   : > { %2515 = vmatprep.mubr.bf16.mxu0 %v9014_v33  ;;  %2868 = vmatprep.mubr.bf16.mxu1 %v9014_v33  ;;  %v1891_v29 = vmax.f32 %v1787_v21, 0.0  ;;  %v1790_v32 = vadd.f32 %v5789_v28, %v6690_v22  ;;  %v1781_v34 = vpop.f32.mrb[51].mxu1 }
 0x296   : > { %v1889_v35 = vmax.f32 %v1779_v27, 0.0  ;;  %v1782_v36 = vadd.f32 %v6690_v22, %v1781_v34  ;;  %3436 = vmatprep.subr.bf16.mxu1 %v5584_v15  ;;  %3084 = vmatpush1.bf16.msra.mxu0 %v5581_v14  ;;  %v7023_v15 = vstv %s5585_s21 }
 0x297   : > { %v1892_v37 = vmax.f32 %v1790_v32, 0.0  ;;  %3437 = vmatpush1.bf16.msra.mxu1 %v5583_v20 }
 0x298   : > { %v1890_v41 = vmax.f32 %v1782_v36, 0.0 }
 0x299   : > { %v6918_v49 = vpack.c.bf16 %v1892_v37, %v1891_v29 }
 0x29a   : > { %v6920_v50 = vpack.c.bf16 %v1890_v41, %v1889_v35  ;;  %v5792_v45 = vpop.f32.mrb[52].mxu1 }
 0x29b   : > { %9099 = vst [vmem:[#allocation13_spill] sm:$0xff] %v6918_v49  ;;  %v1803_v46 = vadd.f32 %v5792_v45, %v6690_v22  ;;  %v1794_v57 = vpop.f32.mrb[53].mxu1 }
 0x29c   : > { %9100 = vst [vmem:[#allocation14_spill] sm:$0xff] %v6920_v50  ;;  %2516 = vmatmul.mubr.bf16.gmra.mrb[112].mxu0 %v6836_v53  ;;  %2869 = vmatmul.mubr.bf16.gmra.mrb[112].mxu1 %v6836_v53  ;;  %v1795_v58 = vadd.f32 %v6690_v22, %v1794_v57  ;;  %v5793_v59 = vpop.f32.mrb[54].mxu1 }
 0x29d   : > { %2525 = vmatprep.mubr.bf16.mxu0 %v9014_v33  ;;  %2878 = vmatprep.mubr.bf16.mxu1 %v9014_v33  ;;  %v1895_v60 = vmax.f32 %v1803_v46, 0.0  ;;  %v1806_v61 = vadd.f32 %v5793_v59, %v6690_v22  ;;  %v1797_v62 = vpop.f32.mrb[55].mxu1 }
 0x29e   : > { %v1893_v63 = vmax.f32 %v1795_v58, 0.0  ;;  %v1798_v0 = vadd.f32 %v6690_v22, %v1797_v62 }
 0x29f   : > { %v1896_v38 = vmax.f32 %v1806_v61, 0.0 }
 0x2a0   : > { %v1894_v39 = vmax.f32 %v1798_v0, 0.0 }
 0x2a1   : > { %v6939_v6 = vpack.c.bf16 %v1896_v38, %v1895_v60 }
 0x2a2   : > { %v6944_v12 = vpack.c.bf16 %v1894_v39, %v1893_v63  ;;  %v5796_v13 = vpop.f32.mrb[56].mxu1 }
 0x2a3   : > { %9101 = vst [vmem:[#allocation15_spill] sm:$0xff] %v6939_v6  ;;  %v1819_v16 = vadd.f32 %v5796_v13, %v6690_v22  ;;  %v1810_v17 = vpop.f32.mrb[57].mxu1 }
 0x2a4   : > { %9102 = vst [vmem:[#allocation16_spill] sm:$0xff] %v6944_v12  ;;  %2526 = vmatmul.mubr.bf16.gmra.mrb[116].mxu0 %v6834_v51  ;;  %2879 = vmatmul.mubr.bf16.gmra.mrb[116].mxu1 %v6834_v51  ;;  %v1811_v21 = vadd.f32 %v6690_v22, %v1810_v17  ;;  %v5797_v26 = vpop.f32.mrb[58].mxu1 }
 0x2a5   : > { %2535 = vmatprep.mubr.bf16.mxu0 %v9014_v33  ;;  %2888 = vmatprep.mubr.bf16.mxu1 %v9014_v33  ;;  %v1899_v27 = vmax.f32 %v1819_v16, 0.0  ;;  %v1822_v28 = vadd.f32 %v5797_v26, %v6690_v22  ;;  %v1813_v29 = vpop.f32.mrb[59].mxu1 }
 0x2a6   : > { %v1897_v32 = vmax.f32 %v1811_v21, 0.0  ;;  %v1814_v34 = vadd.f32 %v6690_v22, %v1813_v29 }
 0x2a7   : > { %v1900_v35 = vmax.f32 %v1822_v28, 0.0 }
 0x2a8   : > { %v1898_v36 = vmax.f32 %v1814_v34, 0.0 }
 0x2a9   : > { %v6954_v37 = vpack.c.bf16 %v1900_v35, %v1899_v27 }
 0x2aa   : > { %v6956_v41 = vpack.c.bf16 %v1898_v36, %v1897_v32  ;;  %v5800_v45 = vpop.f32.mrb[60].mxu1 }
 0x2ab   : > { %9103 = vst [vmem:[#allocation17_spill] sm:$0xff] %v6954_v37  ;;  %v1835_v46 = vadd.f32 %v5800_v45, %v6690_v22  ;;  %v1826_v57 = vpop.f32.mrb[61].mxu1 }
 0x2ac   : > { %9104 = vst [vmem:[#allocation18_spill] sm:$0xff] %v6956_v41  ;;  %2536 = vmatmul.mubr.bf16.gmra.mrb[120].mxu0 %v6848_v2  ;;  %2889 = vmatmul.mubr.bf16.gmra.mrb[120].mxu1 %v6848_v2  ;;  %v1827_v58 = vadd.f32 %v6690_v22, %v1826_v57  ;;  %v5801_v59 = vpop.f32.mrb[62].mxu1 }
 0x2ad   : > { %2545 = vmatprep.mubr.bf16.mxu0 %v9014_v33  ;;  %2898 = vmatprep.mubr.bf16.mxu1 %v9014_v33  ;;  %v1903_v60 = vmax.f32 %v1835_v46, 0.0  ;;  %v1838_v61 = vadd.f32 %v5801_v59, %v6690_v22  ;;  %v1829_v62 = vpop.f32.mrb[63].mxu1 }
 0x2ae   : > { %v1901_v63 = vmax.f32 %v1827_v58, 0.0  ;;  %v1830_v0 = vadd.f32 %v6690_v22, %v1829_v62  ;;  %v2003_v22 = vlaneseq }
 0x2af   : > { %v1904_v38 = vmax.f32 %v1838_v61, 0.0 }
 0x2b0   : > { %v1902_v39 = vmax.f32 %v1830_v0, 0.0  ;;  %v7010_v5 = vshrl.u32 %v2003_v22, 7 }
 0x2b1   : > { %v6966_v48 = vpack.c.bf16 %v1904_v38, %v1903_v60 }
 0x2b2   : > { %v6968_v52 = vpack.c.bf16 %v1902_v39, %v1901_v63  ;;  %9107 = vst [vmem:[#allocation21_spill] sm:$0xff] %v7010_v5  ;;  %v2005_v7 = vsub.s32 0, %v7010_v5  ;;  %v2013_v13 = vsub.s32 2, %v7010_v5  ;;  %v3777_v14 = vadd.s32 8, %v7010_v5 }
 0x2b3   : > { %9105 = vst [vmem:[#allocation19_spill] sm:$0xff] %v6966_v48  ;;  %v2009_v16 = vsub.s32 1, %v7010_v5  ;;  %v2017_v17 = vsub.s32 3, %v7010_v5  ;;  %v7033_v21 = vadd.s32 %v7023_v15, %v7010_v5  ;;  %v3778_v32 = vadd.s32 16, %v7010_v5 }
 0x2b4   : > { %9106 = vst [vmem:[#allocation20_spill] sm:$0xff] %v6968_v52  ;;  %2546 = vmatmul.mubr.bf16.gmra.mrb[124].mxu0 %v6846_v1  ;;  %2899 = vmatmul.mubr.bf16.gmra.mrb[124].mxu1 %v6846_v1  ;;  %v7027_v20 = vrot.slane %v2001_v9, %v2005_v7  ;;  %v7035_v26 = vrot.slane %v2001_v9, %v2013_v13  ;;  %v3779_v34 = vadd.s32 24, %v7010_v5  ;;  %v3781_v13 = vadd.s32 40, %v7010_v5 }
 0x2b5   : > { %2555 = vmatprep.mubr.bf16.mxu0 %v9014_v33  ;;  %2908 = vmatprep.mubr.bf16.mxu1 %v9014_v33  ;;  %9108 = vst [vmem:[#allocation22_spill] sm:$0xff] %v7033_v21  ;;  %v7038_v27 = vadd.s32 %v7023_v15, %v3777_v14  ;;  %v7040_v28 = vrot.slane %v2001_v9, %v2009_v16  ;;  %vm3842_vm3 = vcmp.lt.s32.totalorder %v7033_v21, 500 }
 0x2b6   : > { %v7042_v29 = vrot.slane %v2001_v9, %v2017_v17  ;;  %v7055_v63 = vadd.s32 %v7023_v15, %v3778_v32  ;;  %v7058_v0 = vadd.s32 %v7023_v15, %v3779_v34  ;;  %v3780_v9 = vadd.s32 32, %v7010_v5 }
 0x2b7   : > { %vm3843_vm4 = vcmp.lt.s32.totalorder %v7038_v27, 500 }
 0x2b8   : > { %vm3844_vm5 = vcmp.lt.s32.totalorder %v7055_v63, 500  ;;  %vm3845_vm6 = vcmp.lt.s32.totalorder %v7058_v0, 500 }
 0x2bc   : > { %2556 = vmatmul.mubr.bf16.gmra.mrb[128].mxu0 %v6872_v24  ;;  %2909 = vmatmul.mubr.bf16.gmra.mrb[128].mxu1 %v6872_v24 }
 0x2bd   : > { %2565 = vmatprep.mubr.bf16.mxu0 %v9014_v33  ;;  %2918 = vmatprep.mubr.bf16.mxu1 %v9014_v33 }
 0x2c4   : > { %2566 = vmatmul.mubr.bf16.gmra.mrb[132].mxu0 %v6870_v23  ;;  %2919 = vmatmul.mubr.bf16.gmra.mrb[132].mxu1 %v6870_v23 }
 0x2c5   : > { %2575 = vmatprep.mubr.bf16.mxu0 %v9014_v33  ;;  %2928 = vmatprep.mubr.bf16.mxu1 %v9014_v33 }
 0x2cc   : > { %2576 = vmatmul.mubr.bf16.gmra.mrb[136].mxu0 %v6884_v42  ;;  %2929 = vmatmul.mubr.bf16.gmra.mrb[136].mxu1 %v6884_v42 }
 0x2cd   : > { %2585 = vmatprep.mubr.bf16.mxu0 %v9014_v33  ;;  %2938 = vmatprep.mubr.bf16.mxu1 %v9014_v33 }
 0x2d4   : > { %2586 = vmatmul.mubr.bf16.gmra.mrb[140].mxu0 %v6882_v54  ;;  %2939 = vmatmul.mubr.bf16.gmra.mrb[140].mxu1 %v6882_v54 }
 0x2d5   : > { %2595 = vmatprep.mubr.bf16.mxu0 %v9014_v33  ;;  %2948 = vmatprep.mubr.bf16.mxu1 %v9014_v33 }
 0x2dc   : > { %2596 = vmatmul.mubr.bf16.gmra.mrb[144].mxu0 %v6896_v44  ;;  %2949 = vmatmul.mubr.bf16.gmra.mrb[144].mxu1 %v6896_v44 }
 0x2dd   : > { %2605 = vmatprep.mubr.bf16.mxu0 %v9014_v33  ;;  %2958 = vmatprep.mubr.bf16.mxu1 %v9014_v33 }
 0x2e4   : > { %2606 = vmatmul.mubr.bf16.gmra.mrb[148].mxu0 %v6894_v40  ;;  %2959 = vmatmul.mubr.bf16.gmra.mrb[148].mxu1 %v6894_v40 }
 0x2e5   : > { %2615 = vmatprep.mubr.bf16.mxu0 %v9014_v33  ;;  %2968 = vmatprep.mubr.bf16.mxu1 %v9014_v33 }
 0x2ec   : > { %2616 = vmatmul.mubr.bf16.gmra.mrb[152].mxu0 %v6908_v19  ;;  %2969 = vmatmul.mubr.bf16.gmra.mrb[152].mxu1 %v6908_v19 }
 0x2ed   : > { %2625 = vmatprep.mubr.bf16.mxu0 %v9014_v33  ;;  %2978 = vmatprep.mubr.bf16.mxu1 %v9014_v33 }
 0x2f4   : > { %2626 = vmatmul.mubr.bf16.gmra.mrb[156].mxu0 %v6906_v18  ;;  %2979 = vmatmul.mubr.bf16.gmra.mrb[156].mxu1 %v6906_v18 }
 0x2f5   : > { %2635 = vmatprep.mubr.bf16.mxu0 %v9014_v33  ;;  %2988 = vmatprep.mubr.bf16.mxu1 %v9014_v33 }
 0x2fc   : > { %2636 = vmatmul.mubr.bf16.gmra.mrb[160].mxu0 %v6920_v50  ;;  %2989 = vmatmul.mubr.bf16.gmra.mrb[160].mxu1 %v6920_v50 }
 0x2fd   : > { %2645 = vmatprep.mubr.bf16.mxu0 %v9014_v33  ;;  %2998 = vmatprep.mubr.bf16.mxu1 %v9014_v33 }
 0x304   : > { %2646 = vmatmul.mubr.bf16.gmra.mrb[164].mxu0 %v6918_v49  ;;  %2999 = vmatmul.mubr.bf16.gmra.mrb[164].mxu1 %v6918_v49 }
 0x305   : > { %2655 = vmatprep.mubr.bf16.mxu0 %v9014_v33  ;;  %3008 = vmatprep.mubr.bf16.mxu1 %v9014_v33 }
 0x30c   : > { %2656 = vmatmul.mubr.bf16.gmra.mrb[168].mxu0 %v6944_v12  ;;  %3009 = vmatmul.mubr.bf16.gmra.mrb[168].mxu1 %v6944_v12 }
 0x30d   : > { %2665 = vmatprep.mubr.bf16.mxu0 %v9014_v33  ;;  %3018 = vmatprep.mubr.bf16.mxu1 %v9014_v33 }
 0x30f   : > { %v2397_v35 = vpop.f32.mrb[64].mxu0  ;;  %v2750_v36 = vpop.f32.mrb[64].mxu1 }
 0x310   : > { %v2398_v45 = vadd.f32 %v2397_v35, %v7027_v20  ;;  %v2751_v46 = vadd.f32 %v2750_v36, %v7035_v26  ;;  %v2399_v57 = vpop.f32.mrb[65].mxu0  ;;  %v2752_v58 = vpop.f32.mrb[65].mxu1 }
 0x311   : > { %v2400_v59 = vadd.f32 %v2399_v57, %v7040_v28  ;;  %v2753_v60 = vadd.f32 %v2752_v58, %v7042_v29  ;;  %v2401_v61 = vpop.f32.mrb[66].mxu0  ;;  %v2754_v62 = vpop.f32.mrb[66].mxu1 }
 0x312   : > { %v2402_v38 = vadd.f32 %v2401_v61, %v7027_v20  ;;  %v2755_v39 = vadd.f32 %v2754_v62, %v7035_v26  ;;  %v2403_v22 = vpop.f32.mrb[67].mxu0  ;;  %v2756_v7 = vpop.f32.mrb[67].mxu1  ;;  %v3938_v14 = vsel %vm3842_vm3, %v2398_v45, -inf  ;;  %v3940_v16 = vsel %vm3842_vm3, %v2751_v46, -inf }
 0x313   : > { %v2404_v17 = vadd.f32 %v2403_v22, %v7040_v28  ;;  %v2757_v32 = vadd.f32 %v2756_v7, %v7042_v29  ;;  %v3939_v34 = vsel %vm3842_vm3, %v2400_v59, -inf  ;;  %v3941_v35 = vsel %vm3842_vm3, %v2753_v60, -inf }
 0x314   : > { %v3946_v36 = vsel %vm3843_vm4, %v2402_v38, -inf  ;;  %v3948_v57 = vsel %vm3843_vm4, %v2755_v39, -inf  ;;  %2666 = vmatmul.mubr.bf16.gmra.mrb[172].mxu0 %v6939_v6  ;;  %3019 = vmatmul.mubr.bf16.gmra.mrb[172].mxu1 %v6939_v6 }
 0x315   : > { %v4450_v45 = vmax.f32 %v3938_v14, %v3946_v36  ;;  %v4524_v46 = vmax.f32 %v3940_v16, %v3948_v57  ;;  %v3947_v58 = vsel %vm3843_vm4, %v2404_v17, -inf  ;;  %v3949_v59 = vsel %vm3843_vm4, %v2757_v32, -inf  ;;  %2675 = vmatprep.mubr.bf16.mxu0 %v9014_v33  ;;  %3028 = vmatprep.mubr.bf16.mxu1 %v9014_v33 }
 0x316   : > { %v4487_v60 = vmax.f32 %v3939_v34, %v3947_v58  ;;  %v4561_v61 = vmax.f32 %v3941_v35, %v3949_v59  ;;  %v7091_v16 = vadd.s32 %v7023_v15, %v3780_v9  ;;  %v7094_v17 = vadd.s32 %v7023_v15, %v3781_v13 }
 0x317   : > { %v2407_v62 = vpop.f32.mrb[68].mxu0  ;;  %v2760_v38 = vpop.f32.mrb[68].mxu1  ;;  %v3782_v57 = vadd.s32 48, %v7010_v5  ;;  %v3783_v58 = vadd.s32 56, %v7010_v5 }
 0x318   : > { %v2408_v39 = vadd.f32 %v2407_v62, %v7027_v20  ;;  %v2761_v22 = vadd.f32 %v2760_v38, %v7035_v26  ;;  %v2409_v7 = vpop.f32.mrb[69].mxu0  ;;  %v2762_v14 = vpop.f32.mrb[69].mxu1  ;;  %vm3846_vm7 = vcmp.lt.s32.totalorder %v7091_v16, 500  ;;  %vm3847_vm8 = vcmp.lt.s32.totalorder %v7094_v17, 500 }
 0x319   : > { %v2410_v32 = vadd.f32 %v2409_v7, %v7040_v28  ;;  %v2763_v34 = vadd.f32 %v2762_v14, %v7042_v29  ;;  %v2411_v35 = vpop.f32.mrb[70].mxu0  ;;  %v2764_v36 = vpop.f32.mrb[70].mxu1 }
 0x31a   : > { %v3954_v59 = vsel %vm3844_vm5, %v2408_v39, -inf  ;;  %v3956_v9 = vsel %vm3844_vm5, %v2761_v22, -inf  ;;  %v2412_v62 = vadd.f32 %v2411_v35, %v7027_v20  ;;  %v2765_v13 = vadd.f32 %v2764_v36, %v7035_v26  ;;  %v2413_v38 = vpop.f32.mrb[71].mxu0  ;;  %v2766_v7 = vpop.f32.mrb[71].mxu1 }
 0x31b   : > { %v4451_v33 = vmax.f32 %v4450_v45, %v3954_v59  ;;  %v4525_v14 = vmax.f32 %v4524_v46, %v3956_v9  ;;  %v3955_v6 = vsel %vm3844_vm5, %v2410_v32, -inf  ;;  %v3957_v12 = vsel %vm3844_vm5, %v2763_v34, -inf }
 0x31c   : > { %v4488_v49 = vmax.f32 %v4487_v60, %v3955_v6  ;;  %v4562_v50 = vmax.f32 %v4561_v61, %v3957_v12  ;;  %v3962_v39 = vsel %vm3845_vm6, %v2412_v62, -inf  ;;  %v3964_v22 = vsel %vm3845_vm6, %v2765_v13, -inf  ;;  %2676 = vmatmul.mubr.bf16.gmra.mrb[176].mxu0 %v6956_v41  ;;  %3029 = vmatmul.mubr.bf16.gmra.mrb[176].mxu1 %v6956_v41 }
 0x31d   : > { %v4452_v45 = vmax.f32 %v4451_v33, %v3962_v39  ;;  %v4526_v46 = vmax.f32 %v4525_v14, %v3964_v22  ;;  %v2414_v35 = vadd.f32 %v2413_v38, %v7040_v28  ;;  %v2767_v32 = vadd.f32 %v2766_v7, %v7042_v29 }
 0x31e   : > { %v9109_v36 = vmov 0   ;;  %v7127_v61 = vadd.s32 %v7023_v15, %v3782_v57  ;;  %v7130_v34 = vadd.s32 %v7023_v15, %v3783_v58  ;;  %v3784_v57 = vadd.s32 64, %v7010_v5 }
 0x31f   : > { %2685 = vmatprep.mubr.bf16.mxu0 %v9109_v36  ;;  %3038 = vmatprep.mubr.bf16.mxu1 %v9109_v36  ;;  %v3963_v6 = vsel %vm3845_vm6, %v2414_v35, -inf  ;;  %v3965_v12 = vsel %vm3845_vm6, %v2767_v32, -inf  ;;  %v2417_v33 = vpop.f32.mrb[72].mxu0  ;;  %v2770_v60 = vpop.f32.mrb[72].mxu1  ;;  %v3785_v32 = vadd.s32 72, %v7010_v5 }
 0x320   : > { %v4489_v59 = vmax.f32 %v4488_v49, %v3963_v6  ;;  %v4563_v9 = vmax.f32 %v4562_v50, %v3965_v12  ;;  %v2418_v62 = vadd.f32 %v2417_v33, %v7027_v20  ;;  %v2771_v13 = vadd.f32 %v2770_v60, %v7035_v26  ;;  %v2419_v38 = vpop.f32.mrb[73].mxu0  ;;  %v2772_v7 = vpop.f32.mrb[73].mxu1 }
 0x321   : > { %v2420_v14 = vadd.f32 %v2419_v38, %v7040_v28  ;;  %v2773_v39 = vadd.f32 %v2772_v7, %v7042_v29  ;;  %v2421_v22 = vpop.f32.mrb[74].mxu0  ;;  %v2774_v35 = vpop.f32.mrb[74].mxu1  ;;  %vm3848_vm9 = vcmp.lt.s32.totalorder %v7127_v61, 500  ;;  %vm3849_vm10 = vcmp.lt.s32.totalorder %v7130_v34, 500 }
 0x322   : > { %v3970_v49 = vsel %vm3846_vm7, %v2418_v62, -inf  ;;  %v3972_v50 = vsel %vm3846_vm7, %v2771_v13, -inf  ;;  %v2422_v58 = vadd.f32 %v2421_v22, %v7027_v20  ;;  %v2775_v6 = vadd.f32 %v2774_v35, %v7035_v26  ;;  %v2423_v12 = vpop.f32.mrb[75].mxu0  ;;  %v2776_v33 = vpop.f32.mrb[75].mxu1 }
 0x323   : > { %v4453_v60 = vmax.f32 %v4452_v45, %v3970_v49  ;;  %v4527_v38 = vmax.f32 %v4526_v46, %v3972_v50  ;;  %v3971_v7 = vsel %vm3846_vm7, %v2420_v14, -inf  ;;  %v3973_v41 = vsel %vm3846_vm7, %v2773_v39, -inf }
 0x324   : > { %v4490_v18 = vmax.f32 %v4489_v59, %v3971_v7  ;;  %v4564_v19 = vmax.f32 %v4563_v9, %v3973_v41  ;;  %v3978_v62 = vsel %vm3847_vm8, %v2422_v58, -inf  ;;  %v3980_v13 = vsel %vm3847_vm8, %v2775_v6, -inf  ;;  %2686 = vmatmul.mubr.bf16.gmra.mrb[180].mxu0 %v6954_v37  ;;  %3039 = vmatmul.mubr.bf16.gmra.mrb[180].mxu1 %v6954_v37 }
 0x325   : > { %v4454_v45 = vmax.f32 %v4453_v60, %v3978_v62  ;;  %v4528_v46 = vmax.f32 %v4527_v38, %v3980_v13  ;;  %v2424_v22 = vadd.f32 %v2423_v12, %v7040_v28  ;;  %v2777_v14 = vadd.f32 %v2776_v33, %v7042_v29  ;;  %2695 = vmatprep.mubr.bf16.mxu0 %v9109_v36 }
 0x326   : > { %3048 = vmatprep.mubr.bf16.mxu1 %v9109_v36  ;;  %v7165_v35 = vadd.s32 %v7023_v15, %v3784_v57  ;;  %v7168_v49 = vadd.s32 %v7023_v15, %v3785_v32  ;;  %v3786_v57 = vadd.s32 80, %v7010_v5 }
 0x327   : > { %v3979_v41 = vsel %vm3847_vm8, %v2424_v22, -inf  ;;  %v3981_v59 = vsel %vm3847_vm8, %v2777_v14, -inf  ;;  %v2427_v9 = vpop.f32.mrb[76].mxu0  ;;  %v2780_v39 = vpop.f32.mrb[76].mxu1  ;;  %v3787_v22 = vadd.s32 88, %v7010_v5 }
 0x328   : > { %v4491_v50 = vmax.f32 %v4490_v18, %v3979_v41  ;;  %v4565_v58 = vmax.f32 %v4564_v19, %v3981_v59  ;;  %v2428_v6 = vadd.f32 %v2427_v9, %v7027_v20  ;;  %v2781_v12 = vadd.f32 %v2780_v39, %v7035_v26  ;;  %v2429_v33 = vpop.f32.mrb[77].mxu0  ;;  %v2782_v60 = vpop.f32.mrb[77].mxu1 }
 0x329   : > { %v2430_v38 = vadd.f32 %v2429_v33, %v7040_v28  ;;  %v2783_v7 = vadd.f32 %v2782_v60, %v7042_v29  ;;  %v2431_v62 = vpop.f32.mrb[78].mxu0  ;;  %v2784_v13 = vpop.f32.mrb[78].mxu1  ;;  %vm9087_vm11 = vcmp.lt.s32.totalorder %v7165_v35, 500  ;;  %vm9083_vm12 = vcmp.lt.s32.totalorder %v7168_v49, 500 }
 0x32a   : > { %v3986_v18 = vsel %vm3848_vm9, %v2428_v6, -inf  ;;  %v3988_v19 = vsel %vm3848_vm9, %v2781_v12, -inf  ;;  %v2432_v32 = vadd.f32 %v2431_v62, %v7027_v20  ;;  %v2785_v14 = vadd.f32 %v2784_v13, %v7035_v26  ;;  %v2433_v41 = vpop.f32.mrb[79].mxu0  ;;  %v2786_v59 = vpop.f32.mrb[79].mxu1 }
 0x32b   : > { %v4455_v9 = vmax.f32 %v4454_v45, %v3986_v18  ;;  %v4529_v39 = vmax.f32 %v4528_v46, %v3988_v19  ;;  %v3987_v33 = vsel %vm3848_vm9, %v2430_v38, -inf  ;;  %v3989_v60 = vsel %vm3848_vm9, %v2783_v7, -inf }
 0x32c   : > { %v4492_v37 = vmax.f32 %v4491_v50, %v3987_v33  ;;  %v4566_v40 = vmax.f32 %v4565_v58, %v3989_v60  ;;  %v3994_v6 = vsel %vm3849_vm10, %v2432_v32, -inf  ;;  %v3996_v12 = vsel %vm3849_vm10, %v2785_v14, -inf  ;;  %2696 = vmatmul.mubr.bf16.gmra.mrb[184].mxu0 %v6968_v52  ;;  %3049 = vmatmul.mubr.bf16.gmra.mrb[184].mxu1 %v6968_v52 }
 0x32d   : > { %v4456_v45 = vmax.f32 %v4455_v9, %v3994_v6  ;;  %v4530_v46 = vmax.f32 %v4529_v39, %v3996_v12  ;;  %v2434_v62 = vadd.f32 %v2433_v41, %v7040_v28  ;;  %v2787_v38 = vadd.f32 %v2786_v59, %v7042_v29  ;;  %2705 = vmatprep.mubr.bf16.mxu0 %v9109_v36 }
 0x32e   : > { %3058 = vmatprep.mubr.bf16.mxu1 %v9109_v36  ;;  %v7203_v18 = vadd.s32 %v7023_v15, %v3786_v57  ;;  %v7206_v19 = vadd.s32 %v7023_v15, %v3787_v22  ;;  %v3788_v57 = vadd.s32 96, %v7010_v5 }
 0x32f   : > { %v3995_v50 = vsel %vm3849_vm10, %v2434_v62, -inf  ;;  %v3997_v58 = vsel %vm3849_vm10, %v2787_v38, -inf  ;;  %v2437_v7 = vpop.f32.mrb[80].mxu0  ;;  %v2790_v13 = vpop.f32.mrb[80].mxu1  ;;  %v3789_v62 = vadd.s32 104, %v7010_v5 }
 0x330   : > { %v4493_v32 = vmax.f32 %v4492_v37, %v3995_v50  ;;  %v4567_v14 = vmax.f32 %v4566_v40, %v3997_v58  ;;  %v2438_v41 = vadd.f32 %v2437_v7, %v7027_v20  ;;  %v2791_v59 = vadd.f32 %v2790_v13, %v7035_v26  ;;  %v2439_v9 = vpop.f32.mrb[81].mxu0  ;;  %v2792_v39 = vpop.f32.mrb[81].mxu1 }
 0x331   : > { %v2440_v33 = vadd.f32 %v2439_v9, %v7040_v28  ;;  %v2793_v60 = vadd.f32 %v2792_v39, %v7042_v29  ;;  %v2441_v6 = vpop.f32.mrb[82].mxu0  ;;  %v2794_v12 = vpop.f32.mrb[82].mxu1  ;;  %vm9081_vm13 = vcmp.lt.s32.totalorder %v7203_v18, 500  ;;  %vm9080_vm14 = vcmp.lt.s32.totalorder %v7206_v19, 500 }
 0x332   : > { %v4002_v37 = vsel %vm9087_vm11, %v2438_v41, -inf  ;;  %v4004_v40 = vsel %vm9087_vm11, %v2791_v59, -inf  ;;  %v2442_v22 = vadd.f32 %v2441_v6, %v7027_v20  ;;  %v2795_v38 = vadd.f32 %v2794_v12, %v7035_v26  ;;  %v2443_v50 = vpop.f32.mrb[83].mxu0  ;;  %v2796_v58 = vpop.f32.mrb[83].mxu1 }
 0x333   : > { %v4457_v7 = vmax.f32 %v4456_v45, %v4002_v37  ;;  %v4531_v13 = vmax.f32 %v4530_v46, %v4004_v40  ;;  %v4003_v9 = vsel %vm9087_vm11, %v2440_v33, -inf  ;;  %v4005_v39 = vsel %vm9087_vm11, %v2793_v60, -inf }
 0x334   : > { %v4494_v52 = vmax.f32 %v4493_v32, %v4003_v9  ;;  %v4568_v44 = vmax.f32 %v4567_v14, %v4005_v39  ;;  %v4010_v41 = vsel %vm9083_vm12, %v2442_v22, -inf  ;;  %v4012_v59 = vsel %vm9083_vm12, %v2795_v38, -inf  ;;  %2706 = vmatmul.mubr.bf16.gmra.mrb[188].mxu0 %v6966_v48  ;;  %3059 = vmatmul.mubr.bf16.gmra.mrb[188].mxu1 %v6966_v48 }
 0x335   : > { %v4458_v45 = vmax.f32 %v4457_v7, %v4010_v41  ;;  %v4532_v46 = vmax.f32 %v4531_v13, %v4012_v59  ;;  %v2444_v6 = vadd.f32 %v2443_v50, %v7040_v28  ;;  %v2797_v33 = vadd.f32 %v2796_v58, %v7042_v29  ;;  %3101 = vmatprep.mubr.bf16.mxu0 %v9109_v36 }
 0x336   : > { %3454 = vmatprep.mubr.bf16.mxu1 %v9109_v36  ;;  %v7241_v37 = vadd.s32 %v7023_v15, %v3788_v57  ;;  %v7244_v40 = vadd.s32 %v7023_v15, %v3789_v62  ;;  %v3790_v57 = vadd.s32 112, %v7010_v5 }
 0x337   : > { %v4011_v32 = vsel %vm9083_vm12, %v2444_v6, -inf  ;;  %v4013_v14 = vsel %vm9083_vm12, %v2797_v33, -inf  ;;  %v2447_v60 = vpop.f32.mrb[84].mxu0  ;;  %v2800_v12 = vpop.f32.mrb[84].mxu1  ;;  %v3791_v6 = vadd.s32 120, %v7010_v5 }
 0x338   : > { %v4495_v22 = vmax.f32 %v4494_v52, %v4011_v32  ;;  %v4569_v38 = vmax.f32 %v4568_v44, %v4013_v14  ;;  %v2448_v50 = vadd.f32 %v2447_v60, %v7027_v20  ;;  %v2801_v58 = vadd.f32 %v2800_v12, %v7035_v26  ;;  %v2449_v7 = vpop.f32.mrb[85].mxu0  ;;  %v2802_v13 = vpop.f32.mrb[85].mxu1 }
 0x339   : > { %v2450_v9 = vadd.f32 %v2449_v7, %v7040_v28  ;;  %v2803_v39 = vadd.f32 %v2802_v13, %v7042_v29  ;;  %v2451_v41 = vpop.f32.mrb[86].mxu0  ;;  %v2804_v59 = vpop.f32.mrb[86].mxu1  ;;  %vm9082_vm15 = vcmp.lt.s32.totalorder %v7241_v37, 500  ;;  %vm9047_vm0 = vcmp.lt.s32.totalorder %v7244_v40, 500 }
 0x33a   : > { %v4018_v52 = vsel %vm9081_vm13, %v2448_v50, -inf  ;;  %v4020_v44 = vsel %vm9081_vm13, %v2801_v58, -inf  ;;  %v2452_v62 = vadd.f32 %v2451_v41, %v7027_v20  ;;  %v2805_v33 = vadd.f32 %v2804_v59, %v7035_v26  ;;  %v2453_v32 = vpop.f32.mrb[87].mxu0  ;;  %v2806_v14 = vpop.f32.mrb[87].mxu1 }
 0x33b   : > { %v4459_v60 = vmax.f32 %v4458_v45, %v4018_v52  ;;  %v4533_v12 = vmax.f32 %v4532_v46, %v4020_v44  ;;  %v4019_v7 = vsel %vm9081_vm13, %v2450_v9, -inf  ;;  %v4021_v13 = vsel %vm9081_vm13, %v2803_v39, -inf }
 0x33c   : > { %v4496_v48 = vmax.f32 %v4495_v22, %v4019_v7  ;;  %v4570_v54 = vmax.f32 %v4569_v38, %v4021_v13  ;;  %v4026_v50 = vsel %vm9080_vm14, %v2452_v62, -inf  ;;  %v4028_v58 = vsel %vm9080_vm14, %v2805_v33, -inf  ;;  %3102 = vmatmul.mubr.bf16.vlgmr.msra.gmra.mrb[192].mxu0 %v6710_v47  ;;  %3455 = vmatmul.mubr.bf16.vlgmr.msra.gmra.mrb[192].mxu1 %v6710_v47 }
 0x33d   : > { %v4460_v45 = vmax.f32 %v4459_v60, %v4026_v50  ;;  %v4534_v46 = vmax.f32 %v4533_v12, %v4028_v58  ;;  %v2454_v41 = vadd.f32 %v2453_v32, %v7040_v28  ;;  %v2807_v9 = vadd.f32 %v2806_v14, %v7042_v29  ;;  %3111 = vmatprep.mubr.bf16.mxu0 %v9109_v36 }
 0x33e   : > { %3464 = vmatprep.mubr.bf16.mxu1 %v9109_v36  ;;  %v7279_v59 = vadd.s32 %v7023_v15, %v3790_v57  ;;  %v7282_v52 = vadd.s32 %v7023_v15, %v3791_v6  ;;  %v3792_v57 = vadd.s32 128, %v7010_v5  ;;  %v3793_v58 = vadd.s32 136, %v7010_v5 }
 0x33f   : > { %v4027_v22 = vsel %vm9080_vm14, %v2454_v41, -inf  ;;  %v4029_v47 = vsel %vm9080_vm14, %v2807_v9, -inf  ;;  %v2457_v38 = vpop.f32.mrb[88].mxu0  ;;  %v2810_v39 = vpop.f32.mrb[88].mxu1 }
 0x340   : > { %9110 = vst [vmem:[#allocation23_spill] sm:$0xff] %v7282_v52  ;;  %v4497_v44 = vmax.f32 %v4496_v48, %v4027_v22  ;;  %v4571_v62 = vmax.f32 %v4570_v54, %v4029_v47  ;;  %v2458_v33 = vadd.f32 %v2457_v38, %v7027_v20  ;;  %v2811_v32 = vadd.f32 %v2810_v39, %v7035_v26  ;;  %v2459_v14 = vpop.f32.mrb[89].mxu0  ;;  %v2812_v60 = vpop.f32.mrb[89].mxu1 }
 0x341   : > { %v2460_v12 = vadd.f32 %v2459_v14, %v7040_v28  ;;  %v2813_v7 = vadd.f32 %v2812_v60, %v7042_v29  ;;  %v2461_v13 = vpop.f32.mrb[90].mxu0  ;;  %v2814_v50 = vpop.f32.mrb[90].mxu1  ;;  %vm9046_vm1 = vcmp.lt.s32.totalorder %v7279_v59, 500  ;;  %vm9051_vm2 = vcmp.lt.s32.totalorder %v7282_v52, 500 }
 0x342   : > { %v4034_v48 = vsel %vm9082_vm15, %v2458_v33, -inf  ;;  %v4036_v54 = vsel %vm9082_vm15, %v2811_v32, -inf  ;;  %v2462_v6 = vadd.f32 %v2461_v13, %v7027_v20  ;;  %v2815_v41 = vadd.f32 %v2814_v50, %v7035_v26  ;;  %v2463_v9 = vpop.f32.mrb[91].mxu0  ;;  %v2816_v22 = vpop.f32.mrb[91].mxu1 }
 0x343   : > { %v4461_v47 = vmax.f32 %v4460_v45, %v4034_v48  ;;  %v4535_v38 = vmax.f32 %v4534_v46, %v4036_v54  ;;  %v4035_v39 = vsel %vm9082_vm15, %v2460_v12, -inf  ;;  %v4037_v14 = vsel %vm9082_vm15, %v2813_v7, -inf }
 0x344   : > { %v4498_v60 = vmax.f32 %v4497_v44, %v4035_v39  ;;  %v4572_v42 = vmax.f32 %v4571_v62, %v4037_v14  ;;  %v4042_v33 = vsel %vm9047_vm0, %v2462_v6, -inf  ;;  %v4044_v32 = vsel %vm9047_vm0, %v2815_v41, -inf  ;;  %3112 = vmatmul.mubr.bf16.gmra.mrb[196].mxu0 %v6708_v43  ;;  %3465 = vmatmul.mubr.bf16.gmra.mrb[196].mxu1 %v6708_v43 }
 0x345   : > { %v4462_v45 = vmax.f32 %v4461_v47, %v4042_v33  ;;  %v4536_v46 = vmax.f32 %v4535_v38, %v4044_v32  ;;  %v2464_v13 = vadd.f32 %v2463_v9, %v7040_v28  ;;  %v2817_v12 = vadd.f32 %v2816_v22, %v7042_v29  ;;  %3121 = vmatprep.mubr.bf16.mxu0 %v9109_v36 }
 0x346   : > { %3474 = vmatprep.mubr.bf16.mxu1 %v9109_v36  ;;  %v7317_v50 = vadd.s32 %v7023_v15, %v3792_v57  ;;  %v7320_v48 = vadd.s32 %v7023_v15, %v3793_v58  ;;  %v3794_v57 = vadd.s32 144, %v7010_v5  ;;  %v3795_v32 = vadd.s32 152, %v7010_v5 }
 0x347   : > { %v4043_v44 = vsel %vm9047_vm0, %v2464_v13, -inf  ;;  %v4045_v43 = vsel %vm9047_vm0, %v2817_v12, -inf  ;;  %v2467_v62 = vpop.f32.mrb[92].mxu0  ;;  %v2820_v7 = vpop.f32.mrb[92].mxu1 }
 0x348   : > { %9111 = vst [vmem:[#allocation24_spill] sm:$0xff] %v7320_v48  ;;  %v4499_v54 = vmax.f32 %v4498_v60, %v4043_v44  ;;  %v4573_v6 = vmax.f32 %v4572_v42, %v4045_v43  ;;  %v2468_v41 = vadd.f32 %v2467_v62, %v7027_v20  ;;  %v2821_v9 = vadd.f32 %v2820_v7, %v7035_v26  ;;  %v2469_v22 = vpop.f32.mrb[93].mxu0  ;;  %v2822_v47 = vpop.f32.mrb[93].mxu1 }
 0x349   : > { %v2470_v38 = vadd.f32 %v2469_v22, %v7040_v28  ;;  %v2823_v39 = vadd.f32 %v2822_v47, %v7042_v29  ;;  %v2471_v14 = vpop.f32.mrb[94].mxu0  ;;  %v2824_v33 = vpop.f32.mrb[94].mxu1  ;;  %vm9055_vm0 = vcmp.lt.s32.totalorder %v7320_v48, 500 }
 0x34a   : > { %v4050_v58 = vsel %vm9046_vm1, %v2468_v41, -inf  ;;  %v4052_v42 = vsel %vm9046_vm1, %v2821_v9, -inf  ;;  %v2472_v60 = vadd.f32 %v2471_v14, %v7027_v20  ;;  %v2825_v13 = vadd.f32 %v2824_v33, %v7035_v26  ;;  %v2473_v12 = vpop.f32.mrb[95].mxu0  ;;  %v2826_v44 = vpop.f32.mrb[95].mxu1 }
 0x34b   : > { %v4463_v43 = vmax.f32 %v4462_v45, %v4050_v58  ;;  %v4537_v62 = vmax.f32 %v4536_v46, %v4052_v42  ;;  %v4051_v7 = vsel %vm9046_vm1, %v2470_v38, -inf  ;;  %v4053_v22 = vsel %vm9046_vm1, %v2823_v39, -inf }
 0x34c   : > { %v4500_v47 = vmax.f32 %v4499_v54, %v4051_v7  ;;  %v4574_v23 = vmax.f32 %v4573_v6, %v4053_v22  ;;  %v4058_v41 = vsel %vm9051_vm2, %v2472_v60, -inf  ;;  %v4060_v9 = vsel %vm9051_vm2, %v2825_v13, -inf  ;;  %3122 = vmatmul.mubr.bf16.gmra.mrb[200].mxu0 %v6752_v4  ;;  %3475 = vmatmul.mubr.bf16.gmra.mrb[200].mxu1 %v6752_v4 }
 0x34d   : > { %v4464_v45 = vmax.f32 %v4463_v43, %v4058_v41  ;;  %v4538_v46 = vmax.f32 %v4537_v62, %v4060_v9  ;;  %v2474_v14 = vadd.f32 %v2473_v12, %v7040_v28  ;;  %v2827_v38 = vadd.f32 %v2826_v44, %v7042_v29  ;;  %3131 = vmatprep.mubr.bf16.mxu0 %v9109_v36 }
 0x34e   : > { %vm9050_vm1 = vcmp.lt.s32.totalorder %v7317_v50, 500  ;;  %3484 = vmatprep.mubr.bf16.mxu1 %v9109_v36  ;;  %v7355_v33 = vadd.s32 %v7023_v15, %v3794_v57  ;;  %v7358_v58 = vadd.s32 %v7023_v15, %v3795_v32  ;;  %v3796_v57 = vadd.s32 160, %v7010_v5 }
 0x34f   : > { %v4059_v54 = vsel %vm9051_vm2, %v2474_v14, -inf  ;;  %v4061_v4 = vsel %vm9051_vm2, %v2827_v38, -inf  ;;  %v2477_v6 = vpop.f32.mrb[96].mxu0  ;;  %v2830_v39 = vpop.f32.mrb[96].mxu1  ;;  %v3797_v9 = vadd.s32 168, %v7010_v5 }
 0x350   : > { %9112 = vst [vmem:[#allocation25_spill] sm:$0xff] %v7358_v58  ;;  %v4501_v42 = vmax.f32 %v4500_v47, %v4059_v54  ;;  %v4575_v60 = vmax.f32 %v4574_v23, %v4061_v4  ;;  %v2478_v13 = vadd.f32 %v2477_v6, %v7027_v20  ;;  %v2831_v12 = vadd.f32 %v2830_v39, %v7035_v26  ;;  %v2479_v44 = vpop.f32.mrb[97].mxu0  ;;  %v2832_v43 = vpop.f32.mrb[97].mxu1 }
 0x351   : > { %v2480_v62 = vadd.f32 %v2479_v44, %v7040_v28  ;;  %v2833_v7 = vadd.f32 %v2832_v43, %v7042_v29  ;;  %v2481_v22 = vpop.f32.mrb[98].mxu0  ;;  %v2834_v41 = vpop.f32.mrb[98].mxu1  ;;  %vm9059_vm2 = vcmp.lt.s32.totalorder %v7358_v58, 500 }
 0x352   : > { %v4066_v32 = vsel %vm9050_vm1, %v2478_v13, -inf  ;;  %v4068_v23 = vsel %vm9050_vm1, %v2831_v12, -inf  ;;  %v2482_v47 = vadd.f32 %v2481_v22, %v7027_v20  ;;  %v2835_v14 = vadd.f32 %v2834_v41, %v7035_v26  ;;  %v2483_v38 = vpop.f32.mrb[99].mxu0  ;;  %v2836_v54 = vpop.f32.mrb[99].mxu1 }
 0x353   : > { %v4465_v4 = vmax.f32 %v4464_v45, %v4066_v32  ;;  %v4539_v6 = vmax.f32 %v4538_v46, %v4068_v23  ;;  %v4067_v39 = vsel %vm9050_vm1, %v2480_v62, -inf  ;;  %v4069_v44 = vsel %vm9050_vm1, %v2833_v7, -inf }
 0x354   : > { %v4502_v43 = vmax.f32 %v4501_v42, %v4067_v39  ;;  %v4576_v52 = vmax.f32 %v4575_v60, %v4069_v44  ;;  %v4074_v13 = vsel %vm9055_vm0, %v2482_v47, -inf  ;;  %v4076_v12 = vsel %vm9055_vm0, %v2835_v14, -inf  ;;  %3132 = vmatmul.mubr.bf16.gmra.mrb[204].mxu0 %v6750_v3  ;;  %3485 = vmatmul.mubr.bf16.gmra.mrb[204].mxu1 %v6750_v3 }
 0x355   : > { %v4466_v45 = vmax.f32 %v4465_v4, %v4074_v13  ;;  %v4540_v46 = vmax.f32 %v4539_v6, %v4076_v12  ;;  %v2484_v22 = vadd.f32 %v2483_v38, %v7040_v28  ;;  %v2837_v62 = vadd.f32 %v2836_v54, %v7042_v29  ;;  %3141 = vmatprep.mubr.bf16.mxu0 %v9109_v36 }
 0x356   : > { %vm9054_vm1 = vcmp.lt.s32.totalorder %v7355_v33, 500  ;;  %3494 = vmatprep.mubr.bf16.mxu1 %v9109_v36  ;;  %v7393_v41 = vadd.s32 %v7023_v15, %v3796_v57  ;;  %v7396_v32 = vadd.s32 %v7023_v15, %v3797_v9  ;;  %v3798_v57 = vadd.s32 176, %v7010_v5 }
 0x357   : > { %v4075_v42 = vsel %vm9055_vm0, %v2484_v22, -inf  ;;  %v4077_v3 = vsel %vm9055_vm0, %v2837_v62, -inf  ;;  %v2487_v60 = vpop.f32.mrb[100].mxu0  ;;  %v2840_v7 = vpop.f32.mrb[100].mxu1  ;;  %v3799_v12 = vadd.s32 184, %v7010_v5 }
 0x358   : > { %9113 = vst [vmem:[#allocation26_spill] sm:$0xff] %v7396_v32  ;;  %v4503_v23 = vmax.f32 %v4502_v43, %v4075_v42  ;;  %v4577_v47 = vmax.f32 %v4576_v52, %v4077_v3  ;;  %v2488_v14 = vadd.f32 %v2487_v60, %v7027_v20  ;;  %v2841_v38 = vadd.f32 %v2840_v7, %v7035_v26  ;;  %v2489_v54 = vpop.f32.mrb[101].mxu0  ;;  %v2842_v4 = vpop.f32.mrb[101].mxu1 }
 0x359   : > { %v2490_v6 = vadd.f32 %v2489_v54, %v7040_v28  ;;  %v2843_v39 = vadd.f32 %v2842_v4, %v7042_v29  ;;  %v2491_v44 = vpop.f32.mrb[102].mxu0  ;;  %v2844_v13 = vpop.f32.mrb[102].mxu1  ;;  %vm9063_vm0 = vcmp.lt.s32.totalorder %v7396_v32, 500 }
 0x35a   : > { %v4082_v9 = vsel %vm9054_vm1, %v2488_v14, -inf  ;;  %v4084_v52 = vsel %vm9054_vm1, %v2841_v38, -inf  ;;  %v2492_v43 = vadd.f32 %v2491_v44, %v7027_v20  ;;  %v2845_v22 = vadd.f32 %v2844_v13, %v7035_v26  ;;  %v2493_v62 = vpop.f32.mrb[103].mxu0  ;;  %v2846_v42 = vpop.f32.mrb[103].mxu1 }
 0x35b   : > { %v4467_v3 = vmax.f32 %v4466_v45, %v4082_v9  ;;  %v4541_v60 = vmax.f32 %v4540_v46, %v4084_v52  ;;  %v4083_v7 = vsel %vm9054_vm1, %v2490_v6, -inf  ;;  %v4085_v54 = vsel %vm9054_vm1, %v2843_v39, -inf }
 0x35c   : > { %v4504_v4 = vmax.f32 %v4503_v23, %v4083_v7  ;;  %v4578_v48 = vmax.f32 %v4577_v47, %v4085_v54  ;;  %v4090_v14 = vsel %vm9059_vm2, %v2492_v43, -inf  ;;  %v4092_v38 = vsel %vm9059_vm2, %v2845_v22, -inf  ;;  %3142 = vmatmul.mubr.bf16.gmra.mrb[208].mxu0 %v6776_v31  ;;  %3495 = vmatmul.mubr.bf16.gmra.mrb[208].mxu1 %v6776_v31 }
 0x35d   : > { %v4468_v45 = vmax.f32 %v4467_v3, %v4090_v14  ;;  %v4542_v46 = vmax.f32 %v4541_v60, %v4092_v38  ;;  %v2494_v44 = vadd.f32 %v2493_v62, %v7040_v28  ;;  %v2847_v6 = vadd.f32 %v2846_v42, %v7042_v29  ;;  %3151 = vmatprep.mubr.bf16.mxu0 %v9109_v36 }
 0x35e   : > { %vm9058_vm1 = vcmp.lt.s32.totalorder %v7393_v41, 500  ;;  %3504 = vmatprep.mubr.bf16.mxu1 %v9109_v36  ;;  %v7431_v13 = vadd.s32 %v7023_v15, %v3798_v57  ;;  %v7434_v9 = vadd.s32 %v7023_v15, %v3799_v12  ;;  %v3800_v57 = vadd.s32 192, %v7010_v5 }
 0x35f   : > { %v4091_v23 = vsel %vm9059_vm2, %v2494_v44, -inf  ;;  %v4093_v31 = vsel %vm9059_vm2, %v2847_v6, -inf  ;;  %v2497_v47 = vpop.f32.mrb[104].mxu0  ;;  %v2850_v39 = vpop.f32.mrb[104].mxu1  ;;  %v3801_v38 = vadd.s32 200, %v7010_v5 }
 0x360   : > { %9114 = vst [vmem:[#allocation27_spill] sm:$0xff] %v7434_v9  ;;  %v4505_v52 = vmax.f32 %v4504_v4, %v4091_v23  ;;  %v4579_v43 = vmax.f32 %v4578_v48, %v4093_v31  ;;  %v2498_v22 = vadd.f32 %v2497_v47, %v7027_v20  ;;  %v2851_v62 = vadd.f32 %v2850_v39, %v7035_v26  ;;  %v2499_v42 = vpop.f32.mrb[105].mxu0  ;;  %v2852_v3 = vpop.f32.mrb[105].mxu1 }
 0x361   : > { %v2500_v60 = vadd.f32 %v2499_v42, %v7040_v28  ;;  %v2853_v7 = vadd.f32 %v2852_v3, %v7042_v29  ;;  %v2501_v54 = vpop.f32.mrb[106].mxu0  ;;  %v2854_v14 = vpop.f32.mrb[106].mxu1  ;;  %vm9067_vm2 = vcmp.lt.s32.totalorder %v7434_v9, 500 }
 0x362   : > { %v4098_v12 = vsel %vm9058_vm1, %v2498_v22, -inf  ;;  %v4100_v48 = vsel %vm9058_vm1, %v2851_v62, -inf  ;;  %v2502_v4 = vadd.f32 %v2501_v54, %v7027_v20  ;;  %v2855_v44 = vadd.f32 %v2854_v14, %v7035_v26  ;;  %v2503_v6 = vpop.f32.mrb[107].mxu0  ;;  %v2856_v23 = vpop.f32.mrb[107].mxu1 }
 0x363   : > { %v4469_v31 = vmax.f32 %v4468_v45, %v4098_v12  ;;  %v4543_v47 = vmax.f32 %v4542_v46, %v4100_v48  ;;  %v4099_v39 = vsel %vm9058_vm1, %v2500_v60, -inf  ;;  %v4101_v42 = vsel %vm9058_vm1, %v2853_v7, -inf }
 0x364   : > { %v4506_v3 = vmax.f32 %v4505_v52, %v4099_v39  ;;  %v4580_v58 = vmax.f32 %v4579_v43, %v4101_v42  ;;  %v4106_v22 = vsel %vm9063_vm0, %v2502_v4, -inf  ;;  %v4108_v62 = vsel %vm9063_vm0, %v2855_v44, -inf  ;;  %3152 = vmatmul.mubr.bf16.gmra.mrb[212].mxu0 %v6774_v30  ;;  %3505 = vmatmul.mubr.bf16.gmra.mrb[212].mxu1 %v6774_v30 }
 0x365   : > { %v4470_v45 = vmax.f32 %v4469_v31, %v4106_v22  ;;  %v4544_v46 = vmax.f32 %v4543_v47, %v4108_v62  ;;  %v2504_v54 = vadd.f32 %v2503_v6, %v7040_v28  ;;  %v2857_v60 = vadd.f32 %v2856_v23, %v7042_v29  ;;  %3161 = vmatprep.mubr.bf16.mxu0 %v9109_v36 }
 0x366   : > { %vm9062_vm1 = vcmp.lt.s32.totalorder %v7431_v13, 500  ;;  %3514 = vmatprep.mubr.bf16.mxu1 %v9109_v36  ;;  %v7469_v14 = vadd.s32 %v7023_v15, %v3800_v57  ;;  %v7472_v12 = vadd.s32 %v7023_v15, %v3801_v38  ;;  %v3802_v57 = vadd.s32 208, %v7010_v5 }
 0x367   : > { %v4107_v52 = vsel %vm9063_vm0, %v2504_v54, -inf  ;;  %v4109_v30 = vsel %vm9063_vm0, %v2857_v60, -inf  ;;  %v2507_v43 = vpop.f32.mrb[108].mxu0  ;;  %v2860_v7 = vpop.f32.mrb[108].mxu1  ;;  %v3803_v62 = vadd.s32 216, %v7010_v5 }
 0x368   : > { %v4507_v48 = vmax.f32 %v4506_v3, %v4107_v52  ;;  %v4581_v4 = vmax.f32 %v4580_v58, %v4109_v30  ;;  %v2508_v44 = vadd.f32 %v2507_v43, %v7027_v20  ;;  %v2861_v6 = vadd.f32 %v2860_v7, %v7035_v26  ;;  %v2509_v23 = vpop.f32.mrb[109].mxu0  ;;  %v2862_v31 = vpop.f32.mrb[109].mxu1 }
 0x369   : > { %v2510_v47 = vadd.f32 %v2509_v23, %v7040_v28  ;;  %v2863_v39 = vadd.f32 %v2862_v31, %v7042_v29  ;;  %v2511_v42 = vpop.f32.mrb[110].mxu0  ;;  %v2864_v22 = vpop.f32.mrb[110].mxu1  ;;  %vm9071_vm0 = vcmp.lt.s32.totalorder %v7472_v12, 500 }
 0x36a   : > { %v4114_v38 = vsel %vm9062_vm1, %v2508_v44, -inf  ;;  %v4116_v58 = vsel %vm9062_vm1, %v2861_v6, -inf  ;;  %v2512_v3 = vadd.f32 %v2511_v42, %v7027_v20  ;;  %v2865_v54 = vadd.f32 %v2864_v22, %v7035_v26  ;;  %v2513_v60 = vpop.f32.mrb[111].mxu0  ;;  %v2866_v52 = vpop.f32.mrb[111].mxu1 }
 0x36b   : > { %v4471_v30 = vmax.f32 %v4470_v45, %v4114_v38  ;;  %v4545_v43 = vmax.f32 %v4544_v46, %v4116_v58  ;;  %v4115_v7 = vsel %vm9062_vm1, %v2510_v47, -inf  ;;  %v4117_v23 = vsel %vm9062_vm1, %v2863_v39, -inf }
 0x36c   : > { %v4508_v31 = vmax.f32 %v4507_v48, %v4115_v7  ;;  %v4582_v32 = vmax.f32 %v4581_v4, %v4117_v23  ;;  %v4122_v44 = vsel %vm9067_vm2, %v2512_v3, -inf  ;;  %v4124_v6 = vsel %vm9067_vm2, %v2865_v54, -inf  ;;  %3162 = vmatmul.mubr.bf16.gmra.mrb[216].mxu0 %v6788_v56  ;;  %3515 = vmatmul.mubr.bf16.gmra.mrb[216].mxu1 %v6788_v56 }
 0x36d   : > { %v4472_v45 = vmax.f32 %v4471_v30, %v4122_v44  ;;  %v4546_v46 = vmax.f32 %v4545_v43, %v4124_v6  ;;  %v2514_v42 = vadd.f32 %v2513_v60, %v7040_v28  ;;  %v2867_v47 = vadd.f32 %v2866_v52, %v7042_v29  ;;  %3171 = vmatprep.mubr.bf16.mxu0 %v9109_v36 }
 0x36e   : > { %vm9066_vm1 = vcmp.lt.s32.totalorder %v7469_v14, 500  ;;  %3524 = vmatprep.mubr.bf16.mxu1 %v9109_v36  ;;  %v7507_v22 = vadd.s32 %v7023_v15, %v3802_v57  ;;  %v7510_v38 = vadd.s32 %v7023_v15, %v3803_v62  ;;  %v3804_v57 = vadd.s32 224, %v7010_v5 }
 0x36f   : > { %v4123_v48 = vsel %vm9067_vm2, %v2514_v42, -inf  ;;  %v4125_v56 = vsel %vm9067_vm2, %v2867_v47, -inf  ;;  %v2517_v4 = vpop.f32.mrb[112].mxu0  ;;  %v2870_v39 = vpop.f32.mrb[112].mxu1  ;;  %v3805_v6 = vadd.s32 232, %v7010_v5 }
 0x370   : > { %v4509_v58 = vmax.f32 %v4508_v31, %v4123_v48  ;;  %v4583_v3 = vmax.f32 %v4582_v32, %v4125_v56  ;;  %v2518_v54 = vadd.f32 %v2517_v4, %v7027_v20  ;;  %v2871_v60 = vadd.f32 %v2870_v39, %v7035_v26  ;;  %v2519_v52 = vpop.f32.mrb[113].mxu0  ;;  %v2872_v30 = vpop.f32.mrb[113].mxu1 }
 0x371   : > { %v2520_v43 = vadd.f32 %v2519_v52, %v7040_v28  ;;  %v2873_v7 = vadd.f32 %v2872_v30, %v7042_v29  ;;  %v2521_v23 = vpop.f32.mrb[114].mxu0  ;;  %v2874_v44 = vpop.f32.mrb[114].mxu1  ;;  %vm9073_vm2 = vcmp.lt.s32.totalorder %v7510_v38, 500 }
 0x372   : > { %v4130_v62 = vsel %vm9066_vm1, %v2518_v54, -inf  ;;  %v4132_v32 = vsel %vm9066_vm1, %v2871_v60, -inf  ;;  %v2522_v31 = vadd.f32 %v2521_v23, %v7027_v20  ;;  %v2875_v42 = vadd.f32 %v2874_v44, %v7035_v26  ;;  %v2523_v47 = vpop.f32.mrb[115].mxu0  ;;  %v2876_v48 = vpop.f32.mrb[115].mxu1 }
 0x373   : > { %v4473_v56 = vmax.f32 %v4472_v45, %v4130_v62  ;;  %v4547_v4 = vmax.f32 %v4546_v46, %v4132_v32  ;;  %v4131_v39 = vsel %vm9066_vm1, %v2520_v43, -inf  ;;  %v4133_v52 = vsel %vm9066_vm1, %v2873_v7, -inf }
 0x374   : > { %v4510_v30 = vmax.f32 %v4509_v58, %v4131_v39  ;;  %v4584_v9 = vmax.f32 %v4583_v3, %v4133_v52  ;;  %v4138_v54 = vsel %vm9071_vm0, %v2522_v31, -inf  ;;  %v4140_v60 = vsel %vm9071_vm0, %v2875_v42, -inf  ;;  %3172 = vmatmul.mubr.bf16.gmra.mrb[220].mxu0 %v6786_v55  ;;  %3525 = vmatmul.mubr.bf16.gmra.mrb[220].mxu1 %v6786_v55 }
 0x375   : > { %v4474_v45 = vmax.f32 %v4473_v56, %v4138_v54  ;;  %v4548_v46 = vmax.f32 %v4547_v4, %v4140_v60  ;;  %v2524_v23 = vadd.f32 %v2523_v47, %v7040_v28  ;;  %v2877_v43 = vadd.f32 %v2876_v48, %v7042_v29  ;;  %3181 = vmatprep.mubr.bf16.mxu0 %v9109_v36 }
 0x376   : > { %vm9070_vm1 = vcmp.lt.s32.totalorder %v7507_v22, 500  ;;  %3534 = vmatprep.mubr.bf16.mxu1 %v9109_v36  ;;  %v7545_v44 = vadd.s32 %v7023_v15, %v3804_v57  ;;  %v7548_v62 = vadd.s32 %v7023_v15, %v3805_v6  ;;  %v3806_v57 = vadd.s32 240, %v7010_v5 }
 0x377   : > { %v4139_v58 = vsel %vm9071_vm0, %v2524_v23, -inf  ;;  %v4141_v55 = vsel %vm9071_vm0, %v2877_v43, -inf  ;;  %v2527_v3 = vpop.f32.mrb[116].mxu0  ;;  %v2880_v7 = vpop.f32.mrb[116].mxu1  ;;  %v3807_v60 = vadd.s32 248, %v7010_v5 }
 0x378   : > { %v4511_v32 = vmax.f32 %v4510_v30, %v4139_v58  ;;  %v4585_v31 = vmax.f32 %v4584_v9, %v4141_v55  ;;  %v2528_v42 = vadd.f32 %v2527_v3, %v7027_v20  ;;  %v2881_v47 = vadd.f32 %v2880_v7, %v7035_v26  ;;  %v2529_v48 = vpop.f32.mrb[117].mxu0  ;;  %v2882_v56 = vpop.f32.mrb[117].mxu1 }
 0x379   : > { %v2530_v4 = vadd.f32 %v2529_v48, %v7040_v28  ;;  %v2883_v39 = vadd.f32 %v2882_v56, %v7042_v29  ;;  %v2531_v52 = vpop.f32.mrb[118].mxu0  ;;  %v2884_v54 = vpop.f32.mrb[118].mxu1  ;;  %vm3871_vm0 = vcmp.lt.s32.totalorder %v7548_v62, 500 }
 0x37a   : > { %v4146_v6 = vsel %vm9070_vm1, %v2528_v42, -inf  ;;  %v4148_v9 = vsel %vm9070_vm1, %v2881_v47, -inf  ;;  %v2532_v30 = vadd.f32 %v2531_v52, %v7027_v20  ;;  %v2885_v23 = vadd.f32 %v2884_v54, %v7035_v26  ;;  %v2533_v43 = vpop.f32.mrb[119].mxu0  ;;  %v2886_v58 = vpop.f32.mrb[119].mxu1 }
 0x37b   : > { %v4475_v55 = vmax.f32 %v4474_v45, %v4146_v6  ;;  %v4549_v3 = vmax.f32 %v4548_v46, %v4148_v9  ;;  %v4147_v7 = vsel %vm9070_vm1, %v2530_v4, -inf  ;;  %v4149_v48 = vsel %vm9070_vm1, %v2883_v39, -inf }
 0x37c   : > { %v4512_v56 = vmax.f32 %v4511_v32, %v4147_v7  ;;  %v4586_v5 = vmax.f32 %v4585_v31, %v4149_v48  ;;  %v4154_v42 = vsel %vm9073_vm2, %v2532_v30, -inf  ;;  %v4156_v47 = vsel %vm9073_vm2, %v2885_v23, -inf  ;;  %3182 = vmatmul.mubr.bf16.gmra.mrb[224].mxu0 %v6812_v11  ;;  %3535 = vmatmul.mubr.bf16.gmra.mrb[224].mxu1 %v6812_v11 }
 0x37d   : > { %v4476_v45 = vmax.f32 %v4475_v55, %v4154_v42  ;;  %v4550_v46 = vmax.f32 %v4549_v3, %v4156_v47  ;;  %v2534_v52 = vadd.f32 %v2533_v43, %v7040_v28  ;;  %v2887_v4 = vadd.f32 %v2886_v58, %v7042_v29  ;;  %3191 = vmatprep.mubr.bf16.mxu0 %v9109_v36 }
 0x37e   : > { %3544 = vmatprep.mubr.bf16.mxu1 %v9109_v36  ;;  %vm9072_vm1 = vcmp.lt.s32.totalorder %v7545_v44, 500  ;;  %v7587_v48 = vadd.s32 %v7023_v15, %v3806_v57  ;;  %v7590_v42 = vadd.s32 %v7023_v15, %v3807_v60 }
 0x37f   : > { %v4155_v32 = vsel %vm9073_vm2, %v2534_v52, -inf  ;;  %v4157_v31 = vsel %vm9073_vm2, %v2887_v4, -inf  ;;  %v2537_v39 = vpop.f32.mrb[120].mxu0  ;;  %v2890_v11 = vpop.f32.mrb[120].mxu1 }
 0x380   : > { %v4513_v54 = vmax.f32 %v4512_v56, %v4155_v32  ;;  %v4587_v6 = vmax.f32 %v4586_v5, %v4157_v31  ;;  %v2538_v9 = vadd.f32 %v2537_v39, %v7027_v20  ;;  %v2891_v30 = vadd.f32 %v2890_v11, %v7035_v26  ;;  %v2539_v23 = vpop.f32.mrb[121].mxu0  ;;  %v2892_v43 = vpop.f32.mrb[121].mxu1  ;;  %9115 = vst [vmem:[#allocation28_spill] sm:$0xff] %v7587_v48 }
 0x381   : > { %v2540_v58 = vadd.f32 %v2539_v23, %v7040_v28  ;;  %v2893_v55 = vadd.f32 %v2892_v43, %v7042_v29  ;;  %v2541_v3 = vpop.f32.mrb[122].mxu0  ;;  %v2894_v7 = vpop.f32.mrb[122].mxu1  ;;  %9116 = vst [vmem:[#allocation29_spill] sm:$0xff] %v7590_v42  ;;  %vm3873_vm2 = vcmp.lt.s32.totalorder %v7590_v42, 500 }
 0x382   : > { %v4162_v5 = vsel %vm9072_vm1, %v2538_v9, -inf  ;;  %v4164_v56 = vsel %vm9072_vm1, %v2891_v30, -inf  ;;  %v2542_v47 = vadd.f32 %v2541_v3, %v7027_v20  ;;  %v2895_v52 = vadd.f32 %v2894_v7, %v7035_v26  ;;  %v2543_v4 = vpop.f32.mrb[123].mxu0  ;;  %v2896_v32 = vpop.f32.mrb[123].mxu1 }
 0x383   : > { %v4477_v31 = vmax.f32 %v4476_v45, %v4162_v5  ;;  %v4551_v39 = vmax.f32 %v4550_v46, %v4164_v56  ;;  %v4163_v57 = vsel %vm9072_vm1, %v2540_v58, -inf  ;;  %v4165_v15 = vsel %vm9072_vm1, %v2893_v55, -inf }
 0x384   : > { %v4514_v60 = vmax.f32 %v4513_v54, %v4163_v57  ;;  %v4588_v11 = vmax.f32 %v4587_v6, %v4165_v15  ;;  %v4170_v9 = vsel %vm3871_vm0, %v2542_v47, -inf  ;;  %v4172_v30 = vsel %vm3871_vm0, %v2895_v52, -inf  ;;  %3192 = vmatmul.mubr.bf16.gmra.mrb[228].mxu0 %v6810_v10  ;;  %3545 = vmatmul.mubr.bf16.gmra.mrb[228].mxu1 %v6810_v10 }
 0x385   : > { %v4478_v45 = vmax.f32 %v4477_v31, %v4170_v9  ;;  %v4552_v46 = vmax.f32 %v4551_v39, %v4172_v30  ;;  %v2544_v23 = vadd.f32 %v2543_v4, %v7040_v28  ;;  %v2897_v43 = vadd.f32 %v2896_v32, %v7042_v29  ;;  %3201 = vmatprep.mubr.bf16.mxu0 %v9109_v36 }
 0x386   : > { %3554 = vmatprep.mubr.bf16.mxu1 %v9109_v36  ;;  %vm3872_vm1 = vcmp.lt.s32.totalorder %v7587_v48, 500 }
 0x387   : > { %v4171_v54 = vsel %vm3871_vm0, %v2544_v23, -inf  ;;  %v4173_v6 = vsel %vm3871_vm0, %v2897_v43, -inf  ;;  %v2547_v58 = vpop.f32.mrb[124].mxu0  ;;  %v2900_v10 = vpop.f32.mrb[124].mxu1 }
 0x388   : > { %v4515_v55 = vmax.f32 %v4514_v60, %v4171_v54  ;;  %v4589_v3 = vmax.f32 %v4588_v11, %v4173_v6  ;;  %v2548_v7 = vadd.f32 %v2547_v58, %v7027_v20  ;;  %v2901_v5 = vadd.f32 %v2900_v10, %v7035_v26  ;;  %v2549_v56 = vpop.f32.mrb[125].mxu0  ;;  %v2902_v47 = vpop.f32.mrb[125].mxu1 }
 0x389   : > { %v2550_v52 = vadd.f32 %v2549_v56, %v7040_v28  ;;  %v2903_v4 = vadd.f32 %v2902_v47, %v7042_v29  ;;  %v2551_v32 = vpop.f32.mrb[126].mxu0  ;;  %v2904_v31 = vpop.f32.mrb[126].mxu1 }
 0x38a   : > { %v4178_v39 = vsel %vm3872_vm1, %v2548_v7, -inf  ;;  %v4180_v57 = vsel %vm3872_vm1, %v2901_v5, -inf  ;;  %v2552_v15 = vadd.f32 %v2551_v32, %v7027_v20  ;;  %v2905_v60 = vadd.f32 %v2904_v31, %v7035_v26  ;;  %v2553_v11 = vpop.f32.mrb[127].mxu0  ;;  %v2906_v9 = vpop.f32.mrb[127].mxu1 }
 0x38b   : > { %v4479_v30 = vmax.f32 %v4478_v45, %v4178_v39  ;;  %v4553_v23 = vmax.f32 %v4552_v46, %v4180_v57  ;;  %v4179_v43 = vsel %vm3872_vm1, %v2550_v52, -inf  ;;  %v4181_v54 = vsel %vm3872_vm1, %v2903_v4, -inf }
 0x38c   : > { %v4516_v6 = vmax.f32 %v4515_v55, %v4179_v43  ;;  %v4590_v58 = vmax.f32 %v4589_v3, %v4181_v54  ;;  %v4186_v10 = vsel %vm3873_vm2, %v2552_v15, -inf  ;;  %v4188_v7 = vsel %vm3873_vm2, %v2905_v60, -inf  ;;  %3202 = vmatmul.mubr.bf16.gmra.mrb[232].mxu0 %v6824_v8  ;;  %3555 = vmatmul.mubr.bf16.gmra.mrb[232].mxu1 %v6824_v8 }
 0x38d   : > { %v4480_v45 = vmax.f32 %v4479_v30, %v4186_v10  ;;  %v4554_v46 = vmax.f32 %v4553_v23, %v4188_v7  ;;  %v2554_v5 = vadd.f32 %v2553_v11, %v7040_v28  ;;  %v2907_v56 = vadd.f32 %v2906_v9, %v7042_v29  ;;  %3211 = vmatprep.mubr.bf16.mxu0 %v9109_v36 }
 0x38e   : > { %3564 = vmatprep.mubr.bf16.mxu1 %v9109_v36 }
 0x38f   : > { %v4481_v55 = vrot.slane %v4480_v45, 4  ;;  %v4555_v3 = vrot.slane %v4554_v46, 4  ;;  %v4187_v47 = vsel %vm3873_vm2, %v2554_v5, -inf  ;;  %v4189_v52 = vsel %vm3873_vm2, %v2907_v56, -inf  ;;  %v2557_v4 = vpop.f32.mrb[128].mxu0  ;;  %v2910_v8 = vpop.f32.mrb[128].mxu1 }
 0x390   : > { %v4517_v32 = vmax.f32 %v4516_v6, %v4187_v47  ;;  %v4591_v31 = vmax.f32 %v4590_v58, %v4189_v52  ;;  %v2558_v39 = vadd.f32 %v2557_v4, %v7027_v20  ;;  %v2911_v57 = vadd.f32 %v2910_v8, %v7035_v26  ;;  %v2559_v15 = vpop.f32.mrb[129].mxu0  ;;  %v2912_v60 = vpop.f32.mrb[129].mxu1 }
 0x391   : > { %v4482_v11 = vmax.f32 %v4480_v45, %v4481_v55  ;;  %v4556_v9 = vmax.f32 %v4554_v46, %v4555_v3  ;;  %v2560_v30 = vadd.f32 %v2559_v15, %v7040_v28  ;;  %v2913_v23 = vadd.f32 %v2912_v60, %v7042_v29  ;;  %v2561_v43 = vpop.f32.mrb[130].mxu0  ;;  %v2914_v54 = vpop.f32.mrb[130].mxu1 }
 0x392   : > { %v4518_v10 = vrot.slane %v4517_v32, 4  ;;  %v4592_v7 = vrot.slane %v4591_v31, 4  ;;  %v4194_v6 = vsel %vm3842_vm3, %v2558_v39, -inf  ;;  %v4196_v58 = vsel %vm3842_vm3, %v2911_v57, -inf  ;;  %v2563_v5 = vpop.f32.mrb[131].mxu0  ;;  %v2916_v56 = vpop.f32.mrb[131].mxu1 }
 0x393   : > { %v4483_v47 = vrot.slane %v4482_v11, 2  ;;  %v4557_v52 = vrot.slane %v4556_v9, 2  ;;  %v4195_v45 = vsel %vm3842_vm3, %v2560_v30, -inf  ;;  %v4197_v46 = vsel %vm3842_vm3, %v2913_v23, -inf }
 0x394   : > { %v4519_v55 = vmax.f32 %v4517_v32, %v4518_v10  ;;  %v4593_v3 = vmax.f32 %v4591_v31, %v4592_v7  ;;  %v2562_v4 = vadd.f32 %v2561_v43, %v7027_v20  ;;  %v2915_v8 = vadd.f32 %v2914_v54, %v7035_v26  ;;  %3212 = vmatmul.mubr.bf16.gmra.mrb[236].mxu0 %v6822_v25 }
 0x395   : > { %v4484_v39 = vmax.f32 %v4482_v11, %v4483_v47  ;;  %v4558_v57 = vmax.f32 %v4556_v9, %v4557_v52  ;;  %v2564_v15 = vadd.f32 %v2563_v5, %v7040_v28  ;;  %v2917_v60 = vadd.f32 %v2916_v56, %v7042_v29  ;;  %3565 = vmatmul.mubr.bf16.gmra.mrb[236].mxu1 %v6822_v25 }
 0x396   : > { %v4520_v30 = vrot.slane %v4519_v55, 2  ;;  %v4594_v42 = vrot.slane %v4593_v3, 2  ;;  %v4202_v32 = vsel %vm3843_vm4, %v2562_v4, -inf  ;;  %v4204_v31 = vsel %vm3843_vm4, %v2915_v8, -inf  ;;  %3221 = vmatprep.mubr.bf16.mxu0 %v9109_v36  ;;  %3574 = vmatprep.mubr.bf16.mxu1 %v9109_v36 }
 0x397   : > { %v4485_v11 = vrot.slane %v4484_v39, 1  ;;  %v4559_v9 = vrot.slane %v4558_v57, 1  ;;  %v4746_v23 = vmax.f32 %v4194_v6, %v4202_v32  ;;  %v4820_v43 = vmax.f32 %v4196_v58, %v4204_v31  ;;  %v2567_v54 = vpop.f32.mrb[132].mxu0  ;;  %v2920_v10 = vpop.f32.mrb[132].mxu1 }
 0x398   : > { %v4521_v7 = vmax.f32 %v4519_v55, %v4520_v30  ;;  %v4595_v25 = vmax.f32 %v4593_v3, %v4594_v42  ;;  %v4203_v5 = vsel %vm3843_vm4, %v2564_v15, -inf  ;;  %v4205_v56 = vsel %vm3843_vm4, %v2917_v60, -inf  ;;  %v2569_v47 = vpop.f32.mrb[133].mxu0  ;;  %v2922_v52 = vpop.f32.mrb[133].mxu1 }
 0x399   : > { %v7674_v4 = vmax.f32 %v4484_v39, %v4485_v11  ;;  %v7676_v8 = vmax.f32 %v4558_v57, %v4559_v9  ;;  %v4783_v21 = vmax.f32 %v4195_v45, %v4203_v5  ;;  %v4857_v48 = vmax.f32 %v4197_v46, %v4205_v56  ;;  %v2571_v6 = vpop.f32.mrb[134].mxu0  ;;  %v2924_v58 = vpop.f32.mrb[134].mxu1 }
 0x39a   : > { %v4522_v32 = vrot.slane %v4521_v7, 1  ;;  %v4596_v31 = vrot.slane %v4595_v25, 1  ;;  %v2568_v42 = vadd.f32 %v2567_v54, %v7027_v20  ;;  %v2921_v55 = vadd.f32 %v2920_v10, %v7035_v26  ;;  %v2573_v3 = vpop.f32.mrb[135].mxu0  ;;  %v2926_v15 = vpop.f32.mrb[135].mxu1 }
 0x39b   : > { %9117 = vst [vmem:[#allocation30_spill] sm:$0xff] %v7674_v4  ;;  %9118 = vst [vmem:[#allocation31_spill] sm:$0xff] %v7676_v8  ;;  %v2570_v60 = vadd.f32 %v2569_v47, %v7040_v28  ;;  %v2923_v30 = vadd.f32 %v2922_v52, %v7042_v29  ;;  %v2572_v39 = vadd.f32 %v2571_v6, %v7027_v20 }
 0x39c   : > { %v2925_v57 = vadd.f32 %v2924_v58, %v7035_v26  ;;  %v7684_v45 = vmax.f32 %v4521_v7, %v4522_v32  ;;  %v7686_v46 = vmax.f32 %v4595_v25, %v4596_v31  ;;  %v4210_v11 = vsel %vm3844_vm5, %v2568_v42, -inf  ;;  %3222 = vmatmul.mubr.bf16.gmra.mrb[240].mxu0 %v6836_v53 }
 0x39d   : > { %v4212_v9 = vsel %vm3844_vm5, %v2921_v55, -inf  ;;  %v4747_v54 = vmax.f32 %v4746_v23, %v4210_v11  ;;  %v4211_v5 = vsel %vm3844_vm5, %v2570_v60, -inf  ;;  %v4213_v56 = vsel %vm3844_vm5, %v2923_v30, -inf  ;;  %3575 = vmatmul.mubr.bf16.gmra.mrb[240].mxu1 %v6836_v53  ;;  %3231 = vmatprep.mubr.bf16.mxu0 %v9109_v36 }
 0x39e   : > { %9119 = vst [vmem:[#allocation32_spill] sm:$0xff] %v7684_v45  ;;  %9120 = vst [vmem:[#allocation33_spill] sm:$0xff] %v7686_v46  ;;  %v4821_v10 = vmax.f32 %v4820_v43, %v4212_v9  ;;  %v4784_v7 = vmax.f32 %v4783_v21, %v4211_v5  ;;  %v4858_v25 = vmax.f32 %v4857_v48, %v4213_v56  ;;  %v4218_v47 = vsel %vm3845_vm6, %v2572_v39, -inf }
 0x39f   : > { %v4220_v52 = vsel %vm3845_vm6, %v2925_v57, -inf  ;;  %3584 = vmatprep.mubr.bf16.mxu1 %v9109_v36  ;;  %v4748_v23 = vmax.f32 %v4747_v54, %v4218_v47  ;;  %v2574_v6 = vadd.f32 %v2573_v3, %v7040_v28  ;;  %v2927_v58 = vadd.f32 %v2926_v15, %v7042_v29  ;;  %v2577_v32 = vpop.f32.mrb[136].mxu0  ;;  %v2930_v53 = vpop.f32.mrb[136].mxu1 }
 0x3a0   : > { %v4822_v43 = vmax.f32 %v4821_v10, %v4220_v52  ;;  %v2578_v31 = vadd.f32 %v2577_v32, %v7027_v20  ;;  %v2931_v21 = vadd.f32 %v2930_v53, %v7035_v26  ;;  %v2579_v48 = vpop.f32.mrb[137].mxu0  ;;  %v2932_v42 = vpop.f32.mrb[137].mxu1 }
 0x3a1   : > { %v4219_v55 = vsel %vm3845_vm6, %v2574_v6, -inf  ;;  %v4221_v60 = vsel %vm3845_vm6, %v2927_v58, -inf  ;;  %v2580_v30 = vadd.f32 %v2579_v48, %v7040_v28  ;;  %v2933_v3 = vadd.f32 %v2932_v42, %v7042_v29  ;;  %v2581_v39 = vpop.f32.mrb[138].mxu0  ;;  %v2934_v15 = vpop.f32.mrb[138].mxu1 }
 0x3a2   : > { %v4785_v57 = vmax.f32 %v4784_v7, %v4219_v55  ;;  %v4859_v11 = vmax.f32 %v4858_v25, %v4221_v60  ;;  %v4226_v9 = vsel %vm3846_vm7, %v2578_v31, -inf  ;;  %v4228_v54 = vsel %vm3846_vm7, %v2931_v21, -inf  ;;  %v2583_v10 = vpop.f32.mrb[139].mxu0  ;;  %v2936_v5 = vpop.f32.mrb[139].mxu1 }
 0x3a3   : > { %v4749_v56 = vmax.f32 %v4748_v23, %v4226_v9  ;;  %v4823_v47 = vmax.f32 %v4822_v43, %v4228_v54  ;;  %v4227_v52 = vsel %vm3846_vm7, %v2580_v30, -inf  ;;  %v4229_v6 = vsel %vm3846_vm7, %v2933_v3, -inf }
 0x3a4   : > { %v4786_v58 = vmax.f32 %v4785_v57, %v4227_v52  ;;  %v4860_v32 = vmax.f32 %v4859_v11, %v4229_v6  ;;  %v2582_v7 = vadd.f32 %v2581_v39, %v7027_v20  ;;  %v2935_v25 = vadd.f32 %v2934_v15, %v7035_v26  ;;  %3232 = vmatmul.mubr.bf16.gmra.mrb[244].mxu0 %v6834_v51 }
 0x3a5   : > { %v2584_v53 = vadd.f32 %v2583_v10, %v7040_v28  ;;  %v2937_v31 = vadd.f32 %v2936_v5, %v7042_v29  ;;  %3585 = vmatmul.mubr.bf16.gmra.mrb[244].mxu1 %v6834_v51  ;;  %3241 = vmatprep.mubr.bf16.mxu0 %v9109_v36 }
 0x3a6   : > { %v4234_v23 = vsel %vm3847_vm8, %v2582_v7, -inf  ;;  %v4236_v43 = vsel %vm3847_vm8, %v2935_v25, -inf  ;;  %3594 = vmatprep.mubr.bf16.mxu1 %v9109_v36 }
 0x3a7   : > { %v4750_v21 = vmax.f32 %v4749_v56, %v4234_v23  ;;  %v4824_v48 = vmax.f32 %v4823_v47, %v4236_v43  ;;  %v4235_v42 = vsel %vm3847_vm8, %v2584_v53, -inf  ;;  %v4237_v55 = vsel %vm3847_vm8, %v2937_v31, -inf  ;;  %v2587_v60 = vpop.f32.mrb[140].mxu0  ;;  %v2940_v51 = vpop.f32.mrb[140].mxu1 }
 0x3a8   : > { %v4787_v30 = vmax.f32 %v4786_v58, %v4235_v42  ;;  %v4861_v3 = vmax.f32 %v4860_v32, %v4237_v55  ;;  %v2588_v39 = vadd.f32 %v2587_v60, %v7027_v20  ;;  %v2941_v15 = vadd.f32 %v2940_v51, %v7035_v26  ;;  %v2589_v57 = vpop.f32.mrb[141].mxu0  ;;  %v2942_v11 = vpop.f32.mrb[141].mxu1 }
 0x3a9   : > { %v2590_v9 = vadd.f32 %v2589_v57, %v7040_v28  ;;  %v2943_v54 = vadd.f32 %v2942_v11, %v7042_v29  ;;  %v2591_v10 = vpop.f32.mrb[142].mxu0  ;;  %v2944_v5 = vpop.f32.mrb[142].mxu1 }
 0x3aa   : > { %v4242_v56 = vsel %vm3848_vm9, %v2588_v39, -inf  ;;  %v4244_v47 = vsel %vm3848_vm9, %v2941_v15, -inf  ;;  %v2592_v52 = vadd.f32 %v2591_v10, %v7027_v20  ;;  %v2945_v6 = vadd.f32 %v2944_v5, %v7035_v26  ;;  %v2593_v58 = vpop.f32.mrb[143].mxu0  ;;  %v2946_v32 = vpop.f32.mrb[143].mxu1 }
 0x3ab   : > { %v4751_v7 = vmax.f32 %v4750_v21, %v4242_v56  ;;  %v4825_v25 = vmax.f32 %v4824_v48, %v4244_v47  ;;  %v4243_v53 = vsel %vm3848_vm9, %v2590_v9, -inf  ;;  %v4245_v31 = vsel %vm3848_vm9, %v2943_v54, -inf }
 0x3ac   : > { %v4788_v23 = vmax.f32 %v4787_v30, %v4243_v53  ;;  %v4862_v43 = vmax.f32 %v4861_v3, %v4245_v31  ;;  %v4250_v42 = vsel %vm3849_vm10, %v2592_v52, -inf  ;;  %v4252_v55 = vsel %vm3849_vm10, %v2945_v6, -inf  ;;  %3242 = vmatmul.mubr.bf16.gmra.mrb[248].mxu0 %v6848_v2 }
 0x3ad   : > { %v4752_v60 = vmax.f32 %v4751_v7, %v4250_v42  ;;  %v4826_v51 = vmax.f32 %v4825_v25, %v4252_v55  ;;  %v2594_v21 = vadd.f32 %v2593_v58, %v7040_v28  ;;  %v2947_v48 = vadd.f32 %v2946_v32, %v7042_v29  ;;  %3595 = vmatmul.mubr.bf16.gmra.mrb[248].mxu1 %v6848_v2 }
 0x3ae   : > { %3251 = vmatprep.mubr.bf16.mxu0 %v9109_v36  ;;  %3604 = vmatprep.mubr.bf16.mxu1 %v9109_v36 }
 0x3af   : > { %v4251_v30 = vsel %vm3849_vm10, %v2594_v21, -inf  ;;  %v4253_v3 = vsel %vm3849_vm10, %v2947_v48, -inf  ;;  %v2597_v39 = vpop.f32.mrb[144].mxu0  ;;  %v2950_v15 = vpop.f32.mrb[144].mxu1 }
 0x3b0   : > { %v4789_v57 = vmax.f32 %v4788_v23, %v4251_v30  ;;  %v4863_v11 = vmax.f32 %v4862_v43, %v4253_v3  ;;  %v2598_v9 = vadd.f32 %v2597_v39, %v7027_v20  ;;  %v2951_v54 = vadd.f32 %v2950_v15, %v7035_v26  ;;  %v2599_v10 = vpop.f32.mrb[145].mxu0  ;;  %v2952_v2 = vpop.f32.mrb[145].mxu1 }
 0x3b1   : > { %v2600_v5 = vadd.f32 %v2599_v10, %v7040_v28  ;;  %v2953_v56 = vadd.f32 %v2952_v2, %v7042_v29  ;;  %v2601_v47 = vpop.f32.mrb[146].mxu0  ;;  %v2954_v52 = vpop.f32.mrb[146].mxu1 }
 0x3b2   : > { %v4258_v6 = vsel %vm9087_vm11, %v2598_v9, -inf  ;;  %v4260_v58 = vsel %vm9087_vm11, %v2951_v54, -inf  ;;  %v2602_v32 = vadd.f32 %v2601_v47, %v7027_v20  ;;  %v2955_v7 = vadd.f32 %v2954_v52, %v7035_v26  ;;  %v2603_v25 = vpop.f32.mrb[147].mxu0  ;;  %v2956_v53 = vpop.f32.mrb[147].mxu1 }
 0x3b3   : > { %v4753_v31 = vmax.f32 %v4752_v60, %v4258_v6  ;;  %v4827_v23 = vmax.f32 %v4826_v51, %v4260_v58  ;;  %v4259_v43 = vsel %vm9087_vm11, %v2600_v5, -inf  ;;  %v4261_v42 = vsel %vm9087_vm11, %v2953_v56, -inf }
 0x3b4   : > { %v4790_v55 = vmax.f32 %v4789_v57, %v4259_v43  ;;  %v4864_v21 = vmax.f32 %v4863_v11, %v4261_v42  ;;  %v4266_v48 = vsel %vm9083_vm12, %v2602_v32, -inf  ;;  %v4268_v30 = vsel %vm9083_vm12, %v2955_v7, -inf  ;;  %3252 = vmatmul.mubr.bf16.gmra.mrb[252].mxu0 %v6846_v1 }
 0x3b5   : > { %v4754_v3 = vmax.f32 %v4753_v31, %v4266_v48  ;;  %v4828_v39 = vmax.f32 %v4827_v23, %v4268_v30  ;;  %v2604_v60 = vadd.f32 %v2603_v25, %v7040_v28  ;;  %v2957_v51 = vadd.f32 %v2956_v53, %v7042_v29  ;;  %3605 = vmatmul.mubr.bf16.gmra.mrb[252].mxu1 %v6846_v1 }
 0x3b6   : > { %3261 = vmatprep.mubr.bf16.mxu0 %v9109_v36  ;;  %3614 = vmatprep.mubr.bf16.mxu1 %v9109_v36 }
 0x3b7   : > { %v4267_v15 = vsel %vm9083_vm12, %v2604_v60, -inf  ;;  %v4269_v57 = vsel %vm9083_vm12, %v2957_v51, -inf  ;;  %v2607_v11 = vpop.f32.mrb[148].mxu0  ;;  %v2960_v9 = vpop.f32.mrb[148].mxu1 }
 0x3b8   : > { %v4791_v54 = vmax.f32 %v4790_v55, %v4267_v15  ;;  %v4865_v10 = vmax.f32 %v4864_v21, %v4269_v57  ;;  %v2608_v2 = vadd.f32 %v2607_v11, %v7027_v20  ;;  %v2961_v5 = vadd.f32 %v2960_v9, %v7035_v26  ;;  %v2609_v56 = vpop.f32.mrb[149].mxu0  ;;  %v2962_v1 = vpop.f32.mrb[149].mxu1 }
 0x3b9   : > { %v2610_v47 = vadd.f32 %v2609_v56, %v7040_v28  ;;  %v2963_v52 = vadd.f32 %v2962_v1, %v7042_v29  ;;  %v2611_v6 = vpop.f32.mrb[150].mxu0  ;;  %v2964_v58 = vpop.f32.mrb[150].mxu1 }
 0x3ba   : > { %v4274_v32 = vsel %vm9081_vm13, %v2608_v2, -inf  ;;  %v4276_v7 = vsel %vm9081_vm13, %v2961_v5, -inf  ;;  %v2612_v25 = vadd.f32 %v2611_v6, %v7027_v20  ;;  %v2965_v53 = vadd.f32 %v2964_v58, %v7035_v26  ;;  %v2613_v31 = vpop.f32.mrb[151].mxu0  ;;  %v2966_v23 = vpop.f32.mrb[151].mxu1 }
 0x3bb   : > { %v4755_v43 = vmax.f32 %v4754_v3, %v4274_v32  ;;  %v4829_v42 = vmax.f32 %v4828_v39, %v4276_v7  ;;  %v4275_v55 = vsel %vm9081_vm13, %v2610_v47, -inf  ;;  %v4277_v21 = vsel %vm9081_vm13, %v2963_v52, -inf }
 0x3bc   : > { %v4792_v48 = vmax.f32 %v4791_v54, %v4275_v55  ;;  %v4866_v30 = vmax.f32 %v4865_v10, %v4277_v21  ;;  %v4282_v60 = vsel %vm9080_vm14, %v2612_v25, -inf  ;;  %v4284_v51 = vsel %vm9080_vm14, %v2965_v53, -inf  ;;  %3262 = vmatmul.mubr.bf16.gmra.mrb[0].mxu0 %v6872_v24 }
 0x3bd   : > { %v4756_v15 = vmax.f32 %v4755_v43, %v4282_v60  ;;  %v4830_v57 = vmax.f32 %v4829_v42, %v4284_v51  ;;  %v2614_v3 = vadd.f32 %v2613_v31, %v7040_v28  ;;  %v2967_v39 = vadd.f32 %v2966_v23, %v7042_v29  ;;  %3615 = vmatmul.mubr.bf16.gmra.mrb[0].mxu1 %v6872_v24 }
 0x3be   : > { %3271 = vmatprep.mubr.bf16.mxu0 %v9109_v36  ;;  %3624 = vmatprep.mubr.bf16.mxu1 %v9109_v36 }
 0x3bf   : > { %v4283_v11 = vsel %vm9080_vm14, %v2614_v3, -inf  ;;  %v4285_v9 = vsel %vm9080_vm14, %v2967_v39, -inf  ;;  %v2617_v54 = vpop.f32.mrb[152].mxu0  ;;  %v2970_v10 = vpop.f32.mrb[152].mxu1  ;;  %vm9121_vm14 = vcmp.lt.s32.totalorder %v7244_v40, 500  ;;  %v9123_v39 = vld [vmem:[#allocation6_spill] sm:$0xff] }
 0x3c0   : > { %v4793_v2 = vmax.f32 %v4792_v48, %v4283_v11  ;;  %v4867_v5 = vmax.f32 %v4866_v30, %v4285_v9  ;;  %v2618_v56 = vadd.f32 %v2617_v54, %v7027_v20  ;;  %v2971_v1 = vadd.f32 %v2970_v10, %v7035_v26  ;;  %v2619_v47 = vpop.f32.mrb[153].mxu0  ;;  %v2972_v24 = vpop.f32.mrb[153].mxu1  ;;  %vm9122_vm13 = vmmov %vm9121_vm14 }
 0x3c1   : > { %v2620_v52 = vadd.f32 %v2619_v47, %v7040_v28  ;;  %v2973_v6 = vadd.f32 %v2972_v24, %v7042_v29  ;;  %v2621_v58 = vpop.f32.mrb[154].mxu0  ;;  %v2974_v32 = vpop.f32.mrb[154].mxu1 }
 0x3c2   : > { %v4290_v7 = vsel %vm9082_vm15, %v2618_v56, -inf  ;;  %v4292_v25 = vsel %vm9082_vm15, %v2971_v1, -inf  ;;  %v2622_v53 = vadd.f32 %v2621_v58, %v7027_v20  ;;  %v2975_v31 = vadd.f32 %v2974_v32, %v7035_v26  ;;  %v2623_v23 = vpop.f32.mrb[155].mxu0  ;;  %v2976_v43 = vpop.f32.mrb[155].mxu1 }
 0x3c3   : > { %v4757_v42 = vmax.f32 %v4756_v15, %v4290_v7  ;;  %v4831_v55 = vmax.f32 %v4830_v57, %v4292_v25  ;;  %v4291_v21 = vsel %vm9082_vm15, %v2620_v52, -inf  ;;  %v4293_v48 = vsel %vm9082_vm15, %v2973_v6, -inf  ;;  %vm9124_vm15 = vmmov %vm9122_vm13 }
 0x3c4   : > { %v4794_v30 = vmax.f32 %v4793_v2, %v4291_v21  ;;  %v4868_v60 = vmax.f32 %v4867_v5, %v4293_v48  ;;  %v4298_v51 = vsel %vm9121_vm14, %v2622_v53, -inf  ;;  %v4300_v3 = vsel %vm9122_vm13, %v2975_v31, -inf  ;;  %3272 = vmatmul.mubr.bf16.gmra.mrb[4].mxu0 %v9123_v39  ;;  %vm9125_vm14 = vmmov %vm9122_vm13 }
 0x3c5   : > { %v4758_v11 = vmax.f32 %v4757_v42, %v4298_v51  ;;  %v4832_v9 = vmax.f32 %v4831_v55, %v4300_v3  ;;  %v2624_v15 = vadd.f32 %v2623_v23, %v7040_v28  ;;  %v2977_v57 = vadd.f32 %v2976_v43, %v7042_v29  ;;  %3625 = vmatmul.mubr.bf16.gmra.mrb[4].mxu1 %v9123_v39  ;;  %v9130_v39 = vld [vmem:[#allocation23_spill] sm:$0xff] }
 0x3c6   : > { %3281 = vmatprep.mubr.bf16.mxu0 %v9109_v36  ;;  %3634 = vmatprep.mubr.bf16.mxu1 %v9109_v36  ;;  %vm9126_vm13 = vcmp.lt.s32.totalorder %v7279_v59, 500 }
 0x3c7   : > { %v4299_v54 = vsel %vm9124_vm15, %v2624_v15, -inf  ;;  %v4301_v10 = vsel %vm9125_vm14, %v2977_v57, -inf  ;;  %v2627_v2 = vpop.f32.mrb[156].mxu0  ;;  %v2980_v5 = vpop.f32.mrb[156].mxu1  ;;  %vm9127_vm15 = vmmov %vm9126_vm13 }
 0x3c8   : > { %v4795_v56 = vmax.f32 %v4794_v30, %v4299_v54  ;;  %v4869_v1 = vmax.f32 %v4868_v60, %v4301_v10  ;;  %v2628_v47 = vadd.f32 %v2627_v2, %v7027_v20  ;;  %v2981_v24 = vadd.f32 %v2980_v5, %v7035_v26  ;;  %v2629_v52 = vpop.f32.mrb[157].mxu0  ;;  %v2982_v6 = vpop.f32.mrb[157].mxu1  ;;  %vm9128_vm14 = vmmov %vm9126_vm13  ;;  %v9133_v54 = vld [vmem:[#allocation8_spill] sm:$0xff] }
 0x3c9   : > { %v2630_v58 = vadd.f32 %v2629_v52, %v7040_v28  ;;  %v2983_v32 = vadd.f32 %v2982_v6, %v7042_v29  ;;  %v2631_v7 = vpop.f32.mrb[158].mxu0  ;;  %v2984_v25 = vpop.f32.mrb[158].mxu1  ;;  %vm9129_vm12 = vmmov %vm9126_vm13 }
 0x3ca   : > { %v4306_v53 = vsel %vm9126_vm13, %v2628_v47, -inf  ;;  %v4308_v31 = vsel %vm9127_vm15, %v2981_v24, -inf  ;;  %v2632_v23 = vadd.f32 %v2631_v7, %v7027_v20  ;;  %v2985_v43 = vadd.f32 %v2984_v25, %v7035_v26  ;;  %v2633_v42 = vpop.f32.mrb[159].mxu0  ;;  %v2986_v55 = vpop.f32.mrb[159].mxu1 }
 0x3cb   : > { %v4759_v21 = vmax.f32 %v4758_v11, %v4306_v53  ;;  %v4833_v48 = vmax.f32 %v4832_v9, %v4308_v31  ;;  %v4307_v30 = vsel %vm9128_vm14, %v2630_v58, -inf  ;;  %v4309_v60 = vsel %vm9129_vm12, %v2983_v32, -inf }
 0x3cc   : > { %v4796_v51 = vmax.f32 %v4795_v56, %v4307_v30  ;;  %v4870_v3 = vmax.f32 %v4869_v1, %v4309_v60  ;;  %vm9131_vm13 = vcmp.lt.s32.totalorder %v9130_v39, 500  ;;  %3282 = vmatmul.mubr.bf16.gmra.mrb[8].mxu0 %v9133_v54  ;;  %v2634_v11 = vadd.f32 %v2633_v42, %v7040_v28 }
 0x3cd   : > { %v4314_v15 = vsel %vm9131_vm13, %v2632_v23, -inf  ;;  %vm9132_vm15 = vmmov %vm9131_vm13  ;;  %v2987_v9 = vadd.f32 %v2986_v55, %v7042_v29  ;;  %3635 = vmatmul.mubr.bf16.gmra.mrb[8].mxu1 %v9133_v54  ;;  %3291 = vmatprep.mubr.bf16.mxu0 %v9109_v36 }
 0x3ce   : > { %v4316_v57 = vsel %vm9132_vm15, %v2985_v43, -inf  ;;  %v4760_v10 = vmax.f32 %v4759_v21, %v4314_v15  ;;  %3644 = vmatprep.mubr.bf16.mxu1 %v9109_v36  ;;  %vm9134_vm12 = vmmov %vm9131_vm13  ;;  %vm9136_vm13 = vcmp.lt.s32.totalorder %v7317_v50, 500 }
 0x3cf   : > { %v4834_v2 = vmax.f32 %v4833_v48, %v4316_v57  ;;  %v4315_v5 = vsel %vm9134_vm12, %v2634_v11, -inf  ;;  %vm9135_vm14 = vmmov %vm9134_vm12  ;;  %v2637_v1 = vpop.f32.mrb[160].mxu0  ;;  %v2990_v47 = vpop.f32.mrb[160].mxu1  ;;  %v9140_v11 = vld [vmem:[#allocation24_spill] sm:$0xff] }
 0x3d0   : > { %v4317_v56 = vsel %vm9135_vm14, %v2987_v9, -inf  ;;  %v4797_v24 = vmax.f32 %v4796_v51, %v4315_v5  ;;  %v2638_v6 = vadd.f32 %v2637_v1, %v7027_v20  ;;  %v2991_v58 = vadd.f32 %v2990_v47, %v7035_v26  ;;  %v2639_v32 = vpop.f32.mrb[161].mxu0  ;;  %v2992_v7 = vpop.f32.mrb[161].mxu1  ;;  %vm9137_vm15 = vmmov %vm9136_vm13 }
 0x3d1   : > { %v4871_v52 = vmax.f32 %v4870_v3, %v4317_v56  ;;  %v2640_v25 = vadd.f32 %v2639_v32, %v7040_v28  ;;  %v2993_v53 = vadd.f32 %v2992_v7, %v7042_v29  ;;  %v2641_v31 = vpop.f32.mrb[162].mxu0  ;;  %v2994_v23 = vpop.f32.mrb[162].mxu1  ;;  %vm9138_vm12 = vmmov %vm9136_vm13  ;;  %v9143_v56 = vld [vmem:[#allocation7_spill] sm:$0xff] }
 0x3d2   : > { %v4322_v43 = vsel %vm9136_vm13, %v2638_v6, -inf  ;;  %v4324_v42 = vsel %vm9137_vm15, %v2991_v58, -inf  ;;  %v2642_v55 = vadd.f32 %v2641_v31, %v7027_v20  ;;  %v2995_v21 = vadd.f32 %v2994_v23, %v7035_v26  ;;  %v2643_v48 = vpop.f32.mrb[163].mxu0  ;;  %v2996_v30 = vpop.f32.mrb[163].mxu1  ;;  %vm9139_vm14 = vmmov %vm9138_vm12 }
 0x3d3   : > { %v4761_v60 = vmax.f32 %v4760_v10, %v4322_v43  ;;  %v4835_v51 = vmax.f32 %v4834_v2, %v4324_v42  ;;  %v4323_v3 = vsel %vm9138_vm12, %v2640_v25, -inf  ;;  %v4325_v15 = vsel %vm9139_vm14, %v2993_v53, -inf }
 0x3d4   : > { %v4798_v57 = vmax.f32 %v4797_v24, %v4323_v3  ;;  %v4872_v54 = vmax.f32 %v4871_v52, %v4325_v15  ;;  %vm9141_vm13 = vcmp.lt.s32.totalorder %v9140_v11, 500  ;;  %3292 = vmatmul.mubr.bf16.gmra.mrb[12].mxu0 %v9143_v56  ;;  %v2644_v10 = vadd.f32 %v2643_v48, %v7040_v28 }
 0x3d5   : > { %v4330_v9 = vsel %vm9141_vm13, %v2642_v55, -inf  ;;  %vm9142_vm15 = vmmov %vm9141_vm13  ;;  %v2997_v2 = vadd.f32 %v2996_v30, %v7042_v29  ;;  %3645 = vmatmul.mubr.bf16.gmra.mrb[12].mxu1 %v9143_v56  ;;  %3301 = vmatprep.mubr.bf16.mxu0 %v9109_v36 }
 0x3d6   : > { %v4332_v5 = vsel %vm9142_vm15, %v2995_v21, -inf  ;;  %v4762_v1 = vmax.f32 %v4761_v60, %v4330_v9  ;;  %3654 = vmatprep.mubr.bf16.mxu1 %v9109_v36  ;;  %vm9144_vm12 = vmmov %vm9141_vm13  ;;  %vm9146_vm13 = vcmp.lt.s32.totalorder %v7355_v33, 500 }
 0x3d7   : > { %v4836_v47 = vmax.f32 %v4835_v51, %v4332_v5  ;;  %v4331_v24 = vsel %vm9144_vm12, %v2644_v10, -inf  ;;  %vm9145_vm14 = vmmov %vm9144_vm12  ;;  %v2647_v6 = vpop.f32.mrb[164].mxu0  ;;  %v3000_v58 = vpop.f32.mrb[164].mxu1 }
 0x3d8   : > { %v4333_v52 = vsel %vm9145_vm14, %v2997_v2, -inf  ;;  %v4799_v32 = vmax.f32 %v4798_v57, %v4331_v24  ;;  %v2648_v25 = vadd.f32 %v2647_v6, %v7027_v20  ;;  %v3001_v53 = vadd.f32 %v3000_v58, %v7035_v26  ;;  %v2649_v31 = vpop.f32.mrb[165].mxu0  ;;  %v3002_v23 = vpop.f32.mrb[165].mxu1  ;;  %vm9147_vm15 = vmmov %vm9146_vm13  ;;  %v9150_v2 = vld [vmem:[#allocation25_spill] sm:$0xff]  ;;  %v9153_v6 = vld [vmem:[#allocation10_spill] sm:$0xff] }
 0x3d9   : > { %v4873_v7 = vmax.f32 %v4872_v54, %v4333_v52  ;;  %v2650_v43 = vadd.f32 %v2649_v31, %v7040_v28  ;;  %v3003_v42 = vadd.f32 %v3002_v23, %v7042_v29  ;;  %v2651_v55 = vpop.f32.mrb[166].mxu0  ;;  %v3004_v21 = vpop.f32.mrb[166].mxu1  ;;  %vm9148_vm12 = vmmov %vm9146_vm13 }
 0x3da   : > { %v4338_v48 = vsel %vm9146_vm13, %v2648_v25, -inf  ;;  %v4340_v30 = vsel %vm9147_vm15, %v3001_v53, -inf  ;;  %v2652_v60 = vadd.f32 %v2651_v55, %v7027_v20  ;;  %v3005_v51 = vadd.f32 %v3004_v21, %v7035_v26  ;;  %v2653_v3 = vpop.f32.mrb[167].mxu0  ;;  %v3006_v15 = vpop.f32.mrb[167].mxu1  ;;  %vm9149_vm14 = vmmov %vm9148_vm12 }
 0x3db   : > { %v4763_v57 = vmax.f32 %v4762_v1, %v4338_v48  ;;  %v4837_v54 = vmax.f32 %v4836_v47, %v4340_v30  ;;  %v4339_v9 = vsel %vm9148_vm12, %v2650_v43, -inf  ;;  %v4341_v5 = vsel %vm9149_vm14, %v3003_v42, -inf }
 0x3dc   : > { %v4800_v56 = vmax.f32 %v4799_v32, %v4339_v9  ;;  %v4874_v10 = vmax.f32 %v4873_v7, %v4341_v5  ;;  %vm9151_vm13 = vcmp.lt.s32.totalorder %v9150_v2, 500  ;;  %3302 = vmatmul.mubr.bf16.gmra.mrb[16].mxu0 %v9153_v6  ;;  %v2654_v1 = vadd.f32 %v2653_v3, %v7040_v28 }
 0x3dd   : > { %v4346_v24 = vsel %vm9151_vm13, %v2652_v60, -inf  ;;  %vm9152_vm15 = vmmov %vm9151_vm13  ;;  %v3007_v47 = vadd.f32 %v3006_v15, %v7042_v29  ;;  %3655 = vmatmul.mubr.bf16.gmra.mrb[16].mxu1 %v9153_v6  ;;  %3311 = vmatprep.mubr.bf16.mxu0 %v9109_v36 }
 0x3de   : > { %v4348_v52 = vsel %vm9152_vm15, %v3005_v51, -inf  ;;  %v4764_v58 = vmax.f32 %v4763_v57, %v4346_v24  ;;  %3664 = vmatprep.mubr.bf16.mxu1 %v9109_v36  ;;  %vm9154_vm12 = vmmov %vm9151_vm13  ;;  %vm9156_vm13 = vcmp.lt.s32.totalorder %v7393_v41, 500 }
 0x3df   : > { %v4838_v25 = vmax.f32 %v4837_v54, %v4348_v52  ;;  %v4347_v32 = vsel %vm9154_vm12, %v2654_v1, -inf  ;;  %vm9155_vm14 = vmmov %vm9154_vm12  ;;  %v2657_v53 = vpop.f32.mrb[168].mxu0  ;;  %v3010_v31 = vpop.f32.mrb[168].mxu1 }
 0x3e0   : > { %v4349_v7 = vsel %vm9155_vm14, %v3007_v47, -inf  ;;  %v4801_v23 = vmax.f32 %v4800_v56, %v4347_v32  ;;  %v2658_v42 = vadd.f32 %v2657_v53, %v7027_v20  ;;  %v3011_v55 = vadd.f32 %v3010_v31, %v7035_v26  ;;  %v2659_v21 = vpop.f32.mrb[169].mxu0  ;;  %v3012_v48 = vpop.f32.mrb[169].mxu1  ;;  %vm9157_vm15 = vmmov %vm9156_vm13  ;;  %v9160_v32 = vld [vmem:[#allocation26_spill] sm:$0xff]  ;;  %v9163_v31 = vld [vmem:[#allocation9_spill] sm:$0xff] }
 0x3e1   : > { %v4875_v43 = vmax.f32 %v4874_v10, %v4349_v7  ;;  %v2660_v30 = vadd.f32 %v2659_v21, %v7040_v28  ;;  %v3013_v60 = vadd.f32 %v3012_v48, %v7042_v29  ;;  %v2661_v51 = vpop.f32.mrb[170].mxu0  ;;  %v3014_v3 = vpop.f32.mrb[170].mxu1  ;;  %vm9158_vm12 = vmmov %vm9156_vm13 }
 0x3e2   : > { %v4354_v15 = vsel %vm9156_vm13, %v2658_v42, -inf  ;;  %v4356_v57 = vsel %vm9157_vm15, %v3011_v55, -inf  ;;  %v2662_v54 = vadd.f32 %v2661_v51, %v7027_v20  ;;  %v3015_v9 = vadd.f32 %v3014_v3, %v7035_v26  ;;  %v2663_v5 = vpop.f32.mrb[171].mxu0  ;;  %v3016_v56 = vpop.f32.mrb[171].mxu1  ;;  %vm9159_vm14 = vmmov %vm9158_vm12 }
 0x3e3   : > { %v4765_v10 = vmax.f32 %v4764_v58, %v4354_v15  ;;  %v4839_v24 = vmax.f32 %v4838_v25, %v4356_v57  ;;  %v4355_v52 = vsel %vm9158_vm12, %v2660_v30, -inf  ;;  %v4357_v6 = vsel %vm9159_vm14, %v3013_v60, -inf }
 0x3e4   : > { %v4802_v1 = vmax.f32 %v4801_v23, %v4355_v52  ;;  %v4876_v47 = vmax.f32 %v4875_v43, %v4357_v6  ;;  %vm9161_vm13 = vcmp.lt.s32.totalorder %v9160_v32, 500  ;;  %3312 = vmatmul.mubr.bf16.gmra.mrb[20].mxu0 %v9163_v31  ;;  %v2664_v58 = vadd.f32 %v2663_v5, %v7040_v28 }
 0x3e5   : > { %v4362_v7 = vsel %vm9161_vm13, %v2662_v54, -inf  ;;  %vm9162_vm15 = vmmov %vm9161_vm13  ;;  %v3017_v25 = vadd.f32 %v3016_v56, %v7042_v29  ;;  %3665 = vmatmul.mubr.bf16.gmra.mrb[20].mxu1 %v9163_v31  ;;  %3321 = vmatprep.mubr.bf16.mxu0 %v9109_v36 }
 0x3e6   : > { %v4364_v53 = vsel %vm9162_vm15, %v3015_v9, -inf  ;;  %v4766_v42 = vmax.f32 %v4765_v10, %v4362_v7  ;;  %3674 = vmatprep.mubr.bf16.mxu1 %v9109_v36  ;;  %vm9164_vm12 = vmmov %vm9161_vm13  ;;  %vm9166_vm13 = vcmp.lt.s32.totalorder %v7431_v13, 500 }
 0x3e7   : > { %v4840_v55 = vmax.f32 %v4839_v24, %v4364_v53  ;;  %v4363_v23 = vsel %vm9164_vm12, %v2664_v58, -inf  ;;  %vm9165_vm14 = vmmov %vm9164_vm12  ;;  %v2667_v21 = vpop.f32.mrb[172].mxu0  ;;  %v3020_v48 = vpop.f32.mrb[172].mxu1 }
 0x3e8   : > { %v4365_v43 = vsel %vm9165_vm14, %v3017_v25, -inf  ;;  %v4803_v30 = vmax.f32 %v4802_v1, %v4363_v23  ;;  %v2668_v51 = vadd.f32 %v2667_v21, %v7027_v20  ;;  %v3021_v3 = vadd.f32 %v3020_v48, %v7035_v26  ;;  %v2669_v15 = vpop.f32.mrb[173].mxu0  ;;  %v3022_v57 = vpop.f32.mrb[173].mxu1  ;;  %vm9167_vm15 = vmmov %vm9166_vm13 }
 0x3e9   : > { %v4877_v60 = vmax.f32 %v4876_v47, %v4365_v43  ;;  %v2670_v54 = vadd.f32 %v2669_v15, %v7040_v28  ;;  %v3023_v9 = vadd.f32 %v3022_v57, %v7042_v29  ;;  %v2671_v5 = vpop.f32.mrb[174].mxu0  ;;  %v3024_v56 = vpop.f32.mrb[174].mxu1  ;;  %vm9168_vm12 = vmmov %vm9166_vm13  ;;  %v9170_v43 = vld [vmem:[#allocation27_spill] sm:$0xff] }
 0x3ea   : > { %v4370_v10 = vsel %vm9166_vm13, %v2668_v51, -inf  ;;  %v4372_v24 = vsel %vm9167_vm15, %v3021_v3, -inf  ;;  %v2672_v52 = vadd.f32 %v2671_v5, %v7027_v20  ;;  %v3025_v6 = vadd.f32 %v3024_v56, %v7035_v26  ;;  %v2673_v1 = vpop.f32.mrb[175].mxu0  ;;  %v3026_v47 = vpop.f32.mrb[175].mxu1  ;;  %vm9169_vm14 = vmmov %vm9168_vm12  ;;  %v9173_v51 = vld [vmem:[#allocation12_spill] sm:$0xff] }
 0x3eb   : > { %v4767_v7 = vmax.f32 %v4766_v42, %v4370_v10  ;;  %v4841_v53 = vmax.f32 %v4840_v55, %v4372_v24  ;;  %v4371_v31 = vsel %vm9168_vm12, %v2670_v54, -inf  ;;  %v4373_v58 = vsel %vm9169_vm14, %v3023_v9, -inf }
 0x3ec   : > { %v4804_v25 = vmax.f32 %v4803_v30, %v4371_v31  ;;  %v4878_v23 = vmax.f32 %v4877_v60, %v4373_v58  ;;  %vm9171_vm13 = vcmp.lt.s32.totalorder %v9170_v43, 500  ;;  %3322 = vmatmul.mubr.bf16.gmra.mrb[24].mxu0 %v9173_v51  ;;  %v2674_v42 = vadd.f32 %v2673_v1, %v7040_v28 }
 0x3ed   : > { %v4378_v21 = vsel %vm9171_vm13, %v2672_v52, -inf  ;;  %vm9172_vm15 = vmmov %vm9171_vm13  ;;  %v3027_v55 = vadd.f32 %v3026_v47, %v7042_v29  ;;  %3675 = vmatmul.mubr.bf16.gmra.mrb[24].mxu1 %v9173_v51  ;;  %3331 = vmatprep.mubr.bf16.mxu0 %v9109_v36 }
 0x3ee   : > { %v4380_v48 = vsel %vm9172_vm15, %v3025_v6, -inf  ;;  %v4768_v3 = vmax.f32 %v4767_v7, %v4378_v21  ;;  %3684 = vmatprep.mubr.bf16.mxu1 %v9109_v36  ;;  %vm9174_vm12 = vmmov %vm9171_vm13  ;;  %vm9176_vm13 = vcmp.lt.s32.totalorder %v7469_v14, 500 }
 0x3ef   : > { %v4842_v15 = vmax.f32 %v4841_v53, %v4380_v48  ;;  %v4379_v30 = vsel %vm9174_vm12, %v2674_v42, -inf  ;;  %vm9175_vm14 = vmmov %vm9174_vm12  ;;  %v2677_v57 = vpop.f32.mrb[176].mxu0  ;;  %v3030_v54 = vpop.f32.mrb[176].mxu1 }
 0x3f0   : > { %v4381_v60 = vsel %vm9175_vm14, %v3027_v55, -inf  ;;  %v4805_v9 = vmax.f32 %v4804_v25, %v4379_v30  ;;  %v2678_v56 = vadd.f32 %v2677_v57, %v7027_v20  ;;  %v3031_v10 = vadd.f32 %v3030_v54, %v7035_v26  ;;  %v2679_v24 = vpop.f32.mrb[177].mxu0  ;;  %v3032_v52 = vpop.f32.mrb[177].mxu1  ;;  %vm9177_vm15 = vmmov %vm9176_vm13 }
 0x3f1   : > { %v4879_v5 = vmax.f32 %v4878_v23, %v4381_v60  ;;  %v2680_v6 = vadd.f32 %v2679_v24, %v7040_v28  ;;  %v3033_v1 = vadd.f32 %v3032_v52, %v7042_v29  ;;  %v2681_v47 = vpop.f32.mrb[178].mxu0  ;;  %v3034_v7 = vpop.f32.mrb[178].mxu1  ;;  %vm9178_vm12 = vmmov %vm9176_vm13 }
 0x3f2   : > { %v4386_v53 = vsel %vm9176_vm13, %v2678_v56, -inf  ;;  %v4388_v31 = vsel %vm9177_vm15, %v3031_v10, -inf  ;;  %v2682_v58 = vadd.f32 %v2681_v47, %v7027_v20  ;;  %v3035_v25 = vadd.f32 %v3034_v7, %v7035_v26  ;;  %v2683_v23 = vpop.f32.mrb[179].mxu0  ;;  %v3036_v21 = vpop.f32.mrb[179].mxu1  ;;  %vm9179_vm14 = vmmov %vm9178_vm12  ;;  %v9182_v56 = vld [vmem:[#allocation11_spill] sm:$0xff] }
 0x3f3   : > { %v4769_v48 = vmax.f32 %v4768_v3, %v4386_v53  ;;  %v4843_v51 = vmax.f32 %v4842_v15, %v4388_v31  ;;  %v4387_v42 = vsel %vm9178_vm12, %v2680_v6, -inf  ;;  %v4389_v55 = vsel %vm9179_vm14, %v3033_v1, -inf }
 0x3f4   : > { %v4806_v30 = vmax.f32 %v4805_v9, %v4387_v42  ;;  %v4880_v60 = vmax.f32 %v4879_v5, %v4389_v55  ;;  %vm9180_vm13 = vcmp.lt.s32.totalorder %v7472_v12, 500  ;;  %3332 = vmatmul.mubr.bf16.gmra.mrb[28].mxu0 %v9182_v56  ;;  %v2684_v3 = vadd.f32 %v2683_v23, %v7040_v28 }
 0x3f5   : > { %v4394_v57 = vsel %vm9180_vm13, %v2682_v58, -inf  ;;  %vm9181_vm15 = vmmov %vm9180_vm13  ;;  %v3037_v15 = vadd.f32 %v3036_v21, %v7042_v29  ;;  %3685 = vmatmul.mubr.bf16.gmra.mrb[28].mxu1 %v9182_v56  ;;  %3341 = vmatprep.mubr.bf16.mxu0 %v9109_v36 }
 0x3f6   : > { %v4396_v54 = vsel %vm9181_vm15, %v3035_v25, -inf  ;;  %v4770_v10 = vmax.f32 %v4769_v48, %v4394_v57  ;;  %3694 = vmatprep.mubr.bf16.mxu1 %v9109_v36  ;;  %vm9183_vm12 = vmmov %vm9180_vm13  ;;  %vm9185_vm13 = vcmp.lt.s32.totalorder %v7507_v22, 500 }
 0x3f7   : > { %v4844_v24 = vmax.f32 %v4843_v51, %v4396_v54  ;;  %v4395_v9 = vsel %vm9183_vm12, %v2684_v3, -inf  ;;  %vm9184_vm14 = vmmov %vm9183_vm12  ;;  %v2687_v52 = vpop.f32.mrb[180].mxu0  ;;  %v3040_v6 = vpop.f32.mrb[180].mxu1 }
 0x3f8   : > { %v4397_v5 = vsel %vm9184_vm14, %v3037_v15, -inf  ;;  %v4807_v1 = vmax.f32 %v4806_v30, %v4395_v9  ;;  %v2688_v7 = vadd.f32 %v2687_v52, %v7027_v20  ;;  %v3041_v53 = vadd.f32 %v3040_v6, %v7035_v26  ;;  %v2689_v31 = vpop.f32.mrb[181].mxu0  ;;  %v3042_v58 = vpop.f32.mrb[181].mxu1  ;;  %vm9186_vm15 = vmmov %vm9185_vm13 }
 0x3f9   : > { %v4881_v47 = vmax.f32 %v4880_v60, %v4397_v5  ;;  %v2690_v25 = vadd.f32 %v2689_v31, %v7040_v28  ;;  %v3043_v23 = vadd.f32 %v3042_v58, %v7042_v29  ;;  %v2691_v21 = vpop.f32.mrb[182].mxu0  ;;  %v3044_v48 = vpop.f32.mrb[182].mxu1  ;;  %vm9187_vm12 = vmmov %vm9185_vm13 }
 0x3fa   : > { %v4402_v51 = vsel %vm9185_vm13, %v2688_v7, -inf  ;;  %v4404_v42 = vsel %vm9186_vm15, %v3041_v53, -inf  ;;  %v2692_v55 = vadd.f32 %v2691_v21, %v7027_v20  ;;  %v3045_v30 = vadd.f32 %v3044_v48, %v7035_v26  ;;  %v2693_v60 = vpop.f32.mrb[183].mxu0  ;;  %v3046_v57 = vpop.f32.mrb[183].mxu1  ;;  %vm9188_vm14 = vmmov %vm9187_vm12  ;;  %v9191_v7 = vld [vmem:[#allocation14_spill] sm:$0xff] }
 0x3fb   : > { %v4771_v54 = vmax.f32 %v4770_v10, %v4402_v51  ;;  %v4845_v56 = vmax.f32 %v4844_v24, %v4404_v42  ;;  %v4403_v3 = vsel %vm9187_vm12, %v2690_v25, -inf  ;;  %v4405_v15 = vsel %vm9188_vm14, %v3043_v23, -inf  ;;  %v9194_v23 = vld [vmem:[#allocation21_spill] sm:$0xff] }
 0x3fc   : > { %v4808_v9 = vmax.f32 %v4807_v1, %v4403_v3  ;;  %v4882_v5 = vmax.f32 %v4881_v47, %v4405_v15  ;;  %vm9189_vm13 = vcmp.lt.s32.totalorder %v7510_v38, 500  ;;  %3342 = vmatmul.mubr.bf16.gmra.mrb[32].mxu0 %v9191_v7  ;;  %v2694_v10 = vadd.f32 %v2693_v60, %v7040_v28 }
 0x3fd   : > { %v4410_v52 = vsel %vm9189_vm13, %v2692_v55, -inf  ;;  %vm9190_vm15 = vmmov %vm9189_vm13  ;;  %v3047_v24 = vadd.f32 %v3046_v57, %v7042_v29  ;;  %3695 = vmatmul.mubr.bf16.gmra.mrb[32].mxu1 %v9191_v7  ;;  %3351 = vmatprep.mubr.bf16.mxu0 %v9109_v36  ;;  %v2021_v21 = vsub.s32 4, %v9194_v23  ;;  %v2029_v48 = vsub.s32 6, %v9194_v23 }
 0x3fe   : > { %v4412_v6 = vsel %vm9190_vm15, %v3045_v30, -inf  ;;  %v4772_v53 = vmax.f32 %v4771_v54, %v4410_v52  ;;  %3704 = vmatprep.mubr.bf16.mxu1 %v9109_v36  ;;  %vm9192_vm12 = vmmov %vm9189_vm13  ;;  %v2025_v52 = vsub.s32 5, %v9194_v23  ;;  %vm9195_vm13 = vcmp.lt.s32.totalorder %v7545_v44, 500 }
 0x3ff   : > { %v4846_v31 = vmax.f32 %v4845_v56, %v4412_v6  ;;  %v4411_v1 = vsel %vm9192_vm12, %v2694_v10, -inf  ;;  %vm9193_vm14 = vmmov %vm9192_vm12  ;;  %v2697_v58 = vpop.f32.mrb[184].mxu0  ;;  %v3050_v25 = vpop.f32.mrb[184].mxu1  ;;  %v2033_v6 = vsub.s32 7, %v9194_v23 }
 0x400   : > { %v4413_v47 = vsel %vm9193_vm14, %v3047_v24, -inf  ;;  %v4809_v51 = vmax.f32 %v4808_v9, %v4411_v1  ;;  %v2698_v55 = vadd.f32 %v2697_v58, %v7027_v20  ;;  %v3051_v30 = vadd.f32 %v3050_v25, %v7035_v26  ;;  %v2699_v60 = vpop.f32.mrb[185].mxu0  ;;  %v3052_v57 = vpop.f32.mrb[185].mxu1  ;;  %vm9196_vm15 = vmmov %vm9195_vm13 }
 0x401   : > { %v4883_v42 = vmax.f32 %v4882_v5, %v4413_v47  ;;  %v2700_v54 = vadd.f32 %v2699_v60, %v7040_v28  ;;  %v3053_v56 = vadd.f32 %v3052_v57, %v7042_v29  ;;  %v2701_v3 = vpop.f32.mrb[186].mxu0  ;;  %v3054_v15 = vpop.f32.mrb[186].mxu1  ;;  %vm9197_vm12 = vmmov %vm9195_vm13 }
 0x402   : > { %v4418_v9 = vsel %vm9195_vm13, %v2698_v55, -inf  ;;  %v4420_v5 = vsel %vm9196_vm15, %v3051_v30, -inf  ;;  %v2702_v7 = vadd.f32 %v2701_v3, %v7027_v20  ;;  %v3055_v10 = vadd.f32 %v3054_v15, %v7035_v26  ;;  %v2703_v24 = vpop.f32.mrb[187].mxu0  ;;  %v3056_v1 = vpop.f32.mrb[187].mxu1  ;;  %vm9198_vm14 = vmmov %vm9197_vm12  ;;  %v9199_v3 = vld [vmem:[#allocation13_spill] sm:$0xff] }
 0x403   : > { %v4773_v47 = vmax.f32 %v4772_v53, %v4418_v9  ;;  %v4847_v58 = vmax.f32 %v4846_v31, %v4420_v5  ;;  %v4419_v25 = vsel %vm9197_vm12, %v2700_v54, -inf  ;;  %v4421_v23 = vsel %vm9198_vm14, %v3053_v56, -inf  ;;  %v5953_v9 = vld [vmem:[%s9012_s6] sm:$0xff] }
 0x404   : > { %v4810_v60 = vmax.f32 %v4809_v51, %v4419_v25  ;;  %v4884_v57 = vmax.f32 %v4883_v42, %v4421_v23  ;;  %v4426_v55 = vsel %vm3871_vm0, %v2702_v7, -inf  ;;  %v4428_v30 = vsel %vm3871_vm0, %v3055_v10, -inf  ;;  %3352 = vmatmul.mubr.bf16.gmra.mrb[36].mxu0 %v9199_v3 }
 0x405   : > { %v4774_v15 = vmax.f32 %v4773_v47, %v4426_v55  ;;  %v4848_v8 = vmax.f32 %v4847_v58, %v4428_v30  ;;  %v2704_v53 = vadd.f32 %v2703_v24, %v7040_v28  ;;  %v3057_v31 = vadd.f32 %v3056_v1, %v7042_v29  ;;  %3705 = vmatmul.mubr.bf16.gmra.mrb[36].mxu1 %v9199_v3 }
 0x406   : > { %3361 = vmatprep.mubr.bf16.mxu0 %v9109_v36  ;;  %3714 = vmatprep.mubr.bf16.mxu1 %v9109_v36  ;;  %v8081_v5 = vrot.slane %v5953_v9, %v2021_v21  ;;  %v8083_v7 = vrot.slane %v5953_v9, %v2029_v48  ;;  %v8091_v21 = vrot.slane %v5953_v9, %v2033_v6  ;;  %vm9212_vm13 = vcmp.lt.s32.totalorder %v7168_v49, 500 }
 0x407   : > { %v4427_v51 = vsel %vm3871_vm0, %v2704_v53, -inf  ;;  %v4429_v42 = vsel %vm3871_vm0, %v3057_v31, -inf  ;;  %v2707_v54 = vpop.f32.mrb[188].mxu0  ;;  %v3060_v56 = vpop.f32.mrb[188].mxu1  ;;  %v8089_v53 = vrot.slane %v5953_v9, %v2025_v52  ;;  %vm9213_vm15 = vmmov %vm9212_vm13 }
 0x408   : > { %v4811_v10 = vmax.f32 %v4810_v60, %v4427_v51  ;;  %v4885_v24 = vmax.f32 %v4884_v57, %v4429_v42  ;;  %v2708_v1 = vadd.f32 %v2707_v54, %v7027_v20  ;;  %v3061_v47 = vadd.f32 %v3060_v56, %v7035_v26  ;;  %v2709_v58 = vpop.f32.mrb[189].mxu0  ;;  %v3062_v25 = vpop.f32.mrb[189].mxu1  ;;  %vm9215_vm12 = vmmov %vm9212_vm13 }
 0x409   : > { %v2710_v23 = vadd.f32 %v2709_v58, %v7040_v28  ;;  %v3063_v55 = vadd.f32 %v3062_v25, %v7042_v29  ;;  %v2711_v30 = vpop.f32.mrb[190].mxu0  ;;  %v3064_v3 = vpop.f32.mrb[190].mxu1  ;;  %vm9216_vm14 = vmmov %vm9215_vm12 }
 0x40a   : > { %v4434_v60 = vsel %vm3872_vm1, %v2708_v1, -inf  ;;  %v4436_v57 = vsel %vm3872_vm1, %v3061_v47, -inf  ;;  %v2712_v31 = vadd.f32 %v2711_v30, %v7027_v20  ;;  %v3065_v51 = vadd.f32 %v3064_v3, %v7035_v26  ;;  %v2713_v42 = vpop.f32.mrb[191].mxu0  ;;  %v3066_v54 = vpop.f32.mrb[191].mxu1  ;;  %v9202_v47 = vld [vmem:[#allocation16_spill] sm:$0xff] }
 0x40b   : > { %v4775_v56 = vmax.f32 %v4774_v15, %v4434_v60  ;;  %v4849_v58 = vmax.f32 %v4848_v8, %v4436_v57  ;;  %v4435_v52 = vsel %vm3872_vm1, %v2710_v23, -inf  ;;  %v4437_v6 = vsel %vm3872_vm1, %v3063_v55, -inf }
 0x40c   : > { %v4812_v9 = vmax.f32 %v4811_v10, %v4435_v52  ;;  %v4886_v25 = vmax.f32 %v4885_v24, %v4437_v6  ;;  %v4442_v46 = vsel %vm3873_vm2, %v2712_v31, -inf  ;;  %v4444_v20 = vsel %vm3873_vm2, %v3065_v51, -inf  ;;  %3362 = vmatmul.mubr.bf16.gmra.mrb[40].mxu0 %v9202_v47 }
 0x40d   : > { %v4776_v26 = vmax.f32 %v4775_v56, %v4442_v46  ;;  %v4850_v30 = vmax.f32 %v4849_v58, %v4444_v20  ;;  %v2714_v8 = vadd.f32 %v2713_v42, %v7040_v28  ;;  %v3067_v15 = vadd.f32 %v3066_v54, %v7042_v29  ;;  %3715 = vmatmul.mubr.bf16.gmra.mrb[40].mxu1 %v9202_v47 }
 0x40e   : > { %3371 = vmatprep.mubr.bf16.mxu0 %v9109_v36  ;;  %3724 = vmatprep.mubr.bf16.mxu1 %v9109_v36 }
 0x40f   : > { %v4777_v10 = vrot.slane %v4776_v26, 4  ;;  %v4851_v24 = vrot.slane %v4850_v30, 4  ;;  %v4443_v23 = vsel %vm3873_vm2, %v2714_v8, -inf  ;;  %v4445_v55 = vsel %vm3873_vm2, %v3067_v15, -inf  ;;  %v3103_v46 = vpop.f32.mrb[192].mxu0  ;;  %v3456_v3 = vpop.f32.mrb[192].mxu1 }
 0x410   : > { %v4813_v60 = vmax.f32 %v4812_v9, %v4443_v23  ;;  %v4887_v28 = vmax.f32 %v4886_v25, %v4445_v55  ;;  %v3104_v29 = vadd.f32 %v3103_v46, %v8081_v5  ;;  %v3457_v57 = vadd.f32 %v3456_v3, %v8083_v7  ;;  %v3105_v31 = vpop.f32.mrb[193].mxu0  ;;  %v3458_v51 = vpop.f32.mrb[193].mxu1 }
 0x411   : > { %v4778_v42 = vmax.f32 %v4776_v26, %v4777_v10  ;;  %v4852_v54 = vmax.f32 %v4850_v30, %v4851_v24  ;;  %v3106_v56 = vadd.f32 %v3105_v31, %v8089_v53  ;;  %v3459_v58 = vadd.f32 %v3458_v51, %v8091_v21  ;;  %v3107_v52 = vpop.f32.mrb[194].mxu0  ;;  %v3460_v6 = vpop.f32.mrb[194].mxu1 }
 0x412   : > { %v4814_v20 = vrot.slane %v4813_v60, 4  ;;  %v4888_v47 = vrot.slane %v4887_v28, 4  ;;  %v3942_v9 = vsel %vm3842_vm3, %v3104_v29, -inf  ;;  %v3944_v25 = vsel %vm3842_vm3, %v3457_v57, -inf  ;;  %v3109_v15 = vpop.f32.mrb[195].mxu0  ;;  %v3462_v23 = vpop.f32.mrb[195].mxu1 }
 0x413   : > { %v4779_v55 = vrot.slane %v4778_v42, 2  ;;  %v4853_v46 = vrot.slane %v4852_v54, 2  ;;  %v3943_v26 = vsel %vm3842_vm3, %v3106_v56, -inf  ;;  %v3945_v30 = vsel %vm3842_vm3, %v3459_v58, -inf  ;;  %v9204_v29 = vld [vmem:[#allocation15_spill] sm:$0xff] }
 0x414   : > { %v4815_v10 = vmax.f32 %v4813_v60, %v4814_v20  ;;  %v4889_v24 = vmax.f32 %v4887_v28, %v4888_v47  ;;  %v3108_v3 = vadd.f32 %v3107_v52, %v8081_v5  ;;  %v3461_v31 = vadd.f32 %v3460_v6, %v8083_v7  ;;  %3372 = vmatmul.mubr.bf16.gmra.mrb[44].mxu0 %v9204_v29 }
 0x415   : > { %v4780_v51 = vmax.f32 %v4778_v42, %v4779_v55  ;;  %v4854_v57 = vmax.f32 %v4852_v54, %v4853_v46  ;;  %v3110_v4 = vadd.f32 %v3109_v15, %v8089_v53  ;;  %v3463_v45 = vadd.f32 %v3462_v23, %v8091_v21  ;;  %3725 = vmatmul.mubr.bf16.gmra.mrb[44].mxu1 %v9204_v29 }
 0x416   : > { %v4816_v56 = vrot.slane %v4815_v10, 2  ;;  %v4890_v1 = vrot.slane %v4889_v24, 2  ;;  %v3950_v60 = vsel %vm3843_vm4, %v3108_v3, -inf  ;;  %v3952_v28 = vsel %vm3843_vm4, %v3461_v31, -inf  ;;  %3381 = vmatprep.mubr.bf16.mxu0 %v9109_v36  ;;  %3734 = vmatprep.mubr.bf16.mxu1 %v9109_v36 }
 0x417   : > { %v4781_v42 = vrot.slane %v4780_v51, 1  ;;  %v4855_v54 = vrot.slane %v4854_v57, 1  ;;  %v4598_v58 = vmax.f32 %v3942_v9, %v3950_v60  ;;  %v4672_v52 = vmax.f32 %v3944_v25, %v3952_v28  ;;  %v3113_v6 = vpop.f32.mrb[196].mxu0  ;;  %v3466_v20 = vpop.f32.mrb[196].mxu1 }
 0x418   : > { %v4817_v47 = vmax.f32 %v4815_v10, %v4816_v56  ;;  %v4891_v15 = vmax.f32 %v4889_v24, %v4890_v1  ;;  %v3951_v23 = vsel %vm3843_vm4, %v3110_v4, -inf  ;;  %v3953_v55 = vsel %vm3843_vm4, %v3463_v45, -inf  ;;  %v3115_v46 = vpop.f32.mrb[197].mxu0  ;;  %v3468_v3 = vpop.f32.mrb[197].mxu1 }
 0x419   : > { %v8145_v31 = vmax.f32 %v4780_v51, %v4781_v42  ;;  %v8147_v29 = vmax.f32 %v4854_v57, %v4855_v54  ;;  %v4635_v8 = vmax.f32 %v3943_v26, %v3951_v23  ;;  %v4709_v48 = vmax.f32 %v3945_v30, %v3953_v55  ;;  %v3117_v9 = vpop.f32.mrb[198].mxu0  ;;  %v3470_v25 = vpop.f32.mrb[198].mxu1 }
 0x41a   : > { %v4818_v60 = vrot.slane %v4817_v47, 1  ;;  %v4892_v28 = vrot.slane %v4891_v15, 1  ;;  %v3114_v1 = vadd.f32 %v3113_v6, %v8081_v5  ;;  %v3467_v10 = vadd.f32 %v3466_v20, %v8083_v7  ;;  %v3119_v4 = vpop.f32.mrb[199].mxu0  ;;  %v3472_v24 = vpop.f32.mrb[199].mxu1  ;;  %v9209_v6 = vld [vmem:[#allocation18_spill] sm:$0xff] }
 0x41b   : > { %9205 = vst [vmem:[#allocation6_spill] sm:$0xff] %v8145_v31  ;;  %9206 = vst [vmem:[#allocation23_spill] sm:$0xff] %v8147_v29  ;;  %v3116_v45 = vadd.f32 %v3115_v46, %v8089_v53  ;;  %v3469_v56 = vadd.f32 %v3468_v3, %v8091_v21  ;;  %v3118_v51 = vadd.f32 %v3117_v9, %v8081_v5 }
 0x41c   : > { %v3471_v57 = vadd.f32 %v3470_v25, %v8083_v7  ;;  %v8155_v26 = vmax.f32 %v4817_v47, %v4818_v60  ;;  %v8157_v30 = vmax.f32 %v4891_v15, %v4892_v28  ;;  %v3958_v42 = vsel %vm3844_vm5, %v3114_v1, -inf  ;;  %3382 = vmatmul.mubr.bf16.gmra.mrb[48].mxu0 %v9209_v6 }
 0x41d   : > { %v3960_v54 = vsel %vm3844_vm5, %v3467_v10, -inf  ;;  %v4599_v20 = vmax.f32 %v4598_v58, %v3958_v42  ;;  %v3959_v55 = vsel %vm3844_vm5, %v3116_v45, -inf  ;;  %v3961_v46 = vsel %vm3844_vm5, %v3469_v56, -inf  ;;  %3735 = vmatmul.mubr.bf16.gmra.mrb[48].mxu1 %v9209_v6  ;;  %3391 = vmatprep.mubr.bf16.mxu0 %v9109_v36 }
 0x41e   : > { %9207 = vst [vmem:[#allocation8_spill] sm:$0xff] %v8155_v26  ;;  %9208 = vst [vmem:[#allocation24_spill] sm:$0xff] %v8157_v30  ;;  %v4673_v23 = vmax.f32 %v4672_v52, %v3960_v54  ;;  %v4636_v47 = vmax.f32 %v4635_v8, %v3959_v55  ;;  %v4710_v15 = vmax.f32 %v4709_v48, %v3961_v46  ;;  %v3966_v3 = vsel %vm3845_vm6, %v3118_v51, -inf }
 0x41f   : > { %v3968_v9 = vsel %vm3845_vm6, %v3471_v57, -inf  ;;  %3744 = vmatprep.mubr.bf16.mxu1 %v9109_v36  ;;  %v4600_v58 = vmax.f32 %v4599_v20, %v3966_v3  ;;  %v3120_v25 = vadd.f32 %v3119_v4, %v8089_v53  ;;  %v3473_v60 = vadd.f32 %v3472_v24, %v8091_v21  ;;  %v3123_v28 = vpop.f32.mrb[200].mxu0  ;;  %v3476_v1 = vpop.f32.mrb[200].mxu1 }
 0x420   : > { %v4674_v52 = vmax.f32 %v4673_v23, %v3968_v9  ;;  %v3124_v10 = vadd.f32 %v3123_v28, %v8081_v5  ;;  %v3477_v48 = vadd.f32 %v3476_v1, %v8083_v7  ;;  %v3125_v8 = vpop.f32.mrb[201].mxu0  ;;  %v3478_v45 = vpop.f32.mrb[201].mxu1 }
 0x421   : > { %v3967_v56 = vsel %vm3845_vm6, %v3120_v25, -inf  ;;  %v3969_v51 = vsel %vm3845_vm6, %v3473_v60, -inf  ;;  %v3126_v57 = vadd.f32 %v3125_v8, %v8089_v53  ;;  %v3479_v4 = vadd.f32 %v3478_v45, %v8091_v21  ;;  %v3127_v42 = vpop.f32.mrb[202].mxu0  ;;  %v3480_v24 = vpop.f32.mrb[202].mxu1 }
 0x422   : > { %v4637_v54 = vmax.f32 %v4636_v47, %v3967_v56  ;;  %v4711_v6 = vmax.f32 %v4710_v15, %v3969_v51  ;;  %v3974_v20 = vsel %vm3846_vm7, %v3124_v10, -inf  ;;  %v3976_v23 = vsel %vm3846_vm7, %v3477_v48, -inf  ;;  %v3129_v55 = vpop.f32.mrb[203].mxu0  ;;  %v3482_v46 = vpop.f32.mrb[203].mxu1  ;;  %v9210_v10 = vld [vmem:[#allocation17_spill] sm:$0xff] }
 0x423   : > { %v4601_v3 = vmax.f32 %v4600_v58, %v3974_v20  ;;  %v4675_v9 = vmax.f32 %v4674_v52, %v3976_v23  ;;  %v3975_v25 = vsel %vm3846_vm7, %v3126_v57, -inf  ;;  %v3977_v60 = vsel %vm3846_vm7, %v3479_v4, -inf }
 0x424   : > { %v4638_v28 = vmax.f32 %v4637_v54, %v3975_v25  ;;  %v4712_v1 = vmax.f32 %v4711_v6, %v3977_v60  ;;  %v3128_v47 = vadd.f32 %v3127_v42, %v8081_v5  ;;  %v3481_v15 = vadd.f32 %v3480_v24, %v8083_v7  ;;  %3392 = vmatmul.mubr.bf16.gmra.mrb[52].mxu0 %v9210_v10 }
 0x425   : > { %v3130_v48 = vadd.f32 %v3129_v55, %v8089_v53  ;;  %v3483_v8 = vadd.f32 %v3482_v46, %v8091_v21  ;;  %3745 = vmatmul.mubr.bf16.gmra.mrb[52].mxu1 %v9210_v10  ;;  %3401 = vmatprep.mubr.bf16.mxu0 %v9109_v36 }
 0x426   : > { %v3982_v58 = vsel %vm3847_vm8, %v3128_v47, -inf  ;;  %v3984_v52 = vsel %vm3847_vm8, %v3481_v15, -inf  ;;  %3754 = vmatprep.mubr.bf16.mxu1 %v9109_v36 }
 0x427   : > { %v4602_v45 = vmax.f32 %v4601_v3, %v3982_v58  ;;  %v4676_v56 = vmax.f32 %v4675_v9, %v3984_v52  ;;  %v3983_v51 = vsel %vm3847_vm8, %v3130_v48, -inf  ;;  %v3985_v57 = vsel %vm3847_vm8, %v3483_v8, -inf  ;;  %v3133_v4 = vpop.f32.mrb[204].mxu0  ;;  %v3486_v42 = vpop.f32.mrb[204].mxu1 }
 0x428   : > { %v4639_v24 = vmax.f32 %v4638_v28, %v3983_v51  ;;  %v4713_v54 = vmax.f32 %v4712_v1, %v3985_v57  ;;  %v3134_v6 = vadd.f32 %v3133_v4, %v8081_v5  ;;  %v3487_v20 = vadd.f32 %v3486_v42, %v8083_v7  ;;  %v3135_v23 = vpop.f32.mrb[205].mxu0  ;;  %v3488_v55 = vpop.f32.mrb[205].mxu1 }
 0x429   : > { %v3136_v46 = vadd.f32 %v3135_v23, %v8089_v53  ;;  %v3489_v3 = vadd.f32 %v3488_v55, %v8091_v21  ;;  %v3137_v9 = vpop.f32.mrb[206].mxu0  ;;  %v3490_v25 = vpop.f32.mrb[206].mxu1 }
 0x42a   : > { %v3990_v60 = vsel %vm3848_vm9, %v3134_v6, -inf  ;;  %v3992_v47 = vsel %vm3848_vm9, %v3487_v20, -inf  ;;  %v3138_v28 = vadd.f32 %v3137_v9, %v8081_v5  ;;  %v3491_v1 = vadd.f32 %v3490_v25, %v8083_v7  ;;  %v3139_v15 = vpop.f32.mrb[207].mxu0  ;;  %v3492_v10 = vpop.f32.mrb[207].mxu1  ;;  %v9211_v6 = vld [vmem:[#allocation20_spill] sm:$0xff] }
 0x42b   : > { %v4603_v48 = vmax.f32 %v4602_v45, %v3990_v60  ;;  %v4677_v8 = vmax.f32 %v4676_v56, %v3992_v47  ;;  %v3991_v58 = vsel %vm3848_vm9, %v3136_v46, -inf  ;;  %v3993_v52 = vsel %vm3848_vm9, %v3489_v3, -inf }
 0x42c   : > { %v4640_v51 = vmax.f32 %v4639_v24, %v3991_v58  ;;  %v4714_v57 = vmax.f32 %v4713_v54, %v3993_v52  ;;  %v3998_v4 = vsel %vm3849_vm10, %v3138_v28, -inf  ;;  %v4000_v42 = vsel %vm3849_vm10, %v3491_v1, -inf  ;;  %3402 = vmatmul.mubr.bf16.gmra.mrb[56].mxu0 %v9211_v6 }
 0x42d   : > { %v4604_v20 = vmax.f32 %v4603_v48, %v3998_v4  ;;  %v4678_v23 = vmax.f32 %v4677_v8, %v4000_v42  ;;  %v3140_v45 = vadd.f32 %v3139_v15, %v8089_v53  ;;  %v3493_v56 = vadd.f32 %v3492_v10, %v8091_v21  ;;  %3755 = vmatmul.mubr.bf16.gmra.mrb[56].mxu1 %v9211_v6 }
 0x42e   : > { %3411 = vmatprep.mubr.bf16.mxu0 %v9109_v36  ;;  %3764 = vmatprep.mubr.bf16.mxu1 %v9109_v36 }
 0x42f   : > { %v3999_v24 = vsel %vm3849_vm10, %v3140_v45, -inf  ;;  %v4001_v54 = vsel %vm3849_vm10, %v3493_v56, -inf  ;;  %v3143_v55 = vpop.f32.mrb[208].mxu0  ;;  %v3496_v46 = vpop.f32.mrb[208].mxu1 }
 0x430   : > { %v4641_v3 = vmax.f32 %v4640_v51, %v3999_v24  ;;  %v4715_v9 = vmax.f32 %v4714_v57, %v4001_v54  ;;  %v3144_v25 = vadd.f32 %v3143_v55, %v8081_v5  ;;  %v3497_v60 = vadd.f32 %v3496_v46, %v8083_v7  ;;  %v3145_v47 = vpop.f32.mrb[209].mxu0  ;;  %v3498_v28 = vpop.f32.mrb[209].mxu1  ;;  %v9214_v46 = vld [vmem:[#allocation19_spill] sm:$0xff] }
 0x431   : > { %v3146_v1 = vadd.f32 %v3145_v47, %v8089_v53  ;;  %v3499_v36 = vadd.f32 %v3498_v28, %v8091_v21  ;;  %v3147_v15 = vpop.f32.mrb[210].mxu0  ;;  %v3500_v10 = vpop.f32.mrb[210].mxu1 }
 0x432   : > { %v4006_v48 = vsel %vm9087_vm11, %v3144_v25, -inf  ;;  %v4008_v8 = vsel %vm9087_vm11, %v3497_v60, -inf  ;;  %v3148_v58 = vadd.f32 %v3147_v15, %v8081_v5  ;;  %v3501_v52 = vadd.f32 %v3500_v10, %v8083_v7  ;;  %v3149_v51 = vpop.f32.mrb[211].mxu0  ;;  %v3502_v57 = vpop.f32.mrb[211].mxu1 }
 0x433   : > { %v4605_v4 = vmax.f32 %v4604_v20, %v4006_v48  ;;  %v4679_v42 = vmax.f32 %v4678_v23, %v4008_v8  ;;  %v4007_v6 = vsel %vm9087_vm11, %v3146_v1, -inf  ;;  %v4009_v45 = vsel %vm9087_vm11, %v3499_v36, -inf }
 0x434   : > { %v4642_v56 = vmax.f32 %v4641_v3, %v4007_v6  ;;  %v4716_v24 = vmax.f32 %v4715_v9, %v4009_v45  ;;  %v4014_v54 = vsel %vm9212_vm13, %v3148_v58, -inf  ;;  %v4016_v55 = vsel %vm9213_vm15, %v3501_v52, -inf  ;;  %3412 = vmatmul.mubr.bf16.gmra.mrb[60].mxu0 %v9214_v46 }
 0x435   : > { %v4606_v25 = vmax.f32 %v4605_v4, %v4014_v54  ;;  %v4680_v60 = vmax.f32 %v4679_v42, %v4016_v55  ;;  %v3150_v20 = vadd.f32 %v3149_v51, %v8089_v53  ;;  %v3503_v23 = vadd.f32 %v3502_v57, %v8091_v21  ;;  %3765 = vmatmul.mubr.bf16.gmra.mrb[60].mxu1 %v9214_v46 }
 0x436   : > { %vm9217_vm13 = vcmp.lt.s32.totalorder %v7203_v18, 500 }
 0x437   : > { %v4015_v3 = vsel %vm9215_vm12, %v3150_v20, -inf  ;;  %v4017_v9 = vsel %vm9216_vm14, %v3503_v23, -inf  ;;  %v3153_v47 = vpop.f32.mrb[212].mxu0  ;;  %v3506_v28 = vpop.f32.mrb[212].mxu1  ;;  %vm9218_vm15 = vmmov %vm9217_vm13 }
 0x438   : > { %v4643_v1 = vmax.f32 %v4642_v56, %v4015_v3  ;;  %v4717_v36 = vmax.f32 %v4716_v24, %v4017_v9  ;;  %v3154_v15 = vadd.f32 %v3153_v47, %v8081_v5  ;;  %v3507_v10 = vadd.f32 %v3506_v28, %v8083_v7  ;;  %v3155_v48 = vpop.f32.mrb[213].mxu0  ;;  %v3508_v8 = vpop.f32.mrb[213].mxu1  ;;  %vm9219_vm12 = vmmov %vm9217_vm13 }
 0x439   : > { %v3156_v58 = vadd.f32 %v3155_v48, %v8089_v53  ;;  %v3509_v52 = vadd.f32 %v3508_v8, %v8091_v21  ;;  %v3157_v51 = vpop.f32.mrb[214].mxu0  ;;  %v3510_v57 = vpop.f32.mrb[214].mxu1  ;;  %vm9220_vm14 = vmmov %vm9219_vm12 }
 0x43a   : > { %v4022_v4 = vsel %vm9217_vm13, %v3154_v15, -inf  ;;  %v4024_v42 = vsel %vm9218_vm15, %v3507_v10, -inf  ;;  %v3158_v6 = vadd.f32 %v3157_v51, %v8081_v5  ;;  %v3511_v45 = vadd.f32 %v3510_v57, %v8083_v7  ;;  %v3159_v56 = vpop.f32.mrb[215].mxu0  ;;  %v3512_v24 = vpop.f32.mrb[215].mxu1 }
 0x43b   : > { %v4607_v54 = vmax.f32 %v4606_v25, %v4022_v4  ;;  %v4681_v55 = vmax.f32 %v4680_v60, %v4024_v42  ;;  %v4023_v46 = vsel %vm9219_vm12, %v3156_v58, -inf  ;;  %v4025_v20 = vsel %vm9220_vm14, %v3509_v52, -inf }
 0x43c   : > { %v4644_v23 = vmax.f32 %v4643_v1, %v4023_v46  ;;  %v4718_v3 = vmax.f32 %v4717_v36, %v4025_v20  ;;  %vm9221_vm13 = vcmp.lt.s32.totalorder %v7206_v19, 500  ;;  %v3160_v10 = vadd.f32 %v3159_v56, %v8089_v53 }
 0x43d   : > { %v4030_v9 = vsel %vm9221_vm13, %v3158_v6, -inf  ;;  %vm9222_vm15 = vmmov %vm9221_vm13  ;;  %v3513_v25 = vadd.f32 %v3512_v24, %v8091_v21 }
 0x43e   : > { %v4032_v47 = vsel %vm9222_vm15, %v3511_v45, -inf  ;;  %v4608_v28 = vmax.f32 %v4607_v54, %v4030_v9  ;;  %vm9223_vm11 = vmmov %vm9221_vm13 }
 0x43f   : > { %v4682_v15 = vmax.f32 %v4681_v55, %v4032_v47  ;;  %v4031_v60 = vsel %vm9223_vm11, %v3160_v10, -inf  ;;  %vm9224_vm12 = vmmov %vm9223_vm11  ;;  %v3163_v1 = vpop.f32.mrb[216].mxu0  ;;  %v3516_v36 = vpop.f32.mrb[216].mxu1  ;;  %vm9225_vm11 = vcmp.lt.s32.totalorder %v7241_v37, 500 }
 0x440   : > { %v4033_v48 = vsel %vm9224_vm12, %v3513_v25, -inf  ;;  %v4645_v8 = vmax.f32 %v4644_v23, %v4031_v60  ;;  %v3164_v52 = vadd.f32 %v3163_v1, %v8081_v5  ;;  %v3517_v51 = vadd.f32 %v3516_v36, %v8083_v7  ;;  %v3165_v57 = vpop.f32.mrb[217].mxu0  ;;  %v3518_v4 = vpop.f32.mrb[217].mxu1  ;;  %vm9226_vm14 = vmmov %vm9225_vm11 }
 0x441   : > { %v4719_v58 = vmax.f32 %v4718_v3, %v4033_v48  ;;  %v3166_v42 = vadd.f32 %v3165_v57, %v8089_v53  ;;  %v3519_v6 = vadd.f32 %v3518_v4, %v8091_v21  ;;  %v3167_v45 = vpop.f32.mrb[218].mxu0  ;;  %v3520_v56 = vpop.f32.mrb[218].mxu1  ;;  %vm9227_vm13 = vmmov %vm9225_vm11  ;;  %vm9229_vm12 = vcmp.lt.s32.totalorder %v7244_v40, 500 }
 0x442   : > { %v4038_v24 = vsel %vm9225_vm11, %v3164_v52, -inf  ;;  %v4040_v54 = vsel %vm9226_vm14, %v3517_v51, -inf  ;;  %v3168_v55 = vadd.f32 %v3167_v45, %v8081_v5  ;;  %v3521_v46 = vadd.f32 %v3520_v56, %v8083_v7  ;;  %v3169_v20 = vpop.f32.mrb[219].mxu0  ;;  %v3522_v23 = vpop.f32.mrb[219].mxu1  ;;  %vm9228_vm15 = vmmov %vm9225_vm11 }
 0x443   : > { %v4609_v3 = vmax.f32 %v4608_v28, %v4038_v24  ;;  %v4683_v9 = vmax.f32 %v4682_v15, %v4040_v54  ;;  %v4039_v47 = vsel %vm9227_vm13, %v3166_v42, -inf  ;;  %v4041_v10 = vsel %vm9228_vm15, %v3519_v6, -inf  ;;  %vm9230_vm11 = vmmov %vm9229_vm12 }
 0x444   : > { %v4646_v25 = vmax.f32 %v4645_v8, %v4039_v47  ;;  %v4720_v60 = vmax.f32 %v4719_v58, %v4041_v10  ;;  %v4046_v48 = vsel %vm9229_vm12, %v3168_v55, -inf  ;;  %v4048_v1 = vsel %vm9230_vm11, %v3521_v46, -inf  ;;  %vm9231_vm14 = vmmov %vm9230_vm11 }
 0x445   : > { %v4610_v36 = vmax.f32 %v4609_v3, %v4046_v48  ;;  %v4684_v52 = vmax.f32 %v4683_v9, %v4048_v1  ;;  %v3170_v51 = vadd.f32 %v3169_v20, %v8089_v53  ;;  %v3523_v28 = vadd.f32 %v3522_v23, %v8091_v21  ;;  %vm9232_vm13 = vmmov %vm9230_vm11 }
 0x446   : > { %vm9233_vm15 = vcmp.lt.s32.totalorder %v7279_v59, 500 }
 0x447   : > { %v4047_v15 = vsel %vm9231_vm14, %v3170_v51, -inf  ;;  %v4049_v57 = vsel %vm9232_vm13, %v3523_v28, -inf  ;;  %v3173_v8 = vpop.f32.mrb[220].mxu0  ;;  %v3526_v58 = vpop.f32.mrb[220].mxu1  ;;  %vm9234_vm12 = vmmov %vm9233_vm15  ;;  %vm9237_vm13 = vcmp.lt.s32.totalorder %v9130_v39, 500 }
 0x448   : > { %v4647_v4 = vmax.f32 %v4646_v25, %v4047_v15  ;;  %v4721_v42 = vmax.f32 %v4720_v60, %v4049_v57  ;;  %v3174_v6 = vadd.f32 %v3173_v8, %v8081_v5  ;;  %v3527_v45 = vadd.f32 %v3526_v58, %v8083_v7  ;;  %v3175_v56 = vpop.f32.mrb[221].mxu0  ;;  %v3528_v24 = vpop.f32.mrb[221].mxu1  ;;  %vm9235_vm11 = vmmov %vm9234_vm12 }
 0x449   : > { %v3176_v54 = vadd.f32 %v3175_v56, %v8089_v53  ;;  %v3529_v55 = vadd.f32 %v3528_v24, %v8091_v21  ;;  %v3177_v46 = vpop.f32.mrb[222].mxu0  ;;  %v3530_v20 = vpop.f32.mrb[222].mxu1  ;;  %vm9236_vm14 = vmmov %vm9235_vm11 }
 0x44a   : > { %v4054_v23 = vsel %vm9233_vm15, %v3174_v6, -inf  ;;  %v4056_v3 = vsel %vm9234_vm12, %v3527_v45, -inf  ;;  %v3178_v9 = vadd.f32 %v3177_v46, %v8081_v5  ;;  %v3531_v47 = vadd.f32 %v3530_v20, %v8083_v7  ;;  %v3179_v10 = vpop.f32.mrb[223].mxu0  ;;  %v3532_v25 = vpop.f32.mrb[223].mxu1  ;;  %vm9238_vm15 = vmmov %vm9237_vm13 }
 0x44b   : > { %v4611_v60 = vmax.f32 %v4610_v36, %v4054_v23  ;;  %v4685_v48 = vmax.f32 %v4684_v52, %v4056_v3  ;;  %v4055_v1 = vsel %vm9235_vm11, %v3176_v54, -inf  ;;  %v4057_v51 = vsel %vm9236_vm14, %v3529_v55, -inf  ;;  %vm9239_vm12 = vmmov %vm9237_vm13 }
 0x44c   : > { %v4648_v28 = vmax.f32 %v4647_v4, %v4055_v1  ;;  %v4722_v15 = vmax.f32 %v4721_v42, %v4057_v51  ;;  %v4062_v57 = vsel %vm9237_vm13, %v3178_v9, -inf  ;;  %v4064_v8 = vsel %vm9238_vm15, %v3531_v47, -inf  ;;  %vm9240_vm11 = vmmov %vm9239_vm12 }
 0x44d   : > { %v4612_v58 = vmax.f32 %v4611_v60, %v4062_v57  ;;  %v4686_v6 = vmax.f32 %v4685_v48, %v4064_v8  ;;  %v3180_v45 = vadd.f32 %v3179_v10, %v8089_v53  ;;  %v3533_v36 = vadd.f32 %v3532_v25, %v8091_v21 }
 0x44e   : > { %vm9241_vm14 = vcmp.lt.s32.totalorder %v7317_v50, 500 }
 0x44f   : > { %v4063_v52 = vsel %vm9239_vm12, %v3180_v45, -inf  ;;  %v4065_v56 = vsel %vm9240_vm11, %v3533_v36, -inf  ;;  %v3183_v4 = vpop.f32.mrb[224].mxu0  ;;  %v3536_v42 = vpop.f32.mrb[224].mxu1  ;;  %vm9242_vm13 = vmmov %vm9241_vm14  ;;  %vm9245_vm11 = vcmp.lt.s32.totalorder %v9140_v11, 500 }
 0x450   : > { %v4649_v24 = vmax.f32 %v4648_v28, %v4063_v52  ;;  %v4723_v54 = vmax.f32 %v4722_v15, %v4065_v56  ;;  %v3184_v55 = vadd.f32 %v3183_v4, %v8081_v5  ;;  %v3537_v46 = vadd.f32 %v3536_v42, %v8083_v7  ;;  %v3185_v20 = vpop.f32.mrb[225].mxu0  ;;  %v3538_v23 = vpop.f32.mrb[225].mxu1  ;;  %vm9243_vm15 = vmmov %vm9242_vm13 }
 0x451   : > { %v3186_v3 = vadd.f32 %v3185_v20, %v8089_v53  ;;  %v3539_v9 = vadd.f32 %v3538_v23, %v8091_v21  ;;  %v3187_v47 = vpop.f32.mrb[226].mxu0  ;;  %v3540_v10 = vpop.f32.mrb[226].mxu1  ;;  %vm9244_vm12 = vmmov %vm9242_vm13 }
 0x452   : > { %v4070_v25 = vsel %vm9241_vm14, %v3184_v55, -inf  ;;  %v4072_v60 = vsel %vm9242_vm13, %v3537_v46, -inf  ;;  %v3188_v48 = vadd.f32 %v3187_v47, %v8081_v5  ;;  %v3541_v1 = vadd.f32 %v3540_v10, %v8083_v7  ;;  %v3189_v51 = vpop.f32.mrb[227].mxu0  ;;  %v3542_v28 = vpop.f32.mrb[227].mxu1  ;;  %vm9246_vm14 = vmmov %vm9245_vm11 }
 0x453   : > { %v4613_v15 = vmax.f32 %v4612_v58, %v4070_v25  ;;  %v4687_v57 = vmax.f32 %v4686_v6, %v4072_v60  ;;  %v4071_v8 = vsel %vm9243_vm15, %v3186_v3, -inf  ;;  %v4073_v45 = vsel %vm9244_vm12, %v3539_v9, -inf  ;;  %vm9247_vm13 = vmmov %vm9245_vm11 }
 0x454   : > { %v4650_v36 = vmax.f32 %v4649_v24, %v4071_v8  ;;  %v4724_v52 = vmax.f32 %v4723_v54, %v4073_v45  ;;  %v4078_v56 = vsel %vm9245_vm11, %v3188_v48, -inf  ;;  %v4080_v4 = vsel %vm9246_vm14, %v3541_v1, -inf  ;;  %vm9248_vm15 = vmmov %vm9245_vm11 }
 0x455   : > { %v4614_v42 = vmax.f32 %v4613_v15, %v4078_v56  ;;  %v4688_v55 = vmax.f32 %v4687_v57, %v4080_v4  ;;  %v3190_v46 = vadd.f32 %v3189_v51, %v8089_v53  ;;  %v3543_v58 = vadd.f32 %v3542_v28, %v8091_v21 }
 0x456   : > { %vm9249_vm12 = vcmp.lt.s32.totalorder %v7355_v33, 500 }
 0x457   : > { %v4079_v6 = vsel %vm9247_vm13, %v3190_v46, -inf  ;;  %v4081_v20 = vsel %vm9248_vm15, %v3543_v58, -inf  ;;  %v3193_v24 = vpop.f32.mrb[228].mxu0  ;;  %v3546_v54 = vpop.f32.mrb[228].mxu1  ;;  %vm9250_vm11 = vmmov %vm9249_vm12  ;;  %vm9253_vm15 = vcmp.lt.s32.totalorder %v9150_v2, 500 }
 0x458   : > { %v4651_v23 = vmax.f32 %v4650_v36, %v4079_v6  ;;  %v4725_v3 = vmax.f32 %v4724_v52, %v4081_v20  ;;  %v3194_v9 = vadd.f32 %v3193_v24, %v8081_v5  ;;  %v3547_v47 = vadd.f32 %v3546_v54, %v8083_v7  ;;  %v3195_v10 = vpop.f32.mrb[229].mxu0  ;;  %v3548_v25 = vpop.f32.mrb[229].mxu1  ;;  %vm9251_vm14 = vmmov %vm9250_vm11 }
 0x459   : > { %v3196_v60 = vadd.f32 %v3195_v10, %v8089_v53  ;;  %v3549_v48 = vadd.f32 %v3548_v25, %v8091_v21  ;;  %v3197_v1 = vpop.f32.mrb[230].mxu0  ;;  %v3550_v51 = vpop.f32.mrb[230].mxu1  ;;  %vm9252_vm13 = vmmov %vm9250_vm11 }
 0x45a   : > { %v4086_v28 = vsel %vm9249_vm12, %v3194_v9, -inf  ;;  %v4088_v15 = vsel %vm9250_vm11, %v3547_v47, -inf  ;;  %v3198_v57 = vadd.f32 %v3197_v1, %v8081_v5  ;;  %v3551_v8 = vadd.f32 %v3550_v51, %v8083_v7  ;;  %v3199_v45 = vpop.f32.mrb[231].mxu0  ;;  %v3552_v36 = vpop.f32.mrb[231].mxu1  ;;  %vm9254_vm12 = vmmov %vm9253_vm15 }
 0x45b   : > { %v4615_v52 = vmax.f32 %v4614_v42, %v4086_v28  ;;  %v4689_v56 = vmax.f32 %v4688_v55, %v4088_v15  ;;  %v4087_v4 = vsel %vm9251_vm14, %v3196_v60, -inf  ;;  %v4089_v46 = vsel %vm9252_vm13, %v3549_v48, -inf  ;;  %vm9255_vm11 = vmmov %vm9254_vm12 }
 0x45c   : > { %v4652_v58 = vmax.f32 %v4651_v23, %v4087_v4  ;;  %v4726_v6 = vmax.f32 %v4725_v3, %v4089_v46  ;;  %v4094_v20 = vsel %vm9253_vm15, %v3198_v57, -inf  ;;  %v4096_v24 = vsel %vm9254_vm12, %v3551_v8, -inf  ;;  %vm9256_vm14 = vmmov %vm9255_vm11 }
 0x45d   : > { %v4616_v54 = vmax.f32 %v4615_v52, %v4094_v20  ;;  %v4690_v9 = vmax.f32 %v4689_v56, %v4096_v24  ;;  %v3200_v47 = vadd.f32 %v3199_v45, %v8089_v53  ;;  %v3553_v42 = vadd.f32 %v3552_v36, %v8091_v21 }
 0x45e   : > { %vm9257_vm13 = vcmp.lt.s32.totalorder %v7393_v41, 500 }
 0x45f   : > { %v4095_v55 = vsel %vm9255_vm11, %v3200_v47, -inf  ;;  %v4097_v10 = vsel %vm9256_vm14, %v3553_v42, -inf  ;;  %v3203_v23 = vpop.f32.mrb[232].mxu0  ;;  %v3556_v3 = vpop.f32.mrb[232].mxu1  ;;  %vm9258_vm15 = vmmov %vm9257_vm13  ;;  %vm9261_vm14 = vcmp.lt.s32.totalorder %v9160_v32, 500 }
 0x460   : > { %v4653_v25 = vmax.f32 %v4652_v58, %v4095_v55  ;;  %v4727_v60 = vmax.f32 %v4726_v6, %v4097_v10  ;;  %v3204_v48 = vadd.f32 %v3203_v23, %v8081_v5  ;;  %v3557_v1 = vadd.f32 %v3556_v3, %v8083_v7  ;;  %v3205_v51 = vpop.f32.mrb[233].mxu0  ;;  %v3558_v28 = vpop.f32.mrb[233].mxu1  ;;  %vm9259_vm12 = vmmov %vm9257_vm13 }
 0x461   : > { %v3206_v15 = vadd.f32 %v3205_v51, %v8089_v53  ;;  %v3559_v57 = vadd.f32 %v3558_v28, %v8091_v21  ;;  %v3207_v8 = vpop.f32.mrb[234].mxu0  ;;  %v3560_v45 = vpop.f32.mrb[234].mxu1  ;;  %vm9260_vm11 = vmmov %vm9259_vm12 }
 0x462   : > { %v4102_v36 = vsel %vm9257_vm13, %v3204_v48, -inf  ;;  %v4104_v52 = vsel %vm9258_vm15, %v3557_v1, -inf  ;;  %v3208_v56 = vadd.f32 %v3207_v8, %v8081_v5  ;;  %v3561_v4 = vadd.f32 %v3560_v45, %v8083_v7  ;;  %v3209_v46 = vpop.f32.mrb[235].mxu0  ;;  %v3562_v58 = vpop.f32.mrb[235].mxu1  ;;  %vm9262_vm13 = vmmov %vm9261_vm14 }
 0x463   : > { %v4617_v6 = vmax.f32 %v4616_v54, %v4102_v36  ;;  %v4691_v20 = vmax.f32 %v4690_v9, %v4104_v52  ;;  %v4103_v24 = vsel %vm9259_vm12, %v3206_v15, -inf  ;;  %v4105_v47 = vsel %vm9260_vm11, %v3559_v57, -inf  ;;  %vm9263_vm15 = vmmov %vm9262_vm13 }
 0x464   : > { %v4654_v42 = vmax.f32 %v4653_v25, %v4103_v24  ;;  %v4728_v55 = vmax.f32 %v4727_v60, %v4105_v47  ;;  %v4110_v10 = vsel %vm9261_vm14, %v3208_v56, -inf  ;;  %v4112_v23 = vsel %vm9262_vm13, %v3561_v4, -inf  ;;  %vm9264_vm12 = vmmov %vm9262_vm13 }
 0x465   : > { %v4618_v3 = vmax.f32 %v4617_v6, %v4110_v10  ;;  %v4692_v48 = vmax.f32 %v4691_v20, %v4112_v23  ;;  %v3210_v1 = vadd.f32 %v3209_v46, %v8089_v53  ;;  %v3563_v54 = vadd.f32 %v3562_v58, %v8091_v21 }
 0x466   : > { %vm9265_vm11 = vcmp.lt.s32.totalorder %v7431_v13, 500 }
 0x467   : > { %v4111_v9 = vsel %vm9263_vm15, %v3210_v1, -inf  ;;  %v4113_v51 = vsel %vm9264_vm12, %v3563_v54, -inf  ;;  %v3213_v25 = vpop.f32.mrb[236].mxu0  ;;  %vm9266_vm14 = vmmov %vm9265_vm11  ;;  %vm9269_vm12 = vcmp.lt.s32.totalorder %v9170_v43, 500 }
 0x468   : > { %v4655_v60 = vmax.f32 %v4654_v42, %v4111_v9  ;;  %v4729_v28 = vmax.f32 %v4728_v55, %v4113_v51  ;;  %v3214_v15 = vadd.f32 %v3213_v25, %v8081_v5  ;;  %v3566_v57 = vpop.f32.mrb[236].mxu1  ;;  %v3215_v8 = vpop.f32.mrb[237].mxu0  ;;  %vm9267_vm13 = vmmov %vm9265_vm11 }
 0x469   : > { %v3567_v45 = vadd.f32 %v3566_v57, %v8083_v7  ;;  %v3216_v36 = vadd.f32 %v3215_v8, %v8089_v53  ;;  %v3568_v52 = vpop.f32.mrb[237].mxu1  ;;  %v3217_v56 = vpop.f32.mrb[238].mxu0  ;;  %vm9268_vm15 = vmmov %vm9265_vm11 }
 0x46a   : > { %v4118_v4 = vsel %vm9265_vm11, %v3214_v15, -inf  ;;  %v3569_v46 = vadd.f32 %v3568_v52, %v8091_v21  ;;  %v3218_v58 = vadd.f32 %v3217_v56, %v8081_v5  ;;  %v3570_v6 = vpop.f32.mrb[238].mxu1  ;;  %v3219_v20 = vpop.f32.mrb[239].mxu0  ;;  %vm9270_vm11 = vmmov %vm9269_vm12 }
 0x46b   : > { %v4619_v24 = vmax.f32 %v4618_v3, %v4118_v4  ;;  %v4120_v47 = vsel %vm9266_vm14, %v3567_v45, -inf  ;;  %v4119_v42 = vsel %vm9267_vm13, %v3216_v36, -inf  ;;  %v3571_v55 = vadd.f32 %v3570_v6, %v8083_v7  ;;  %v3572_v10 = vpop.f32.mrb[239].mxu1  ;;  %vm9271_vm14 = vmmov %vm9270_vm11 }
 0x46c   : > { %v4693_v23 = vmax.f32 %v4692_v48, %v4120_v47  ;;  %v4656_v1 = vmax.f32 %v4655_v60, %v4119_v42  ;;  %v4121_v54 = vsel %vm9268_vm15, %v3569_v46, -inf  ;;  %v4126_v9 = vsel %vm9269_vm12, %v3218_v58, -inf  ;;  %vm9272_vm13 = vmmov %vm9270_vm11 }
 0x46d   : > { %v4730_v51 = vmax.f32 %v4729_v28, %v4121_v54  ;;  %v4620_v25 = vmax.f32 %v4619_v24, %v4126_v9  ;;  %v4128_v3 = vsel %vm9270_vm11, %v3571_v55, -inf  ;;  %v3220_v15 = vadd.f32 %v3219_v20, %v8089_v53 }
 0x46e   : > { %v4694_v57 = vmax.f32 %v4693_v23, %v4128_v3  ;;  %v3573_v8 = vadd.f32 %v3572_v10, %v8091_v21  ;;  %vm9273_vm15 = vcmp.lt.s32.totalorder %v7469_v14, 500 }
 0x46f   : > { %v4127_v48 = vsel %vm9271_vm14, %v3220_v15, -inf  ;;  %v3223_v60 = vpop.f32.mrb[240].mxu0  ;;  %vm9274_vm12 = vmmov %vm9273_vm15 }
 0x470   : > { %v4657_v45 = vmax.f32 %v4656_v1, %v4127_v48  ;;  %v4129_v36 = vsel %vm9272_vm13, %v3573_v8, -inf  ;;  %v3224_v52 = vadd.f32 %v3223_v60, %v8081_v5  ;;  %v3576_v28 = vpop.f32.mrb[240].mxu1  ;;  %v3225_v56 = vpop.f32.mrb[241].mxu0  ;;  %vm9275_vm11 = vmmov %vm9274_vm12  ;;  %vm9277_vm13 = vcmp.lt.s32.totalorder %v7472_v12, 500 }
 0x471   : > { %v4731_v4 = vmax.f32 %v4730_v51, %v4129_v36  ;;  %v3577_v46 = vadd.f32 %v3576_v28, %v8083_v7  ;;  %v3226_v58 = vadd.f32 %v3225_v56, %v8089_v53  ;;  %v3578_v6 = vpop.f32.mrb[241].mxu1  ;;  %v3227_v20 = vpop.f32.mrb[242].mxu0  ;;  %vm9276_vm14 = vmmov %vm9275_vm11 }
 0x472   : > { %v4134_v24 = vsel %vm9273_vm15, %v3224_v52, -inf  ;;  %v3579_v47 = vadd.f32 %v3578_v6, %v8091_v21  ;;  %v3228_v42 = vadd.f32 %v3227_v20, %v8081_v5  ;;  %v3580_v55 = vpop.f32.mrb[242].mxu1  ;;  %v3229_v10 = vpop.f32.mrb[243].mxu0  ;;  %vm9278_vm15 = vmmov %vm9277_vm13 }
 0x473   : > { %v4621_v23 = vmax.f32 %v4620_v25, %v4134_v24  ;;  %v4136_v1 = vsel %vm9274_vm12, %v3577_v46, -inf  ;;  %v4135_v54 = vsel %vm9275_vm11, %v3226_v58, -inf  ;;  %v3581_v9 = vadd.f32 %v3580_v55, %v8083_v7  ;;  %v3582_v51 = vpop.f32.mrb[243].mxu1  ;;  %vm9279_vm12 = vmmov %vm9277_vm13 }
 0x474   : > { %v4695_v3 = vmax.f32 %v4694_v57, %v4136_v1  ;;  %v4658_v15 = vmax.f32 %v4657_v45, %v4135_v54  ;;  %v4137_v8 = vsel %vm9276_vm14, %v3579_v47, -inf  ;;  %v4142_v48 = vsel %vm9277_vm13, %v3228_v42, -inf  ;;  %vm9280_vm11 = vmmov %vm9279_vm12 }
 0x475   : > { %v4732_v60 = vmax.f32 %v4731_v4, %v4137_v8  ;;  %v4622_v36 = vmax.f32 %v4621_v23, %v4142_v48  ;;  %v4144_v25 = vsel %vm9278_vm15, %v3581_v9, -inf  ;;  %v3230_v52 = vadd.f32 %v3229_v10, %v8089_v53 }
 0x476   : > { %v4696_v28 = vmax.f32 %v4695_v3, %v4144_v25  ;;  %v3583_v56 = vadd.f32 %v3582_v51, %v8091_v21  ;;  %vm9281_vm14 = vcmp.lt.s32.totalorder %v7507_v22, 500 }
 0x477   : > { %v4143_v57 = vsel %vm9279_vm12, %v3230_v52, -inf  ;;  %v3233_v45 = vpop.f32.mrb[244].mxu0  ;;  %vm9282_vm13 = vmmov %vm9281_vm14 }
 0x478   : > { %v4659_v46 = vmax.f32 %v4658_v15, %v4143_v57  ;;  %v4145_v58 = vsel %vm9280_vm11, %v3583_v56, -inf  ;;  %v3234_v6 = vadd.f32 %v3233_v45, %v8081_v5  ;;  %v3586_v4 = vpop.f32.mrb[244].mxu1  ;;  %v3235_v20 = vpop.f32.mrb[245].mxu0  ;;  %vm9283_vm15 = vmmov %vm9282_vm13  ;;  %vm9285_vm11 = vcmp.lt.s32.totalorder %v7510_v38, 500 }
 0x479   : > { %v4733_v24 = vmax.f32 %v4732_v60, %v4145_v58  ;;  %v3587_v47 = vadd.f32 %v3586_v4, %v8083_v7  ;;  %v3236_v42 = vadd.f32 %v3235_v20, %v8089_v53  ;;  %v3588_v55 = vpop.f32.mrb[245].mxu1  ;;  %v3237_v10 = vpop.f32.mrb[246].mxu0  ;;  %vm9284_vm12 = vmmov %vm9282_vm13 }
 0x47a   : > { %v4150_v23 = vsel %vm9281_vm14, %v3234_v6, -inf  ;;  %v3589_v1 = vadd.f32 %v3588_v55, %v8091_v21  ;;  %v3238_v54 = vadd.f32 %v3237_v10, %v8081_v5  ;;  %v3590_v9 = vpop.f32.mrb[246].mxu1  ;;  %v3239_v51 = vpop.f32.mrb[247].mxu0  ;;  %vm9286_vm14 = vmmov %vm9285_vm11 }
 0x47b   : > { %v4623_v3 = vmax.f32 %v4622_v36, %v4150_v23  ;;  %v4152_v15 = vsel %vm9282_vm13, %v3587_v47, -inf  ;;  %v4151_v8 = vsel %vm9283_vm15, %v3236_v42, -inf  ;;  %v3591_v48 = vadd.f32 %v3590_v9, %v8083_v7  ;;  %v3592_v60 = vpop.f32.mrb[247].mxu1  ;;  %vm9287_vm13 = vmmov %vm9285_vm11 }
 0x47c   : > { %v4697_v25 = vmax.f32 %v4696_v28, %v4152_v15  ;;  %v4660_v52 = vmax.f32 %v4659_v46, %v4151_v8  ;;  %v4153_v56 = vsel %vm9284_vm12, %v3589_v1, -inf  ;;  %v4158_v57 = vsel %vm9285_vm11, %v3238_v54, -inf  ;;  %vm9288_vm15 = vmmov %vm9285_vm11 }
 0x47d   : > { %v4734_v45 = vmax.f32 %v4733_v24, %v4153_v56  ;;  %v4624_v58 = vmax.f32 %v4623_v3, %v4158_v57  ;;  %v4160_v36 = vsel %vm9286_vm14, %v3591_v48, -inf  ;;  %v3240_v6 = vadd.f32 %v3239_v51, %v8089_v53 }
 0x47e   : > { %v4698_v4 = vmax.f32 %v4697_v25, %v4160_v36  ;;  %v3593_v20 = vadd.f32 %v3592_v60, %v8091_v21  ;;  %vm9289_vm12 = vcmp.lt.s32.totalorder %v7545_v44, 500 }
 0x47f   : > { %v4159_v28 = vsel %vm9287_vm13, %v3240_v6, -inf  ;;  %v3243_v46 = vpop.f32.mrb[248].mxu0  ;;  %vm9290_vm11 = vmmov %vm9289_vm12 }
 0x480   : > { %v4661_v47 = vmax.f32 %v4660_v52, %v4159_v28  ;;  %v4161_v42 = vsel %vm9288_vm15, %v3593_v20, -inf  ;;  %v3244_v55 = vadd.f32 %v3243_v46, %v8081_v5  ;;  %v3596_v24 = vpop.f32.mrb[248].mxu1  ;;  %v3245_v10 = vpop.f32.mrb[249].mxu0  ;;  %vm9291_vm14 = vmmov %vm9290_vm11  ;;  %vm9304_vm15 = vcmp.lt.s32.totalorder %v7203_v18, 500 }
 0x481   : > { %v4735_v23 = vmax.f32 %v4734_v45, %v4161_v42  ;;  %v3597_v1 = vadd.f32 %v3596_v24, %v8083_v7  ;;  %v3246_v54 = vadd.f32 %v3245_v10, %v8089_v53  ;;  %v3598_v9 = vpop.f32.mrb[249].mxu1  ;;  %v3247_v51 = vpop.f32.mrb[250].mxu0  ;;  %vm9292_vm13 = vmmov %vm9290_vm11 }
 0x482   : > { %v4166_v3 = vsel %vm9289_vm12, %v3244_v55, -inf  ;;  %v3599_v15 = vadd.f32 %v3598_v9, %v8091_v21  ;;  %v3248_v8 = vadd.f32 %v3247_v51, %v8081_v5  ;;  %v3600_v48 = vpop.f32.mrb[250].mxu1  ;;  %v3249_v60 = vpop.f32.mrb[251].mxu0  ;;  %vm9305_vm12 = vmmov %vm9304_vm15 }
 0x483   : > { %v4625_v25 = vmax.f32 %v4624_v58, %v4166_v3  ;;  %v4168_v52 = vsel %vm9290_vm11, %v3597_v1, -inf  ;;  %v4167_v56 = vsel %vm9291_vm14, %v3246_v54, -inf  ;;  %v3601_v57 = vadd.f32 %v3600_v48, %v8083_v7  ;;  %v3602_v45 = vpop.f32.mrb[251].mxu1  ;;  %vm9306_vm11 = vmmov %vm9305_vm12 }
 0x484   : > { %v4699_v36 = vmax.f32 %v4698_v4, %v4168_v52  ;;  %v4662_v6 = vmax.f32 %v4661_v47, %v4167_v56  ;;  %v4169_v20 = vsel %vm9292_vm13, %v3599_v15, -inf  ;;  %v4174_v28 = vsel %vm3871_vm0, %v3248_v8, -inf  ;;  %vm9307_vm14 = vmmov %vm9306_vm11 }
 0x485   : > { %v4736_v46 = vmax.f32 %v4735_v23, %v4169_v20  ;;  %v4626_v42 = vmax.f32 %v4625_v25, %v4174_v28  ;;  %v4176_v58 = vsel %vm3871_vm0, %v3601_v57, -inf  ;;  %v3250_v55 = vadd.f32 %v3249_v60, %v8089_v53 }
 0x486   : > { %v4700_v24 = vmax.f32 %v4699_v36, %v4176_v58  ;;  %v3603_v10 = vadd.f32 %v3602_v45, %v8091_v21  ;;  %vm9308_vm13 = vcmp.lt.s32.totalorder %v7206_v19, 500 }
 0x487   : > { %v4175_v4 = vsel %vm3871_vm0, %v3250_v55, -inf  ;;  %v3253_v47 = vpop.f32.mrb[252].mxu0 }
 0x488   : > { %v4663_v1 = vmax.f32 %v4662_v6, %v4175_v4  ;;  %v4177_v54 = vsel %vm3871_vm0, %v3603_v10, -inf  ;;  %v3254_v9 = vadd.f32 %v3253_v47, %v8081_v5  ;;  %v3606_v23 = vpop.f32.mrb[252].mxu1  ;;  %v3255_v51 = vpop.f32.mrb[253].mxu0 }
 0x489   : > { %v4737_v3 = vmax.f32 %v4736_v46, %v4177_v54  ;;  %v3607_v15 = vadd.f32 %v3606_v23, %v8083_v7  ;;  %v3256_v8 = vadd.f32 %v3255_v51, %v8089_v53  ;;  %v3608_v48 = vpop.f32.mrb[253].mxu1  ;;  %v3257_v60 = vpop.f32.mrb[254].mxu0 }
 0x48a   : > { %v4182_v52 = vsel %vm3872_vm1, %v3254_v9, -inf  ;;  %v3609_v56 = vadd.f32 %v3608_v48, %v8091_v21  ;;  %v3258_v57 = vadd.f32 %v3257_v60, %v8081_v5  ;;  %v3610_v45 = vpop.f32.mrb[254].mxu1  ;;  %v3259_v36 = vpop.f32.mrb[255].mxu0 }
 0x48b   : > { %v4627_v6 = vmax.f32 %v4626_v42, %v4182_v52  ;;  %v4184_v20 = vsel %vm3872_vm1, %v3607_v15, -inf  ;;  %v4183_v28 = vsel %vm3872_vm1, %v3256_v8, -inf  ;;  %v3611_v46 = vadd.f32 %v3610_v45, %v8083_v7  ;;  %v3612_v58 = vpop.f32.mrb[255].mxu1 }
 0x48c   : > { %v4701_v55 = vmax.f32 %v4700_v24, %v4184_v20  ;;  %v4664_v10 = vmax.f32 %v4663_v1, %v4183_v28  ;;  %v4185_v4 = vsel %vm3872_vm1, %v3609_v56, -inf  ;;  %v4190_v54 = vsel %vm3873_vm2, %v3258_v57, -inf }
 0x48d   : > { %v4738_v9 = vmax.f32 %v4737_v3, %v4185_v4  ;;  %v4628_v23 = vmax.f32 %v4627_v6, %v4190_v54  ;;  %v4192_v42 = vsel %vm3873_vm2, %v3611_v46, -inf  ;;  %v3260_v51 = vadd.f32 %v3259_v36, %v8089_v53 }
 0x48e   : > { %v4702_v15 = vmax.f32 %v4701_v55, %v4192_v42  ;;  %v3613_v8 = vadd.f32 %v3612_v58, %v8091_v21 }
 0x48f   : > { %v4629_v48 = vrot.slane %v4628_v23, 4  ;;  %v4191_v24 = vsel %vm3873_vm2, %v3260_v51, -inf  ;;  %v3263_v1 = vpop.f32.mrb[0].mxu0 }
 0x490   : > { %v4703_v60 = vrot.slane %v4702_v15, 4  ;;  %v4665_v52 = vmax.f32 %v4664_v10, %v4191_v24  ;;  %v4193_v56 = vsel %vm3873_vm2, %v3613_v8, -inf  ;;  %v3264_v3 = vadd.f32 %v3263_v1, %v8081_v5  ;;  %v3616_v57 = vpop.f32.mrb[0].mxu1  ;;  %v3265_v45 = vpop.f32.mrb[1].mxu0 }
 0x491   : > { %v4630_v6 = vmax.f32 %v4628_v23, %v4629_v48  ;;  %v4739_v20 = vmax.f32 %v4738_v9, %v4193_v56  ;;  %v3617_v36 = vadd.f32 %v3616_v57, %v8083_v7  ;;  %v3266_v28 = vadd.f32 %v3265_v45, %v8089_v53  ;;  %v3618_v46 = vpop.f32.mrb[1].mxu1  ;;  %v3267_v58 = vpop.f32.mrb[2].mxu0 }
 0x492   : > { %v4704_v55 = vmax.f32 %v4702_v15, %v4703_v60  ;;  %v4666_v4 = vrot.slane %v4665_v52, 4  ;;  %v4198_v10 = vsel %vm3842_vm3, %v3264_v3, -inf  ;;  %v3619_v42 = vadd.f32 %v3618_v46, %v8091_v21  ;;  %v3620_v51 = vpop.f32.mrb[2].mxu1  ;;  %v3269_v8 = vpop.f32.mrb[3].mxu0 }
 0x493   : > { %v4631_v24 = vrot.slane %v4630_v6, 2  ;;  %v4740_v1 = vrot.slane %v4739_v20, 4  ;;  %v4200_v9 = vsel %vm3842_vm3, %v3617_v36, -inf  ;;  %v4199_v23 = vsel %vm3842_vm3, %v3266_v28, -inf  ;;  %v3622_v48 = vpop.f32.mrb[3].mxu1 }
 0x494   : > { %v4705_v56 = vrot.slane %v4704_v55, 2  ;;  %v4667_v57 = vmax.f32 %v4665_v52, %v4666_v4  ;;  %v4201_v15 = vsel %vm3842_vm3, %v3619_v42, -inf  ;;  %v3268_v60 = vadd.f32 %v3267_v58, %v8081_v5 }
 0x495   : > { %v4632_v3 = vmax.f32 %v4630_v6, %v4631_v24  ;;  %v4741_v45 = vmax.f32 %v4739_v20, %v4740_v1  ;;  %v3621_v46 = vadd.f32 %v3620_v51, %v8083_v7  ;;  %v3270_v29 = vadd.f32 %v3269_v8, %v8089_v53 }
 0x496   : > { %v4706_v30 = vmax.f32 %v4704_v55, %v4705_v56  ;;  %v4668_v31 = vrot.slane %v4667_v57, 2  ;;  %v4206_v36 = vsel %vm3843_vm4, %v3268_v60, -inf  ;;  %v3623_v28 = vadd.f32 %v3622_v48, %v8091_v21 }
 0x497   : > { %v4633_v26 = vrot.slane %v4632_v3, 1  ;;  %v4742_v52 = vrot.slane %v4741_v45, 2  ;;  %v4894_v4 = vmax.f32 %v4198_v10, %v4206_v36  ;;  %v4208_v54 = vsel %vm3843_vm4, %v3621_v46, -inf  ;;  %v3273_v58 = vpop.f32.mrb[4].mxu0 }
 0x498   : > { %v4707_v6 = vrot.slane %v4706_v30, 1  ;;  %v4669_v20 = vmax.f32 %v4667_v57, %v4668_v31  ;;  %v4968_v42 = vmax.f32 %v4200_v9, %v4208_v54  ;;  %v4207_v51 = vsel %vm3843_vm4, %v3270_v29, -inf  ;;  %v3626_v55 = vpop.f32.mrb[4].mxu1  ;;  %v3275_v8 = vpop.f32.mrb[5].mxu0 }
 0x499   : > { %v8549_v24 = vmax.f32 %v4632_v3, %v4633_v26  ;;  %v4743_v1 = vmax.f32 %v4741_v45, %v4742_v52  ;;  %v4931_v56 = vmax.f32 %v4199_v23, %v4207_v51  ;;  %v4209_v48 = vsel %vm3843_vm4, %v3623_v28, -inf  ;;  %v3628_v10 = vpop.f32.mrb[5].mxu1  ;;  %v3277_v60 = vpop.f32.mrb[6].mxu0 }
 0x49a   : > { %v8553_v36 = vmax.f32 %v4706_v30, %v4707_v6  ;;  %v4670_v46 = vrot.slane %v4669_v20, 1  ;;  %v5005_v47 = vmax.f32 %v4201_v15, %v4209_v48  ;;  %v3274_v31 = vadd.f32 %v3273_v58, %v8081_v5  ;;  %v3630_v9 = vpop.f32.mrb[6].mxu1  ;;  %v3279_v57 = vpop.f32.mrb[7].mxu0 }
 0x49b   : > { %v4744_v29 = vrot.slane %v4743_v1, 1  ;;  %v3627_v54 = vadd.f32 %v3626_v55, %v8083_v7  ;;  %v3276_v26 = vadd.f32 %v3275_v8, %v8089_v53  ;;  %v3629_v23 = vadd.f32 %v3628_v10, %v8091_v21  ;;  %v3632_v3 = vpop.f32.mrb[7].mxu1 }
 0x49c   : > { %v8559_v27 = vmax.f32 %v4669_v20, %v4670_v46  ;;  %v4214_v30 = vsel %vm3844_vm5, %v3274_v31, -inf  ;;  %v3278_v45 = vadd.f32 %v3277_v60, %v8081_v5  ;;  %v3631_v15 = vadd.f32 %v3630_v9, %v8083_v7 }
 0x49d   : > { %v8565_v28 = vmax.f32 %v4743_v1, %v4744_v29  ;;  %v4895_v52 = vmax.f32 %v4894_v4, %v4214_v30  ;;  %v4216_v58 = vsel %vm3844_vm5, %v3627_v54, -inf  ;;  %v4215_v6 = vsel %vm3844_vm5, %v3276_v26, -inf }
 0x49e   : > { %v4969_v51 = vmax.f32 %v4968_v42, %v4216_v58  ;;  %v4932_v55 = vmax.f32 %v4931_v56, %v4215_v6  ;;  %v4217_v20 = vsel %vm3844_vm5, %v3629_v23, -inf  ;;  %v4222_v8 = vsel %vm3845_vm6, %v3278_v45, -inf }
 0x49f   : > { %v5006_v48 = vmax.f32 %v5005_v47, %v4217_v20  ;;  %v4896_v10 = vmax.f32 %v4895_v52, %v4222_v8  ;;  %v4224_v1 = vsel %vm3845_vm6, %v3631_v15, -inf  ;;  %v3280_v4 = vadd.f32 %v3279_v57, %v8089_v53  ;;  %v3283_v60 = vpop.f32.mrb[8].mxu0 }
 0x4a0   : > { %v4970_v46 = vmax.f32 %v4969_v51, %v4224_v1  ;;  %v3633_v31 = vadd.f32 %v3632_v3, %v8091_v21  ;;  %v3284_v42 = vadd.f32 %v3283_v60, %v8081_v5  ;;  %v3636_v56 = vpop.f32.mrb[8].mxu1  ;;  %v3285_v9 = vpop.f32.mrb[9].mxu0  ;;  %vm9296_vm3 = vcmp.lt.s32.totalorder %v7165_v35, 500 }
 0x4a1   : > { %v4223_v63 = vsel %vm3845_vm6, %v3280_v4, -inf  ;;  %v3637_v29 = vadd.f32 %v3636_v56, %v8083_v7  ;;  %v3286_v47 = vadd.f32 %v3285_v9, %v8089_v53  ;;  %v3638_v54 = vpop.f32.mrb[9].mxu1  ;;  %v3287_v26 = vpop.f32.mrb[10].mxu0  ;;  %vm9297_vm4 = vmmov %vm9296_vm3 }
 0x4a2   : > { %v4933_v23 = vmax.f32 %v4932_v55, %v4223_v63  ;;  %v4225_v57 = vsel %vm3845_vm6, %v3633_v31, -inf  ;;  %v4230_v3 = vsel %vm3846_vm7, %v3284_v42, -inf  ;;  %v3639_v30 = vadd.f32 %v3638_v54, %v8091_v21  ;;  %v3640_v45 = vpop.f32.mrb[10].mxu1  ;;  %v3289_v15 = vpop.f32.mrb[11].mxu0  ;;  %vm9298_vm5 = vmmov %vm9296_vm3 }
 0x4a3   : > { %v5007_v52 = vmax.f32 %v5006_v48, %v4225_v57  ;;  %v4897_v58 = vmax.f32 %v4896_v10, %v4230_v3  ;;  %v4232_v6 = vsel %vm3846_vm7, %v3637_v29, -inf  ;;  %v4231_v51 = vsel %vm3846_vm7, %v3286_v47, -inf  ;;  %v3642_v20 = vpop.f32.mrb[11].mxu1  ;;  %vm9299_vm6 = vmmov %vm9296_vm3 }
 0x4a4   : > { %v4971_v55 = vmax.f32 %v4970_v46, %v4232_v6  ;;  %v4934_v8 = vmax.f32 %v4933_v23, %v4231_v51  ;;  %v4233_v0 = vsel %vm3846_vm7, %v3639_v30, -inf  ;;  %v3288_v1 = vadd.f32 %v3287_v26, %v8081_v5 }
 0x4a5   : > { %v5008_v4 = vmax.f32 %v5007_v52, %v4233_v0  ;;  %v3641_v60 = vadd.f32 %v3640_v45, %v8083_v7  ;;  %v3290_v48 = vadd.f32 %v3289_v15, %v8089_v53  ;;  %v3643_v10 = vadd.f32 %v3642_v20, %v8091_v21 }
 0x4a6   : > { %v4238_v31 = vsel %vm3847_vm8, %v3288_v1, -inf  ;;  %vm9300_vm7 = vcmp.lt.s32.totalorder %v7168_v49, 500 }
 0x4a7   : > { %v4898_v42 = vmax.f32 %v4897_v58, %v4238_v31  ;;  %v4240_v46 = vsel %vm3847_vm8, %v3641_v60, -inf  ;;  %v4239_v16 = vsel %vm3847_vm8, %v3290_v48, -inf  ;;  %v4241_v56 = vsel %vm3847_vm8, %v3643_v10, -inf  ;;  %v3293_v9 = vpop.f32.mrb[12].mxu0  ;;  %vm9301_vm8 = vmmov %vm9300_vm7 }
 0x4a8   : > { %v4972_v63 = vmax.f32 %v4971_v55, %v4240_v46  ;;  %v4935_v29 = vmax.f32 %v4934_v8, %v4239_v16  ;;  %v5009_v47 = vmax.f32 %v5008_v4, %v4241_v56  ;;  %v3294_v54 = vadd.f32 %v3293_v9, %v8081_v5  ;;  %v3646_v26 = vpop.f32.mrb[12].mxu1  ;;  %v3295_v23 = vpop.f32.mrb[13].mxu0 }
 0x4a9   : > { %v3647_v57 = vadd.f32 %v3646_v26, %v8083_v7  ;;  %v3296_v3 = vadd.f32 %v3295_v23, %v8089_v53  ;;  %v3648_v30 = vpop.f32.mrb[13].mxu1  ;;  %v3297_v45 = vpop.f32.mrb[14].mxu0 }
 0x4aa   : > { %v4246_v15 = vsel %vm3848_vm9, %v3294_v54, -inf  ;;  %v3649_v17 = vadd.f32 %v3648_v30, %v8091_v21  ;;  %v3298_v52 = vadd.f32 %v3297_v45, %v8081_v5  ;;  %v3650_v58 = vpop.f32.mrb[14].mxu1  ;;  %v3299_v6 = vpop.f32.mrb[15].mxu0 }
 0x4ab   : > { %v4899_v51 = vmax.f32 %v4898_v42, %v4246_v15  ;;  %v4248_v20 = vsel %vm3848_vm9, %v3647_v57, -inf  ;;  %v4247_v55 = vsel %vm3848_vm9, %v3296_v3, -inf  ;;  %v3651_v8 = vadd.f32 %v3650_v58, %v8083_v7  ;;  %v3652_v0 = vpop.f32.mrb[15].mxu1 }
 0x4ac   : > { %v4973_v1 = vmax.f32 %v4972_v63, %v4248_v20  ;;  %v4936_v4 = vmax.f32 %v4935_v29, %v4247_v55  ;;  %v4249_v60 = vsel %vm3848_vm9, %v3649_v17, -inf  ;;  %v4254_v48 = vsel %vm3849_vm10, %v3298_v52, -inf  ;;  %vm9302_vm9 = vmmov %vm9300_vm7 }
 0x4ad   : > { %v5010_v10 = vmax.f32 %v5009_v47, %v4249_v60  ;;  %v4900_v31 = vmax.f32 %v4899_v51, %v4254_v48  ;;  %v4256_v42 = vsel %vm3849_vm10, %v3651_v8, -inf  ;;  %v3300_v46 = vadd.f32 %v3299_v6, %v8089_v53 }
 0x4ae   : > { %v4974_v16 = vmax.f32 %v4973_v1, %v4256_v42  ;;  %v3653_v56 = vadd.f32 %v3652_v0, %v8091_v21 }
 0x4af   : > { %v4255_v9 = vsel %vm3849_vm10, %v3300_v46, -inf  ;;  %v3303_v63 = vpop.f32.mrb[16].mxu0 }
 0x4b0   : > { %v4937_v29 = vmax.f32 %v4936_v4, %v4255_v9  ;;  %v4257_v61 = vsel %vm3849_vm10, %v3653_v56, -inf  ;;  %v3304_v54 = vadd.f32 %v3303_v63, %v8081_v5  ;;  %v3656_v47 = vpop.f32.mrb[16].mxu1  ;;  %v3305_v26 = vpop.f32.mrb[17].mxu0  ;;  %vm9303_vm10 = vmmov %vm9300_vm7 }
 0x4b1   : > { %v5011_v23 = vmax.f32 %v5010_v10, %v4257_v61  ;;  %v3657_v57 = vadd.f32 %v3656_v47, %v8083_v7  ;;  %v3306_v3 = vadd.f32 %v3305_v26, %v8089_v53  ;;  %v3658_v30 = vpop.f32.mrb[17].mxu1  ;;  %v3307_v45 = vpop.f32.mrb[18].mxu0 }
 0x4b2   : > { %v4262_v15 = vsel %vm9296_vm3, %v3304_v54, -inf  ;;  %v3659_v17 = vadd.f32 %v3658_v30, %v8091_v21  ;;  %v3308_v52 = vadd.f32 %v3307_v45, %v8081_v5  ;;  %v3660_v34 = vpop.f32.mrb[18].mxu1  ;;  %v3309_v58 = vpop.f32.mrb[19].mxu0  ;;  %vm9309_vm3 = vmmov %vm9308_vm13 }
 0x4b3   : > { %v4901_v6 = vmax.f32 %v4900_v31, %v4262_v15  ;;  %v4264_v51 = vsel %vm9297_vm4, %v3657_v57, -inf  ;;  %v4263_v20 = vsel %vm9298_vm5, %v3306_v3, -inf  ;;  %v3661_v55 = vadd.f32 %v3660_v34, %v8083_v7  ;;  %v3662_v8 = vpop.f32.mrb[19].mxu1  ;;  %vm9310_vm4 = vmmov %vm9309_vm3 }
 0x4b4   : > { %v4975_v0 = vmax.f32 %v4974_v16, %v4264_v51  ;;  %v4938_v1 = vmax.f32 %v4937_v29, %v4263_v20  ;;  %v4265_v4 = vsel %vm9299_vm6, %v3659_v17, -inf  ;;  %v4270_v60 = vsel %vm9300_vm7, %v3308_v52, -inf  ;;  %vm9311_vm5 = vmmov %vm9309_vm3 }
 0x4b5   : > { %v5012_v48 = vmax.f32 %v5011_v23, %v4265_v4  ;;  %v4902_v10 = vmax.f32 %v4901_v6, %v4270_v60  ;;  %v4272_v31 = vsel %vm9301_vm8, %v3661_v55, -inf  ;;  %v3310_v42 = vadd.f32 %v3309_v58, %v8089_v53 }
 0x4b6   : > { %v4976_v46 = vmax.f32 %v4975_v0, %v4272_v31  ;;  %v3663_v56 = vadd.f32 %v3662_v8, %v8091_v21  ;;  %vm9312_vm6 = vcmp.lt.s32.totalorder %v7241_v37, 500 }
 0x4b7   : > { %v4271_v16 = vsel %vm9302_vm9, %v3310_v42, -inf  ;;  %v3313_v9 = vpop.f32.mrb[20].mxu0  ;;  %vm9313_vm7 = vmmov %vm9312_vm6 }
 0x4b8   : > { %v4939_v63 = vmax.f32 %v4938_v1, %v4271_v16  ;;  %v4273_v35 = vsel %vm9303_vm10, %v3663_v56, -inf  ;;  %v3314_v29 = vadd.f32 %v3313_v9, %v8081_v5  ;;  %v3666_v61 = vpop.f32.mrb[20].mxu1  ;;  %v3315_v54 = vpop.f32.mrb[21].mxu0  ;;  %vm9314_vm8 = vmmov %vm9312_vm6  ;;  %vm9316_vm10 = vcmp.lt.s32.totalorder %v7244_v40, 500 }
 0x4b9   : > { %v5013_v47 = vmax.f32 %v5012_v48, %v4273_v35  ;;  %v3667_v26 = vadd.f32 %v3666_v61, %v8083_v7  ;;  %v3316_v23 = vadd.f32 %v3315_v54, %v8089_v53  ;;  %v3668_v57 = vpop.f32.mrb[21].mxu1  ;;  %v3317_v3 = vpop.f32.mrb[22].mxu0  ;;  %vm9315_vm9 = vmmov %vm9312_vm6 }
 0x4ba   : > { %v4278_v30 = vsel %vm9304_vm15, %v3314_v29, -inf  ;;  %v3669_v45 = vadd.f32 %v3668_v57, %v8091_v21  ;;  %v3318_v15 = vadd.f32 %v3317_v3, %v8081_v5  ;;  %v3670_v49 = vpop.f32.mrb[22].mxu1  ;;  %v3319_v17 = vpop.f32.mrb[23].mxu0  ;;  %vm9317_vm15 = vmmov %vm9316_vm10 }
 0x4bb   : > { %v4903_v52 = vmax.f32 %v4902_v10, %v4278_v30  ;;  %v4280_v34 = vsel %vm9305_vm12, %v3667_v26, -inf  ;;  %v4279_v58 = vsel %vm9306_vm11, %v3316_v23, -inf  ;;  %v3671_v6 = vadd.f32 %v3670_v49, %v8083_v7  ;;  %v3672_v51 = vpop.f32.mrb[23].mxu1  ;;  %vm9318_vm12 = vmmov %vm9316_vm10 }
 0x4bc   : > { %v4977_v20 = vmax.f32 %v4976_v46, %v4280_v34  ;;  %v4940_v55 = vmax.f32 %v4939_v63, %v4279_v58  ;;  %v4281_v8 = vsel %vm9307_vm14, %v3669_v45, -inf  ;;  %v4286_v0 = vsel %vm9308_vm13, %v3318_v15, -inf  ;;  %vm9319_vm11 = vmmov %vm9316_vm10 }
 0x4bd   : > { %v5014_v1 = vmax.f32 %v5013_v47, %v4281_v8  ;;  %v4904_v4 = vmax.f32 %v4903_v52, %v4286_v0  ;;  %v4288_v60 = vsel %vm9309_vm3, %v3671_v6, -inf  ;;  %v3320_v48 = vadd.f32 %v3319_v17, %v8089_v53 }
 0x4be   : > { %v4978_v10 = vmax.f32 %v4977_v20, %v4288_v60  ;;  %v3673_v31 = vadd.f32 %v3672_v51, %v8091_v21  ;;  %vm9320_vm14 = vcmp.lt.s32.totalorder %v7279_v59, 500 }
 0x4bf   : > { %v4287_v42 = vsel %vm9310_vm4, %v3320_v48, -inf  ;;  %v3323_v46 = vpop.f32.mrb[24].mxu0  ;;  %vm9321_vm13 = vmmov %vm9320_vm14 }
 0x4c0   : > { %v4941_v56 = vmax.f32 %v4940_v55, %v4287_v42  ;;  %v4289_v18 = vsel %vm9311_vm5, %v3673_v31, -inf  ;;  %v3324_v16 = vadd.f32 %v3323_v46, %v8081_v5  ;;  %v3676_v9 = vpop.f32.mrb[24].mxu1  ;;  %v3325_v63 = vpop.f32.mrb[25].mxu0  ;;  %vm9322_vm3 = vmmov %vm9321_vm13  ;;  %vm9324_vm5 = vcmp.lt.s32.totalorder %v9130_v39, 500 }
 0x4c1   : > { %v5015_v35 = vmax.f32 %v5014_v1, %v4289_v18  ;;  %v3677_v29 = vadd.f32 %v3676_v9, %v8083_v7  ;;  %v3326_v61 = vadd.f32 %v3325_v63, %v8089_v53  ;;  %v3678_v54 = vpop.f32.mrb[25].mxu1  ;;  %v3327_v47 = vpop.f32.mrb[26].mxu0  ;;  %vm9323_vm4 = vmmov %vm9322_vm3 }
 0x4c2   : > { %v4294_v26 = vsel %vm9312_vm6, %v3324_v16, -inf  ;;  %v3679_v23 = vadd.f32 %v3678_v54, %v8091_v21  ;;  %v3328_v57 = vadd.f32 %v3327_v47, %v8081_v5  ;;  %v3680_v19 = vpop.f32.mrb[26].mxu1  ;;  %v3329_v3 = vpop.f32.mrb[27].mxu0  ;;  %vm9325_vm6 = vmmov %vm9324_vm5 }
 0x4c3   : > { %v4905_v30 = vmax.f32 %v4904_v4, %v4294_v26  ;;  %v4296_v45 = vsel %vm9313_vm7, %v3677_v29, -inf  ;;  %v4295_v15 = vsel %vm9314_vm8, %v3326_v61, -inf  ;;  %v3681_v49 = vadd.f32 %v3680_v19, %v8083_v7  ;;  %v3682_v17 = vpop.f32.mrb[27].mxu1  ;;  %vm9326_vm7 = vmmov %vm9324_vm5 }
 0x4c4   : > { %v4979_v52 = vmax.f32 %v4978_v10, %v4296_v45  ;;  %v4942_v34 = vmax.f32 %v4941_v56, %v4295_v15  ;;  %v4297_v58 = vsel %vm9315_vm9, %v3679_v23, -inf  ;;  %v4302_v6 = vsel %vm9316_vm10, %v3328_v57, -inf  ;;  %vm9327_vm8 = vmmov %vm9324_vm5 }
 0x4c5   : > { %v5016_v51 = vmax.f32 %v5015_v35, %v4297_v58  ;;  %v4906_v20 = vmax.f32 %v4905_v30, %v4302_v6  ;;  %v4304_v55 = vsel %vm9317_vm15, %v3681_v49, -inf  ;;  %v3330_v8 = vadd.f32 %v3329_v3, %v8089_v53 }
 0x4c6   : > { %v4980_v0 = vmax.f32 %v4979_v52, %v4304_v55  ;;  %v3683_v1 = vadd.f32 %v3682_v17, %v8091_v21  ;;  %vm9328_vm9 = vcmp.lt.s32.totalorder %v7317_v50, 500 }
 0x4c7   : > { %v4303_v4 = vsel %vm9318_vm12, %v3330_v8, -inf  ;;  %v3333_v60 = vpop.f32.mrb[28].mxu0  ;;  %vm9329_vm10 = vmmov %vm9328_vm9 }
 0x4c8   : > { %v4943_v48 = vmax.f32 %v4942_v34, %v4303_v4  ;;  %v4305_v37 = vsel %vm9319_vm11, %v3683_v1, -inf  ;;  %v3334_v10 = vadd.f32 %v3333_v60, %v8081_v5  ;;  %v3686_v31 = vpop.f32.mrb[28].mxu1  ;;  %v3335_v42 = vpop.f32.mrb[29].mxu0  ;;  %vm9330_vm15 = vmmov %vm9328_vm9  ;;  %vm9332_vm11 = vcmp.lt.s32.totalorder %v9140_v11, 500 }
 0x4c9   : > { %v5017_v46 = vmax.f32 %v5016_v51, %v4305_v37  ;;  %v3687_v56 = vadd.f32 %v3686_v31, %v8083_v7  ;;  %v3336_v18 = vadd.f32 %v3335_v42, %v8089_v53  ;;  %v3688_v16 = vpop.f32.mrb[29].mxu1  ;;  %v3337_v9 = vpop.f32.mrb[30].mxu0  ;;  %vm9331_vm12 = vmmov %vm9328_vm9 }
 0x4ca   : > { %v4310_v63 = vsel %vm9320_vm14, %v3334_v10, -inf  ;;  %v3689_v35 = vadd.f32 %v3688_v16, %v8091_v21  ;;  %v3338_v29 = vadd.f32 %v3337_v9, %v8081_v5  ;;  %v3690_v40 = vpop.f32.mrb[30].mxu1  ;;  %v3339_v61 = vpop.f32.mrb[31].mxu0  ;;  %vm9333_vm14 = vmmov %vm9332_vm11 }
 0x4cb   : > { %v4907_v54 = vmax.f32 %v4906_v20, %v4310_v63  ;;  %v4312_v47 = vsel %vm9321_vm13, %v3687_v56, -inf  ;;  %v4311_v26 = vsel %vm9322_vm3, %v3336_v18, -inf  ;;  %v3691_v23 = vadd.f32 %v3690_v40, %v8083_v7  ;;  %v3692_v57 = vpop.f32.mrb[31].mxu1  ;;  %vm9334_vm13 = vmmov %vm9332_vm11 }
 0x4cc   : > { %v4981_v19 = vmax.f32 %v4980_v0, %v4312_v47  ;;  %v4944_v3 = vmax.f32 %v4943_v48, %v4311_v26  ;;  %v4313_v30 = vsel %vm9323_vm4, %v3689_v35, -inf  ;;  %v4318_v45 = vsel %vm9324_vm5, %v3338_v29, -inf  ;;  %vm9335_vm3 = vmmov %vm9332_vm11 }
 0x4cd   : > { %v5018_v15 = vmax.f32 %v5017_v46, %v4313_v30  ;;  %v4908_v49 = vmax.f32 %v4907_v54, %v4318_v45  ;;  %v4320_v17 = vsel %vm9325_vm6, %v3691_v23, -inf  ;;  %v3340_v52 = vadd.f32 %v3339_v61, %v8089_v53 }
 0x4ce   : > { %v4982_v34 = vmax.f32 %v4981_v19, %v4320_v17  ;;  %v3693_v58 = vadd.f32 %v3692_v57, %v8091_v21  ;;  %vm9336_vm4 = vcmp.lt.s32.totalorder %v7355_v33, 500 }
 0x4cf   : > { %v4319_v6 = vsel %vm9326_vm7, %v3340_v52, -inf  ;;  %v3343_v51 = vpop.f32.mrb[32].mxu0  ;;  %vm9337_vm5 = vmmov %vm9336_vm4 }
 0x4d0   : > { %v4945_v20 = vmax.f32 %v4944_v3, %v4319_v6  ;;  %v4321_v59 = vsel %vm9327_vm8, %v3693_v58, -inf  ;;  %v3344_v55 = vadd.f32 %v3343_v51, %v8081_v5  ;;  %v3696_v8 = vpop.f32.mrb[32].mxu1  ;;  %v3345_v0 = vpop.f32.mrb[33].mxu0  ;;  %vm9338_vm6 = vmmov %vm9336_vm4  ;;  %vm9340_vm8 = vcmp.lt.s32.totalorder %v9150_v2, 500 }
 0x4d1   : > { %v5019_v1 = vmax.f32 %v5018_v15, %v4321_v59  ;;  %v3697_v4 = vadd.f32 %v3696_v8, %v8083_v7  ;;  %v3346_v60 = vadd.f32 %v3345_v0, %v8089_v53  ;;  %v3698_v48 = vpop.f32.mrb[33].mxu1  ;;  %v3347_v37 = vpop.f32.mrb[34].mxu0  ;;  %vm9339_vm7 = vmmov %vm9336_vm4 }
 0x4d2   : > { %v4326_v10 = vsel %vm9328_vm9, %v3344_v55, -inf  ;;  %v3699_v31 = vadd.f32 %v3698_v48, %v8091_v21  ;;  %v3348_v42 = vadd.f32 %v3347_v37, %v8081_v5  ;;  %v3700_v39 = vpop.f32.mrb[34].mxu1  ;;  %v3349_v46 = vpop.f32.mrb[35].mxu0  ;;  %vm9341_vm9 = vmmov %vm9340_vm8 }
 0x4d3   : > { %v4909_v56 = vmax.f32 %v4908_v49, %v4326_v10  ;;  %v4328_v18 = vsel %vm9329_vm10, %v3697_v4, -inf  ;;  %v4327_v16 = vsel %vm9330_vm15, %v3346_v60, -inf  ;;  %v3701_v9 = vadd.f32 %v3700_v39, %v8083_v7  ;;  %v3702_v63 = vpop.f32.mrb[35].mxu1  ;;  %vm9342_vm10 = vmmov %vm9340_vm8 }
 0x4d4   : > { %v4983_v35 = vmax.f32 %v4982_v34, %v4328_v18  ;;  %v4946_v29 = vmax.f32 %v4945_v20, %v4327_v16  ;;  %v4329_v40 = vsel %vm9331_vm12, %v3699_v31, -inf  ;;  %v4334_v61 = vsel %vm9332_vm11, %v3348_v42, -inf  ;;  %vm9343_vm15 = vmmov %vm9340_vm8 }
 0x4d5   : > { %v5020_v54 = vmax.f32 %v5019_v1, %v4329_v40  ;;  %v4910_v47 = vmax.f32 %v4909_v56, %v4334_v61  ;;  %v4336_v26 = vsel %vm9333_vm14, %v3701_v9, -inf  ;;  %v3350_v23 = vadd.f32 %v3349_v46, %v8089_v53 }
 0x4d6   : > { %v4984_v57 = vmax.f32 %v4983_v35, %v4336_v26  ;;  %v3703_v19 = vadd.f32 %v3702_v63, %v8091_v21  ;;  %vm9344_vm12 = vcmp.lt.s32.totalorder %v7393_v41, 500 }
 0x4d7   : > { %v4335_v3 = vsel %vm9334_vm13, %v3350_v23, -inf  ;;  %v3353_v30 = vpop.f32.mrb[36].mxu0  ;;  %vm9345_vm11 = vmmov %vm9344_vm12 }
 0x4d8   : > { %v4947_v45 = vmax.f32 %v4946_v29, %v4335_v3  ;;  %v4337_v50 = vsel %vm9335_vm3, %v3703_v19, -inf  ;;  %v3354_v15 = vadd.f32 %v3353_v30, %v8081_v5  ;;  %v3706_v49 = vpop.f32.mrb[36].mxu1  ;;  %v3355_v17 = vpop.f32.mrb[37].mxu0  ;;  %vm9346_vm14 = vmmov %vm9345_vm11  ;;  %vm9348_vm3 = vcmp.lt.s32.totalorder %v9160_v32, 500 }
 0x4d9   : > { %v5021_v52 = vmax.f32 %v5020_v54, %v4337_v50  ;;  %v3707_v34 = vadd.f32 %v3706_v49, %v8083_v7  ;;  %v3356_v58 = vadd.f32 %v3355_v17, %v8089_v53  ;;  %v3708_v6 = vpop.f32.mrb[37].mxu1  ;;  %v3357_v51 = vpop.f32.mrb[38].mxu0  ;;  %vm9347_vm13 = vmmov %vm9345_vm11 }
 0x4da   : > { %v4342_v20 = vsel %vm9336_vm4, %v3354_v15, -inf  ;;  %v3709_v59 = vadd.f32 %v3708_v6, %v8091_v21  ;;  %v3358_v55 = vadd.f32 %v3357_v51, %v8081_v5  ;;  %v3710_v11 = vpop.f32.mrb[38].mxu1  ;;  %v3359_v8 = vpop.f32.mrb[39].mxu0  ;;  %vm9349_vm4 = vmmov %vm9348_vm3 }
 0x4db   : > { %v4911_v0 = vmax.f32 %v4910_v47, %v4342_v20  ;;  %v4344_v1 = vsel %vm9337_vm5, %v3707_v34, -inf  ;;  %v4343_v4 = vsel %vm9338_vm6, %v3356_v58, -inf  ;;  %v3711_v60 = vadd.f32 %v3710_v11, %v8083_v7  ;;  %v3712_v48 = vpop.f32.mrb[39].mxu1  ;;  %vm9350_vm5 = vmmov %vm9348_vm3 }
 0x4dc   : > { %v4985_v37 = vmax.f32 %v4984_v57, %v4344_v1  ;;  %v4948_v10 = vmax.f32 %v4947_v45, %v4343_v4  ;;  %v4345_v31 = vsel %vm9339_vm7, %v3709_v59, -inf  ;;  %v4350_v42 = vsel %vm9340_vm8, %v3358_v55, -inf  ;;  %vm9351_vm6 = vmmov %vm9348_vm3 }
 0x4dd   : > { %v5022_v39 = vmax.f32 %v5021_v52, %v4345_v31  ;;  %v4912_v46 = vmax.f32 %v4911_v0, %v4350_v42  ;;  %v4352_v56 = vsel %vm9341_vm9, %v3711_v60, -inf  ;;  %v3360_v18 = vadd.f32 %v3359_v8, %v8089_v53 }
 0x4de   : > { %v4986_v16 = vmax.f32 %v4985_v37, %v4352_v56  ;;  %v3713_v9 = vadd.f32 %v3712_v48, %v8091_v21  ;;  %vm9352_vm7 = vcmp.lt.s32.totalorder %v7431_v13, 500 }
 0x4df   : > { %v4351_v63 = vsel %vm9342_vm10, %v3360_v18, -inf  ;;  %v3363_v35 = vpop.f32.mrb[40].mxu0  ;;  %vm9353_vm8 = vmmov %vm9352_vm7 }
 0x4e0   : > { %v4949_v29 = vmax.f32 %v4948_v10, %v4351_v63  ;;  %v4353_v33 = vsel %vm9343_vm15, %v3713_v9, -inf  ;;  %v3364_v40 = vadd.f32 %v3363_v35, %v8081_v5  ;;  %v3716_v61 = vpop.f32.mrb[40].mxu1  ;;  %v3365_v54 = vpop.f32.mrb[41].mxu0  ;;  %vm9354_vm9 = vmmov %vm9352_vm7  ;;  %vm9356_vm15 = vcmp.lt.s32.totalorder %v9170_v43, 500 }
 0x4e1   : > { %v5023_v47 = vmax.f32 %v5022_v39, %v4353_v33  ;;  %v3717_v26 = vadd.f32 %v3716_v61, %v8083_v7  ;;  %v3366_v23 = vadd.f32 %v3365_v54, %v8089_v53  ;;  %v3718_v57 = vpop.f32.mrb[41].mxu1  ;;  %v3367_v19 = vpop.f32.mrb[42].mxu0  ;;  %vm9355_vm10 = vmmov %vm9352_vm7 }
 0x4e2   : > { %v4358_v3 = vsel %vm9344_vm12, %v3364_v40, -inf  ;;  %v3719_v30 = vadd.f32 %v3718_v57, %v8091_v21  ;;  %v3368_v45 = vadd.f32 %v3367_v19, %v8081_v5  ;;  %v3720_v2 = vpop.f32.mrb[42].mxu1  ;;  %v3369_v50 = vpop.f32.mrb[43].mxu0  ;;  %vm9357_vm12 = vmmov %vm9356_vm15 }
 0x4e3   : > { %v4913_v15 = vmax.f32 %v4912_v46, %v4358_v3  ;;  %v4360_v49 = vsel %vm9345_vm11, %v3717_v26, -inf  ;;  %v4359_v17 = vsel %vm9346_vm14, %v3366_v23, -inf  ;;  %v3721_v52 = vadd.f32 %v3720_v2, %v8083_v7  ;;  %v3722_v34 = vpop.f32.mrb[43].mxu1  ;;  %vm9358_vm11 = vmmov %vm9357_vm12 }
 0x4e4   : > { %v4987_v58 = vmax.f32 %v4986_v16, %v4360_v49  ;;  %v4950_v6 = vmax.f32 %v4949_v29, %v4359_v17  ;;  %v4361_v51 = vsel %vm9347_vm13, %v3719_v30, -inf  ;;  %v4366_v20 = vsel %vm9348_vm3, %v3368_v45, -inf  ;;  %vm9359_vm14 = vmmov %vm9358_vm11 }
 0x4e5   : > { %v5024_v59 = vmax.f32 %v5023_v47, %v4361_v51  ;;  %v4914_v55 = vmax.f32 %v4913_v15, %v4366_v20  ;;  %v4368_v11 = vsel %vm9349_vm4, %v3721_v52, -inf  ;;  %v3370_v8 = vadd.f32 %v3369_v50, %v8089_v53 }
 0x4e6   : > { %v4988_v0 = vmax.f32 %v4987_v58, %v4368_v11  ;;  %v3723_v1 = vadd.f32 %v3722_v34, %v8091_v21  ;;  %vm9360_vm13 = vcmp.lt.s32.totalorder %v7469_v14, 500 }
 0x4e7   : > { %v4367_v4 = vsel %vm9350_vm5, %v3370_v8, -inf  ;;  %v3373_v60 = vpop.f32.mrb[44].mxu0  ;;  %vm9361_vm3 = vmmov %vm9360_vm13 }
 0x4e8   : > { %v4951_v48 = vmax.f32 %v4950_v6, %v4367_v4  ;;  %v4369_v41 = vsel %vm9351_vm6, %v3723_v1, -inf  ;;  %v3374_v37 = vadd.f32 %v3373_v60, %v8081_v5  ;;  %v3726_v10 = vpop.f32.mrb[44].mxu1  ;;  %v3375_v31 = vpop.f32.mrb[45].mxu0  ;;  %vm9362_vm4 = vmmov %vm9361_vm3  ;;  %vm9364_vm6 = vcmp.lt.s32.totalorder %v7472_v12, 500 }
 0x4e9   : > { %v5025_v42 = vmax.f32 %v5024_v59, %v4369_v41  ;;  %v3727_v39 = vadd.f32 %v3726_v10, %v8083_v7  ;;  %v3376_v46 = vadd.f32 %v3375_v31, %v8089_v53  ;;  %v3728_v56 = vpop.f32.mrb[45].mxu1  ;;  %v3377_v18 = vpop.f32.mrb[46].mxu0  ;;  %vm9363_vm5 = vmmov %vm9361_vm3 }
 0x4ea   : > { %v4374_v16 = vsel %vm9352_vm7, %v3374_v37, -inf  ;;  %v3729_v9 = vadd.f32 %v3728_v56, %v8091_v21  ;;  %v3378_v63 = vadd.f32 %v3377_v18, %v8081_v5  ;;  %v3730_v32 = vpop.f32.mrb[46].mxu1  ;;  %v3379_v35 = vpop.f32.mrb[47].mxu0  ;;  %vm9365_vm7 = vmmov %vm9364_vm6 }
 0x4eb   : > { %v4915_v29 = vmax.f32 %v4914_v55, %v4374_v16  ;;  %v4376_v33 = vsel %vm9353_vm8, %v3727_v39, -inf  ;;  %v4375_v40 = vsel %vm9354_vm9, %v3376_v46, -inf  ;;  %v3731_v61 = vadd.f32 %v3730_v32, %v8083_v7  ;;  %v3732_v54 = vpop.f32.mrb[47].mxu1  ;;  %vm9366_vm8 = vmmov %vm9364_vm6 }
 0x4ec   : > { %v4989_v47 = vmax.f32 %v4988_v0, %v4376_v33  ;;  %v4952_v26 = vmax.f32 %v4951_v48, %v4375_v40  ;;  %v4377_v23 = vsel %vm9355_vm10, %v3729_v9, -inf  ;;  %v4382_v57 = vsel %vm9356_vm15, %v3378_v63, -inf  ;;  %vm9367_vm9 = vmmov %vm9364_vm6 }
 0x4ed   : > { %v5026_v19 = vmax.f32 %v5025_v42, %v4377_v23  ;;  %v4916_v3 = vmax.f32 %v4915_v29, %v4382_v57  ;;  %v4384_v30 = vsel %vm9357_vm12, %v3731_v61, -inf  ;;  %v3380_v45 = vadd.f32 %v3379_v35, %v8089_v53 }
 0x4ee   : > { %v4990_v2 = vmax.f32 %v4989_v47, %v4384_v30  ;;  %v3733_v50 = vadd.f32 %v3732_v54, %v8091_v21  ;;  %vm9368_vm10 = vcmp.lt.s32.totalorder %v7507_v22, 500 }
 0x4ef   : > { %v4383_v15 = vsel %vm9358_vm11, %v3380_v45, -inf  ;;  %v3383_v49 = vpop.f32.mrb[48].mxu0  ;;  %vm9369_vm15 = vmmov %vm9368_vm10 }
 0x4f0   : > { %v4953_v17 = vmax.f32 %v4952_v26, %v4383_v15  ;;  %v4385_v13 = vsel %vm9359_vm14, %v3733_v50, -inf  ;;  %v3384_v52 = vadd.f32 %v3383_v49, %v8081_v5  ;;  %v3736_v34 = vpop.f32.mrb[48].mxu1  ;;  %v3385_v58 = vpop.f32.mrb[49].mxu0  ;;  %vm9370_vm12 = vmmov %vm9368_vm10  ;;  %vm9372_vm14 = vcmp.lt.s32.totalorder %v7510_v38, 500 }
 0x4f1   : > { %v5027_v6 = vmax.f32 %v5026_v19, %v4385_v13  ;;  %v3737_v51 = vadd.f32 %v3736_v34, %v8083_v7  ;;  %v3386_v20 = vadd.f32 %v3385_v58, %v8089_v53  ;;  %v3738_v59 = vpop.f32.mrb[49].mxu1  ;;  %v3387_v55 = vpop.f32.mrb[50].mxu0  ;;  %vm9371_vm11 = vmmov %vm9368_vm10 }
 0x4f2   : > { %v4390_v11 = vsel %vm9360_vm13, %v3384_v52, -inf  ;;  %v3739_v8 = vadd.f32 %v3738_v59, %v8091_v21  ;;  %v3388_v0 = vadd.f32 %v3387_v55, %v8081_v5  ;;  %v3740_v43 = vpop.f32.mrb[50].mxu1  ;;  %v3389_v1 = vpop.f32.mrb[51].mxu0  ;;  %vm9373_vm13 = vmmov %vm9372_vm14 }
 0x4f3   : > { %v4917_v4 = vmax.f32 %v4916_v3, %v4390_v11  ;;  %v4392_v60 = vsel %vm9361_vm3, %v3737_v51, -inf  ;;  %v4391_v48 = vsel %vm9362_vm4, %v3386_v20, -inf  ;;  %v3741_v41 = vadd.f32 %v3740_v43, %v8083_v7  ;;  %v3742_v37 = vpop.f32.mrb[51].mxu1  ;;  %vm9374_vm3 = vmmov %vm9373_vm13 }
 0x4f4   : > { %v4991_v10 = vmax.f32 %v4990_v2, %v4392_v60  ;;  %v4954_v31 = vmax.f32 %v4953_v17, %v4391_v48  ;;  %v4393_v42 = vsel %vm9363_vm5, %v3739_v8, -inf  ;;  %v4398_v39 = vsel %vm9364_vm6, %v3388_v0, -inf  ;;  %vm9375_vm4 = vmmov %vm9374_vm3 }
 0x4f5   : > { %v5028_v46 = vmax.f32 %v5027_v6, %v4393_v42  ;;  %v4918_v56 = vmax.f32 %v4917_v4, %v4398_v39  ;;  %v4400_v18 = vsel %vm9365_vm7, %v3741_v41, -inf  ;;  %v3390_v16 = vadd.f32 %v3389_v1, %v8089_v53 }
 0x4f6   : > { %v4992_v9 = vmax.f32 %v4991_v10, %v4400_v18  ;;  %v3743_v63 = vadd.f32 %v3742_v37, %v8091_v21  ;;  %vm9376_vm5 = vcmp.lt.s32.totalorder %v7545_v44, 500 }
 0x4f7   : > { %v4399_v32 = vsel %vm9366_vm8, %v3390_v16, -inf  ;;  %v3393_v35 = vpop.f32.mrb[52].mxu0  ;;  %vm9377_vm6 = vmmov %vm9376_vm5 }
 0x4f8   : > { %v4955_v29 = vmax.f32 %v4954_v31, %v4399_v32  ;;  %v4401_v14 = vsel %vm9367_vm9, %v3743_v63, -inf  ;;  %v3394_v33 = vadd.f32 %v3393_v35, %v8081_v5  ;;  %v3746_v40 = vpop.f32.mrb[52].mxu1  ;;  %v3395_v61 = vpop.f32.mrb[53].mxu0  ;;  %vm9378_vm7 = vmmov %vm9376_vm5  ;;  %vm5141_vm9 = vcmask (!%p5586_p3), 1047559  }
 0x4f9   : > { %v5029_v54 = vmax.f32 %v5028_v46, %v4401_v14  ;;  %v3747_v47 = vadd.f32 %v3746_v40, %v8083_v7  ;;  %v3396_v26 = vadd.f32 %v3395_v61, %v8089_v53  ;;  %v3748_v23 = vpop.f32.mrb[53].mxu1  ;;  %v3397_v57 = vpop.f32.mrb[54].mxu0  ;;  %vm9379_vm8 = vmmov %vm9376_vm5 }
 0x4fa   : > { %v4406_v19 = vsel %vm9368_vm10, %v3394_v33, -inf  ;;  %v3749_v3 = vadd.f32 %v3748_v23, %v8091_v21  ;;  %v3398_v30 = vadd.f32 %v3397_v57, %v8081_v5  ;;  %v3750_v12 = vpop.f32.mrb[54].mxu1  ;;  %v3399_v45 = vpop.f32.mrb[55].mxu0 }
 0x4fb   : > { %v4919_v2 = vmax.f32 %v4918_v56, %v4406_v19  ;;  %v4408_v50 = vsel %vm9369_vm15, %v3747_v47, -inf  ;;  %v4407_v15 = vsel %vm9370_vm12, %v3396_v26, -inf  ;;  %v3751_v49 = vadd.f32 %v3750_v12, %v8083_v7  ;;  %v3752_v17 = vpop.f32.mrb[55].mxu1 }
 0x4fc   : > { %v4993_v13 = vmax.f32 %v4992_v9, %v4408_v50  ;;  %v4956_v52 = vmax.f32 %v4955_v29, %v4407_v15  ;;  %v4409_v34 = vsel %vm9371_vm11, %v3749_v3, -inf  ;;  %v4414_v58 = vsel %vm9372_vm14, %v3398_v30, -inf }
 0x4fd   : > { %v5030_v6 = vmax.f32 %v5029_v54, %v4409_v34  ;;  %v4920_v51 = vmax.f32 %v4919_v2, %v4414_v58  ;;  %v4416_v20 = vsel %vm9373_vm13, %v3751_v49, -inf  ;;  %v3400_v59 = vadd.f32 %v3399_v45, %v8089_v53 }
 0x4fe   : > { %v4994_v55 = vmax.f32 %v4993_v13, %v4416_v20  ;;  %v3753_v11 = vadd.f32 %v3752_v17, %v8091_v21 }
 0x4ff   : > { %v4415_v8 = vsel %vm9374_vm3, %v3400_v59, -inf  ;;  %v3403_v0 = vpop.f32.mrb[56].mxu0 }
 0x500   : > { %v4957_v43 = vmax.f32 %v4956_v52, %v4415_v8  ;;  %v4417_v22 = vsel %vm9375_vm4, %v3753_v11, -inf  ;;  %v3404_v1 = vadd.f32 %v3403_v0, %v8081_v5  ;;  %v3756_v4 = vpop.f32.mrb[56].mxu1  ;;  %v3405_v60 = vpop.f32.mrb[57].mxu0 }
 0x501   : > { %v5031_v48 = vmax.f32 %v5030_v6, %v4417_v22  ;;  %v3757_v41 = vadd.f32 %v3756_v4, %v8083_v7  ;;  %v3406_v37 = vadd.f32 %v3405_v60, %v8089_v53  ;;  %v3758_v10 = vpop.f32.mrb[57].mxu1  ;;  %v3407_v31 = vpop.f32.mrb[58].mxu0 }
 0x502   : > { %v4422_v42 = vsel %vm9376_vm5, %v3404_v1, -inf  ;;  %v3759_v39 = vadd.f32 %v3758_v10, %v8091_v21  ;;  %v3408_v46 = vadd.f32 %v3407_v31, %v8081_v5  ;;  %v3760_v38 = vpop.f32.mrb[58].mxu1  ;;  %v3409_v56 = vpop.f32.mrb[59].mxu0 }
 0x503   : > { %v4921_v18 = vmax.f32 %v4920_v51, %v4422_v42  ;;  %v4424_v16 = vsel %vm9377_vm6, %v3757_v41, -inf  ;;  %v4423_v9 = vsel %vm9378_vm7, %v3406_v37, -inf  ;;  %v3761_v63 = vadd.f32 %v3760_v38, %v8083_v7  ;;  %v3762_v32 = vpop.f32.mrb[59].mxu1 }
 0x504   : > { %v4995_v35 = vmax.f32 %v4994_v55, %v4424_v16  ;;  %v4958_v29 = vmax.f32 %v4957_v43, %v4423_v9  ;;  %v4425_v14 = vsel %vm9379_vm8, %v3759_v39, -inf  ;;  %v4430_v33 = vsel %vm3871_vm0, %v3408_v46, -inf }
 0x505   : > { %v5032_v40 = vmax.f32 %v5031_v48, %v4425_v14  ;;  %v4922_v61 = vmax.f32 %v4921_v18, %v4430_v33  ;;  %v4432_v54 = vsel %vm3871_vm0, %v3761_v63, -inf  ;;  %v3410_v47 = vadd.f32 %v3409_v56, %v8089_v53 }
 0x506   : > { %v4996_v26 = vmax.f32 %v4995_v35, %v4432_v54  ;;  %v3763_v23 = vadd.f32 %v3762_v32, %v8091_v21 }
 0x507   : > { %v4431_v57 = vsel %vm3871_vm0, %v3410_v47, -inf  ;;  %v3413_v19 = vpop.f32.mrb[60].mxu0 }
 0x508   : > { %v4959_v3 = vmax.f32 %v4958_v29, %v4431_v57  ;;  %v4433_v44 = vsel %vm3871_vm0, %v3763_v23, -inf  ;;  %v3414_v30 = vadd.f32 %v3413_v19, %v8081_v5  ;;  %v3766_v12 = vpop.f32.mrb[60].mxu1  ;;  %v3415_v45 = vpop.f32.mrb[61].mxu0  ;;  %v6089_v19 = vmov (!%p5586_p3), 1983009808  }
 0x509   : > { %v5033_v2 = vmax.f32 %v5032_v40, %v4433_v44  ;;  %v3767_v50 = vadd.f32 %v3766_v12, %v8083_v7  ;;  %v3416_v15 = vadd.f32 %v3415_v45, %v8089_v53  ;;  %v3768_v49 = vpop.f32.mrb[61].mxu1  ;;  %v3417_v17 = vpop.f32.mrb[62].mxu0  ;;  %v9381_v44 = vld [vmem:[#allocation32_spill] sm:$0xff] (!%p5586_p3)  ;;  %v9383_v45 = vld [vmem:[#allocation33_spill] sm:$0xff] (!%p5586_p3)  ;;  %vm5135_vm0 = vcmask (!%p5586_p3), 1041409  }
 0x50a   : > { %v4438_v13 = vsel %vm3872_vm1, %v3414_v30, -inf  ;;  %v3769_v52 = vadd.f32 %v3768_v49, %v8091_v21  ;;  %v3418_v34 = vadd.f32 %v3417_v17, %v8081_v5  ;;  %v3770_v62 = vpop.f32.mrb[62].mxu1  ;;  %v3419_v58 = vpop.f32.mrb[63].mxu0  ;;  %v9382_v30 = vld [vmem:[#allocation30_spill] sm:$0xff] (!%p5586_p3)  ;;  %v9385_v49 = vld [vmem:[#allocation8_spill] sm:$0xff] (!%p5586_p3) }
 0x50b   : > { %v4923_v6 = vmax.f32 %v4922_v61, %v4438_v13  ;;  %v4440_v51 = vsel %vm3872_vm1, %v3767_v50, -inf  ;;  %v4439_v20 = vsel %vm3872_vm1, %v3416_v15, -inf  ;;  %v3771_v59 = vadd.f32 %v3770_v62, %v8083_v7  ;;  %v3772_v55 = vpop.f32.mrb[63].mxu1  ;;  %v9386_v17 = vld [vmem:[#allocation6_spill] sm:$0xff] (!%p5586_p3) }
 0x50c   : > { %v4997_v11 = vmax.f32 %v4996_v26, %v4440_v51  ;;  %v4960_v8 = vmax.f32 %v4959_v3, %v4439_v20  ;;  %v4441_v0 = vsel %vm3872_vm1, %v3769_v52, -inf  ;;  %v4446_v5 = vsel %vm3873_vm2, %v3418_v34, -inf  ;;  %v9387_v52 = vld [vmem:[#allocation24_spill] sm:$0xff] (!%p5586_p3)  ;;  %v9388_v34 = vld [vmem:[#allocation23_spill] sm:$0xff] (!%p5586_p3) }
 0x50d   : > { %v5034_v22 = vmax.f32 %v5033_v2, %v4441_v0  ;;  %v4924_v1 = vmax.f32 %v4923_v6, %v4446_v5  ;;  %v4448_v4 = vsel %vm3873_vm2, %v3771_v59, -inf  ;;  %v3420_v60 = vadd.f32 %v3419_v58, %v8089_v53  ;;  %v9384_v2 = vld [vmem:[#allocation31_spill] sm:$0xff] (!%p5586_p3)  ;;  %v9389_v59 = vld [vmem:[#allocation21_spill] sm:$0xff] (!%p5586_p3) }
 0x50e   : > { %v4998_v48 = vmax.f32 %v4997_v11, %v4448_v4  ;;  %v3773_v41 = vadd.f32 %v3772_v55, %v8091_v21  ;;  %v5065_v3 = vunpack.c.l.s4 (!%p5586_p3), %v6089_v19  ;;  %v5062_v12 = vcombine.low (!%p5586_p3), %v9382_v30, %v9381_v44 }
 0x50f   : > { %v4925_v7 = vrot.slane %v4924_v1, 4  ;;  %v4447_v37 = vsel %vm3873_vm2, %v3420_v60, -inf  ;;  %v5063_v50 = vcombine.low (!%p5586_p3), %v9384_v2, %v9383_v45  ;;  %v5096_v13 = vcombine.low (!%p5586_p3), %v9386_v17, %v9385_v49 }
 0x510   : > { %v4999_v10 = vrot.slane %v4998_v48, 4  ;;  %v4961_v25 = vmax.f32 %v4960_v8, %v4447_v37  ;;  %v4449_v31 = vsel %vm3873_vm2, %v3773_v41, -inf  ;;  %v5066_v15 = vunpack.c.0.s8 (!%p5586_p3), %v5065_v3 }
 0x511   : > { %v4926_v42 = vmax.f32 %v4924_v1, %v4925_v7  ;;  %v5035_v39 = vmax.f32 %v5034_v22, %v4449_v31  ;;  %v5097_v62 = vcombine.low (!%p5586_p3), %v9388_v34, %v9387_v52  ;;  %v5079_v58 = vcombine.low (!%p5586_p3), %v8549_v24, %v8559_v27 }
 0x512   : > { %v5000_v46 = vmax.f32 %v4998_v48, %v4999_v10  ;;  %v4962_v38 = vrot.slane %v4961_v25, 4  ;;  %v5080_v6 = vcombine.low (!%p5586_p3), %v8553_v36, %v8565_v28  ;;  %v5069_v55 = vsub.s32 (!%p5586_p3), %v5066_v15, %v9389_v59 }
 0x513   : > { %v4927_v56 = vrot.slane %v4926_v42, 2  ;;  %v5036_v18 = vrot.slane %v5035_v39, 4  ;;  %vm5137_vm1 = vcmask (!%p5586_p3), 1043459   ;;  %vm5139_vm2 = vcmask (!%p5586_p3), 1045509  }
 0x514   : > { %v5001_v16 = vrot.slane %v5000_v46, 2  ;;  %v4963_v53 = vmax.f32 %v4961_v25, %v4962_v38  ;;  %v5070_v11 = vrot.slane (!%p5586_p3), %v5062_v12, %v5069_v55  ;;  %v5077_v8 = vrot.slane (!%p5586_p3), %v5063_v50, %v5069_v55 }
 0x515   : > { %v4928_v9 = vmax.f32 %v4926_v42, %v4927_v56  ;;  %v5037_v63 = vmax.f32 %v5035_v39, %v5036_v18  ;;  %v5104_v0 = vrot.slane (!%p5586_p3), %v5096_v13, %v5069_v55  ;;  %v5111_v43 = vrot.slane (!%p5586_p3), %v5097_v62, %v5069_v55 }
 0x516   : > { %v5002_v21 = vmax.f32 %v5000_v46, %v5001_v16  ;;  %v4964_v32 = vrot.slane %v4963_v53, 2  ;;  %v5087_v5 = vrot.slane (!%p5586_p3), %v5079_v58, %v5069_v55  ;;  %v5094_v22 = vrot.slane (!%p5586_p3), %v5080_v6, %v5069_v55 }
 0x517   : > { %v4929_v35 = vrot.slane %v4928_v9, 1  ;;  %v5038_v29 = vrot.slane %v5037_v63, 2  ;;  %5045 = sbr.rel (%p5586_p3) target bundleno = 1324 (0x52c), region = 114  ;;  %v5078_v60 = vcombine.low (!%p5586_p3), %v5070_v11, %v5077_v8  ;;  %v5112_v48 = vcombine.low (!%p5586_p3), %v5104_v0, %v5111_v43 }
 0x518   : > { %v5003_v14 = vrot.slane %v5002_v21, 1  ;;  %v4965_v33 = vmax.f32 %v4963_v53, %v4964_v32  ;;  %v5095_v41 = vcombine.low (!%p5586_p3), %v5087_v5, %v5094_v22 }
 0x519   : > { %v8919_v40 = vmax.f32 %v4928_v9, %v4929_v35  ;;  %v5039_v61 = vmax.f32 %v5037_v63, %v5038_v29  ;;  %v5134_v37 = vrot.slane (!%p5586_p3), %v5112_v48, 7 }
 0x51a   : > { %v8921_v54 = vmax.f32 %v5002_v21, %v5003_v14  ;;  %v4966_v47 = vrot.slane %v4965_v33, 1 }
 0x51b   : > { %v5040_v26 = vrot.slane %v5039_v61, 1  ;;  %v5136_v25 = vsel (!%p5586_p3), %vm5135_vm0, %v5134_v37, %v5078_v60 }
 0x51c   : > { %v8923_v23 = vmax.f32 %v4965_v33, %v4966_v47  ;;  %v5138_v31 = vsel (!%p5586_p3), %vm5137_vm1, %v5134_v37, %v5136_v25 }
 0x51d   : > { %v8925_v57 = vmax.f32 %v5039_v61, %v5040_v26  ;;  %v5140_v39 = vsel (!%p5586_p3), %vm5139_vm2, %v5134_v37, %v5138_v31 }
 0x51e   : > { %v5113_v51 = vcombine.low %v8919_v40, %v8923_v23  ;;  %v5142_v38 = vsel %vm5141_vm9, %v5134_v37, %v5140_v39 }
 0x51f   : > { %v5114_v20 = vcombine.low %v8921_v54, %v8925_v57  ;;  %5152 = vst [vmem:[#allocation3] sm:$0xff] %v5142_v38 }
 0x520   : > { %v5121_v1 = vrot.slane %v5113_v51, %v5069_v55 }
 0x521   : > { %v5128_v4 = vrot.slane %v5114_v20, %v5069_v55 }
 0x523   : > { %v5129_v7 = vcombine.low %v5121_v1, %v5128_v4 }
 0x525   : > { %v5145_v10 = vrot.slane %v5129_v7, 7 }
 0x527   : > { %v5146_v42 = vsel %vm5135_vm0, %v5145_v10, %v5095_v41 }
 0x528   : > { %v5147_v46 = vsel %vm5137_vm1, %v5145_v10, %v5146_v42 }
 0x529   : > { %v5148_v56 = vsel %vm5139_vm2, %v5145_v10, %v5147_v46 }
 0x52a   : > { %v5149_v18 = vsel %vm5141_vm9, %v5145_v10, %v5148_v56 }
 0x52b   : > { %5153 = vst [vmem:[#allocation3 + $0x8] sm:$0xff] %v5149_v18 }
 0x52c PF: > { %p5587_p4 = scmp.le.s32.totalorder %s6046_s26, 0 }
 0x52d   : > { %v6090_v16 = vmov (!%p5587_p4), 1983009808   ;;  %v9390_v9 = vld [vmem:[#allocation32_spill] sm:$0xff] (!%p5587_p4)  ;;  %v9391_v63 = vld [vmem:[#allocation30_spill] sm:$0xff] (!%p5587_p4)  ;;  %v9392_v32 = vld [vmem:[#allocation33_spill] sm:$0xff] (!%p5587_p4)  ;;  %v5193_v44 = vcombine.low (!%p5587_p4), %v8549_v24, %v8559_v27  ;;  %v5194_v30 = vcombine.low (!%p5587_p4), %v8553_v36, %v8565_v28  ;;  %v5227_v12 = vcombine.low (!%p5587_p4), %v8919_v40, %v8923_v23 }
 0x52e   : > { %5157 = sbr.rel (%p5587_p4) target bundleno = 1346 (0x542), region = 118  ;;  %v5179_v53 = vunpack.c.l.s4 (!%p5587_p4), %v6090_v16  ;;  %v5176_v21 = vcombine.low (!%p5587_p4), %v9391_v63, %v9390_v9  ;;  %v9393_v35 = vld [vmem:[#allocation31_spill] sm:$0xff] (!%p5587_p4)  ;;  %v9394_v33 = vld [vmem:[#allocation8_spill] sm:$0xff] (!%p5587_p4)  ;;  %v9395_v61 = vld [vmem:[#allocation6_spill] sm:$0xff] (!%p5587_p4)  ;;  %v5228_v45 = vcombine.low (!%p5587_p4), %v8921_v54, %v8925_v57  ;;  %vm5249_vm10 = vcmask (!%p5587_p4), 1041409  }
 0x52f   : > { %v5177_v29 = vcombine.low (!%p5587_p4), %v9393_v35, %v9392_v32  ;;  %v5210_v47 = vcombine.low (!%p5587_p4), %v9395_v61, %v9394_v33  ;;  %v9396_v26 = vld [vmem:[#allocation24_spill] sm:$0xff] (!%p5587_p4)  ;;  %v9397_v19 = vld [vmem:[#allocation23_spill] sm:$0xff] (!%p5587_p4)  ;;  %v9398_v2 = vld [vmem:[#allocation21_spill] sm:$0xff] (!%p5587_p4)  ;;  %vm5251_vm15 = vcmask (!%p5587_p4), 1043459   ;;  %vm5253_vm12 = vcmask (!%p5587_p4), 1045509  }
 0x530   : > { %v5180_v14 = vunpack.c.0.s8 (!%p5587_p4), %v5179_v53  ;;  %v5211_v3 = vcombine.low (!%p5587_p4), %v9397_v19, %v9396_v26  ;;  %vm5255_vm11 = vcmask (!%p5587_p4), 1047559   ;;  %v5158_v23 = vld [vmem:[#allocation3] sm:$0xff] (!%p5587_p4) }
 0x532   : > { %v5183_v50 = vsub.s32 (!%p5587_p4), %v5180_v14, %v9398_v2  ;;  %v5159_v59 = vld [vmem:[#allocation3 + $0x8] sm:$0xff] (!%p5587_p4) }
 0x534   : > { %v5184_v15 = vrot.slane (!%p5587_p4), %v5176_v21, %v5183_v50  ;;  %v5191_v49 = vrot.slane (!%p5587_p4), %v5177_v29, %v5183_v50  ;;  %v5218_v17 = vrot.slane (!%p5587_p4), %v5210_v47, %v5183_v50  ;;  %v5225_v13 = vrot.slane (!%p5587_p4), %v5211_v3, %v5183_v50 }
 0x535   : > { %v5201_v52 = vrot.slane %v5193_v44, %v5183_v50  ;;  %v5208_v34 = vrot.slane %v5194_v30, %v5183_v50  ;;  %v5235_v62 = vrot.slane %v5227_v12, %v5183_v50  ;;  %v5242_v58 = vrot.slane %v5228_v45, %v5183_v50 }
 0x536   : > { %v5192_v24 = vcombine.low %v5184_v15, %v5191_v49  ;;  %v5226_v27 = vcombine.low %v5218_v17, %v5225_v13 }
 0x537   : > { %v5209_v36 = vcombine.low %v5201_v52, %v5208_v34  ;;  %v5243_v28 = vcombine.low %v5235_v62, %v5242_v58 }
 0x538   : > { %v5248_v6 = vrot.slane %v5226_v27, 7 }
 0x539   : > { %v5259_v40 = vrot.slane %v5243_v28, 7 }
 0x53a   : > { %v5250_v54 = vsel %vm5249_vm10, %v5248_v6, %v5192_v24 }
 0x53b   : > { %v5252_v57 = vsel %vm5251_vm15, %v5248_v6, %v5250_v54  ;;  %v5260_v51 = vsel %vm5249_vm10, %v5259_v40, %v5209_v36 }
 0x53c   : > { %v5254_v20 = vsel %vm5253_vm12, %v5248_v6, %v5252_v57  ;;  %v5261_v55 = vsel %vm5251_vm15, %v5259_v40, %v5260_v51 }
 0x53d   : > { %v5256_v11 = vsel %vm5255_vm11, %v5248_v6, %v5254_v20  ;;  %v5262_v8 = vsel %vm5253_vm12, %v5259_v40, %v5261_v55 }
 0x53e   : > { %v5266_v0 = vmax.f32 %v5158_v23, %v5256_v11  ;;  %v5263_v43 = vsel %vm5255_vm11, %v5259_v40, %v5262_v8 }
 0x53f   : > { %v5267_v5 = vmax.f32 %v5159_v59, %v5263_v43 }
 0x540   : > { %5268 = vst [vmem:[#allocation3] sm:$0xff] %v5266_v0 }
 0x541   : > { %5269 = vst [vmem:[#allocation3 + $0x8] sm:$0xff] %v5267_v5 }
 0x542 PF: > { %p8965_p5 = scmp.eq.s32.totalorder %s5399_s29, 1  ;;  %s6091_s15 = smov [#allocation3]  }
 0x543   : > { %s5280_s16 = sshll.u32 %s6091_s15, 4  ;;  %s5281_s16 = int_to_ptr.vmem [resolvable:$true] %s5280_s16 }
 0x544   : > { %s5954_s17 = scalar_lea.vmem %s5281_s16, 256  ;;  %p5961_p9 = scmp.lt.s32.totalorder %s5281_s16, %s5281_s16 }
 0x545   : > { %p5955_p6 = scmp.ne.s32.totalorder %s5281_s16, %s5954_s17  ;;  %p5962_p10 = scmp.lt.s32.totalorder %s5954_s17, %s5954_s17 }
 0x547   : > { %p5956_p7 = pnand %p5955_p6, %p8965_p5  ;;  %p5963_p11 = por %p5962_p10, %p5961_p9 }
 0x549   : > { %p5957_p8 = pneg %p5956_p7 }
 0x54b   : > { %p5964_p12 = pnand %p5963_p11, %p5957_p8 }
 0x54d   : > { %5967 = shalt.err (!%p5964_p12)
}
 0x54e   : > { %s5968_s29 = scalar_lea.hbm %s9013_s7, 256 }
 0x54f   : > { %p5969_p13 = scmp.ne.s32.totalorder %s9013_s7, %s5968_s29  ;;  %p5974_p2 = scmp.lt.u32.totalorder %s5968_s29, %s9013_s7 }
 0x551   : > { %p5970_p0 = pnand %p5969_p13, %p8965_p5 }
 0x553   : > { %p5971_p1 = pneg %p5970_p0 }
 0x555   : > { %p5976_p3 = pnand %p5974_p2, %p5971_p1 }
 0x557   : > { %5979 = shalt.err (!%p5976_p3)
}
 0x558   : > { %5804 = dma.vmem_to_hbm [thread:$0]  (%p8965_p5), %s5281_s16, 256, %s9013_s7, [#allocation4]  }
 0x559   : > { %6033 = dma.done.wait (%p8965_p5), [#allocation4], 256  }
 0x55a   : > { %6035 = vsyncadd (%p8965_p5), [#allocation4], 4294967040 }
 0x55b PF: > { %s18_s28 = sadd.s32 1, %s6054_s28   ;;  %s9400_s24 = smov %s6042_s25 }
 0x55c   : > { %p15_p4 = scmp.ge.s32.totalorder %s18_s28, 4   ;;  %s9401_s25 = smov %s6168_s10 }
 0x55d   : > { %s9402_s26 = smov %s6050_s27  ;;  %s9403_s27 = smov %s9405_s30 }
 0x55e   :  { %17 = sbr.rel (!%p15_p4) target bundleno = 3 (0x3), region = 187 }
 0x565   :  { %5293 = vsyncpa [#allocation4], 1 }
 0x566   :  { %5295 = vsyncpa [#allocation4 + $0x1], 1 }

</bundles_post_ra>
